<compile_context>
chip_gen: v5e
topology: v5e:2x2
jax: 0.10.0
libtpu: 0.0.40
codegen_flags: <defaults>
</compile_context>

<pallas_src>
import jax
import jax.numpy as jnp
from jax.experimental import pallas as pl
from jax.experimental.pallas import tpu as pltpu

_LANE = 128


def _round_up(x, m):
    return (x + m - 1) // m * m


def _double_conv_kernel(x_ref, w1_ref, b1_ref, w2_ref, b2_ref, o_ref,
                        pad_ref, col_ref):
    """Fused (conv3x3 -> BN -> ReLU) x 2 for one batch element (NHWC).

    x_ref : (1, H, W, Cin)            input tile (unpadded)
    w1_ref: (9*Cin,    Cmid_p)        conv1 weights with BN1 scale folded in
    b1_ref: (1, Cmid_p)               folded BN1 bias
    w2_ref: (9*Cmid_p, Cout_p)        conv2 weights with BN2 scale folded in
    b2_ref: (1, Cout_p)               folded BN2 bias
    o_ref : (1, H, W, Cout_p)         output tile (lane-dense)

    VMEM scratch (shared across both stages):
    pad_ref: (H+2, W+2, max(Cin, Cmid_p))   zero-halo buffer
    col_ref: (H*W, 9*max(Cin, Cmid_p))      im2col slab
    """
    H, W = o_ref.shape[1], o_ref.shape[2]
    cin = x_ref.shape[3]
    cmid_p = w1_ref.shape[1]
    cout_p = o_ref.shape[3]
    cpad = pad_ref.shape[2]
    k1 = 9 * cin
    k2 = 9 * cmid_p

    # ---- zero only the 1-px halo border (interior is fully overwritten). ----
    pad_ref[0:1, :, :] = jnp.zeros((1, W + 2, cpad), jnp.float32)
    pad_ref[H + 1:H + 2, :, :] = jnp.zeros((1, W + 2, cpad), jnp.float32)
    pad_ref[1:H + 1, 0:1, :] = jnp.zeros((H, 1, cpad), jnp.float32)
    pad_ref[1:H + 1, W + 1:W + 2, :] = jnp.zeros((H, 1, cpad), jnp.float32)

    # ---- conv1 -> BN1 -> ReLU -------------------------------------------------
    pad_ref[1:H + 1, 1:W + 1, :cin] = x_ref[0]
    for t in range(9):                       # static, unrolled
        dy, dx = t // 3, t % 3
        col_ref[:, t * cin:(t + 1) * cin] = (
            pad_ref[dy:dy + H, dx:dx + W, :cin].reshape(H * W, cin))
    h = jnp.dot(col_ref[:, :k1], w1_ref[...],
                preferred_element_type=jnp.float32)
    h = jnp.maximum(h + b1_ref[...], 0.0)    # BN1 scale already in w1

    # ---- conv2 -> BN2 -> ReLU (intermediate stays resident in VMEM) ----------
    pad_ref[1:H + 1, 1:W + 1, :cmid_p] = h.reshape(H, W, cmid_p)
    for t in range(9):
        dy, dx = t // 3, t % 3
        col_ref[:, t * cmid_p:(t + 1) * cmid_p] = (
            pad_ref[dy:dy + H, dx:dx + W, :cmid_p].reshape(H * W, cmid_p))
    y = jnp.dot(col_ref[:, :k2], w2_ref[...],
                preferred_element_type=jnp.float32)
    y = jnp.maximum(y + b2_ref[...], 0.0)    # BN2 scale already in w2

    # Lane-dense store: last dim is a multiple of 128.
    o_ref[...] = y.reshape(1, H, W, cout_p).astype(o_ref.dtype)


def _vmem_estimate_bytes(H, W, cin, cmid_p, cout_p):
    """Rough lane/sublane-rounded VMEM working-set estimate (f32)."""
    def arr(*shape):
        s = list(shape)
        s[-1] = _round_up(s[-1], _LANE)
        if len(s) >= 2:
            s[-2] = _round_up(s[-2], 8)
        n = 1
        for d in s:
            n *= d
        return n * 4

    cpad = max(cin, cmid_p)
    scratch = arr(H + 2, W + 2, cpad) + arr(H * W, 9 * cpad)
    io = 2 * (arr(1, H, W, cin) + arr(1, H, W, cout_p))     # double-buffered
    wts = (arr(9 * cin, cmid_p) + arr(1, cmid_p)
           + arr(9 * cmid_p, cout_p) + arr(1, cout_p))
    return scratch + io + wts


def _fused_double_conv_nhwc(x_nhwc, w1p, b1p, w2p, b2p):
    """x_nhwc: (N,H,W,Cin). Returns (N,H,W,Cout_p) float32."""
    N, H, W, cin = x_nhwc.shape
    cmid_p = w1p.shape[1]
    cout_p = w2p.shape[1]
    cpad = max(cin, cmid_p)

    est = _vmem_estimate_bytes(H, W, cin, cmid_p, cout_p)
    vmem_limit = min(max(2 * est, 32 * 1024 * 1024), 64 * 1024 * 1024)

    return pl.pallas_call(
        _double_conv_kernel,
        out_shape=jax.ShapeDtypeStruct((N, H, W, cout_p), jnp.float32),
        grid=(N,),
        in_specs=[
            pl.BlockSpec((1, H, W, cin), lambda b: (b, 0, 0, 0)),
            # Constant index_map -> weights stay resident in VMEM across grid.
            pl.BlockSpec(w1p.shape, lambda b: (0, 0)),
            pl.BlockSpec(b1p.shape, lambda b: (0, 0)),
            pl.BlockSpec(w2p.shape, lambda b: (0, 0)),
            pl.BlockSpec(b2p.shape, lambda b: (0, 0)),
        ],
        out_specs=pl.BlockSpec((1, H, W, cout_p), lambda b: (b, 0, 0, 0)),
        scratch_shapes=[
            pltpu.VMEM((H + 2, W + 2, cpad), jnp.float32),   # shared halo buf
            pltpu.VMEM((H * W, 9 * cpad), jnp.float32),      # shared im2col
        ],
        compiler_params=pltpu.CompilerParams(
            dimension_semantics=("parallel",),   # v7x: split batch over 2 TCs
            vmem_limit_bytes=vmem_limit),
    )(x_nhwc, w1p, b1p, w2p, b2p)


def _fold_bn(gamma, beta, mean, var, eps=1e-5):
    scale = gamma * jax.lax.rsqrt(var + eps)
    bias = beta - mean * scale
    return scale.astype(jnp.float32), bias.astype(jnp.float32)


def _pack_conv_bn(w, gamma, beta, mean, var, cin_p, cout_p, eps=1e-5):
    """w: (3,3,Cin,Cout) HWIO -> ((9*cin_p, cout_p) folded weights, (1,cout_p) bias).

    Inference-BN scale folded into the weights; zero rows/cols pad the channel
    dims so the kernel's zero-halo / padded output lanes stay exact.
    """
    kh, kw, cin, cout = w.shape
    scale, bias = _fold_bn(gamma, beta, mean, var, eps)
    wf = (w * scale[None, None, None, :]).astype(jnp.float32)
    wp = jnp.zeros((kh, kw, cin_p, cout_p), jnp.float32)
    wp = wp.at[:, :, :cin, :cout].set(wf)
    bp = jnp.zeros((1, cout_p), jnp.float32).at[0, :cout].set(bias)
    return wp.reshape(kh * kw * cin_p, cout_p), bp


@jax.jit
def double_conv(x_nchw, params):
    """Forward pass of DoubleConv; x is NCHW (PyTorch layout)."""
    x = jnp.transpose(x_nchw, (0, 2, 3, 1)).astype(jnp.float32)  # -> NHWC
    cin = x.shape[-1]
    cout = params["w2"].shape[-1]
    cmid_p = _round_up(params["w1"].shape[-1], _LANE)
    cout_p = _round_up(cout, _LANE)

    w1p, b1p = _pack_conv_bn(params["w1"], params["gamma1"], params["beta1"],
                             params["mean1"], params["var1"],
                             cin_p=cin, cout_p=cmid_p)
    w2p, b2p = _pack_conv_bn(params["w2"], params["gamma2"], params["beta2"],
                             params["mean2"], params["var2"],
                             cin_p=cmid_p, cout_p=cout_p)

    y = _fused_double_conv_nhwc(x, w1p, b1p, w2p, b2p)
    y = y[..., :cout]                         # drop lane padding
    return jnp.transpose(y, (0, 3, 1, 2))     # back to NCHW


def reference_double_conv(x_nchw, params):
    """Pure-JAX reference (lax conv) for correctness check."""
    def step(x, w_hwio, scale, bias):
        w_oihw = jnp.transpose(w_hwio, (3, 2, 0, 1))
        y = jax.lax.conv_general_dilated(
            x, w_oihw, window_strides=(1, 1), padding=((1, 1), (1, 1)),
            dimension_numbers=("NCHW", "OIHW", "NCHW"))
        y = y * scale[None, :, None, None] + bias[None, :, None, None]
        return jnp.maximum(y, 0.0)

    s1, b1 = _fold_bn(params["gamma1"], params["beta1"],
                      params["mean1"], params["var1"])
    s2, b2 = _fold_bn(params["gamma2"], params["beta2"],
                      params["mean2"], params["var2"])
    h = step(x_nchw.astype(jnp.float32), params["w1"], s1, b1)
    return step(h, params["w2"], s2, b2)


def make_params(key, in_channels, mid_channels, out_channels):
    k1, k2 = jax.random.split(key)
    w1 = 0.1 * jax.random.normal(k1, (3, 3, in_channels, mid_channels),
                                 dtype=jnp.float32)
    w2 = 0.1 * jax.random.normal(k2, (3, 3, mid_channels, out_channels),
                                 dtype=jnp.float32)
    return {
        "w1": w1,
        "w2": w2,
        "gamma1": 1.0 + 0.1 * jnp.arange(mid_channels, dtype=jnp.float32),
        "beta1": 0.05 * jnp.arange(mid_channels, dtype=jnp.float32),
        "mean1": 0.01 * jnp.arange(mid_channels, dtype=jnp.float32),
        "var1": 1.0 + 0.02 * jnp.arange(mid_channels, dtype=jnp.float32),
        "gamma2": 1.0 + 0.1 * jnp.arange(out_channels, dtype=jnp.float32),
        "beta2": 0.05 * jnp.arange(out_channels, dtype=jnp.float32),
        "mean2": 0.01 * jnp.arange(out_channels, dtype=jnp.float32),
        "var2": 1.0 + 0.02 * jnp.arange(out_channels, dtype=jnp.float32),
    }


if __name__ == "__main__":
    key = jax.random.PRNGKey(0)
    kx, kp = jax.random.split(key)

    N, C_in, H, W = 2, 4, 16, 16
    C_mid = C_out = 8  # mid_channels defaults to out_channels

    x = jax.random.normal(kx, (N, C_in, H, W), dtype=jnp.float32)
    params = make_params(kp, C_in, C_mid, C_out)

    out = jax.block_until_ready(double_conv(x, params))
    ref = reference_double_conv(x, params)

    assert out.shape == (N, C_out, H, W), out.shape
    err = float(jnp.max(jnp.abs(out - ref)))
    assert err < 1e-3, err
    print("KERNEL_OK")
</pallas_src>

<mosaic_0001>
module attributes {stable_mosaic.version = 11 : i64} {
  func.func @_double_conv_kernel(%arg0: i32, %arg1: memref<1x16x16x4xf32, #tpu.memory_space<vmem>>, %arg2: memref<36x128xf32, #tpu.memory_space<vmem>>, %arg3: memref<1x128xf32, #tpu.memory_space<vmem>>, %arg4: memref<1152x128xf32, #tpu.memory_space<vmem>>, %arg5: memref<1x128xf32, #tpu.memory_space<vmem>>, %arg6: memref<1x16x16x128xf32, #tpu.memory_space<vmem>>, %arg7: memref<18x18x128xf32, #tpu.memory_space<vmem>>, %arg8: memref<256x1152xf32, #tpu.memory_space<vmem>>) attributes {dimension_semantics = [#tpu.dimension_semantics<parallel>], iteration_bounds = array<i64: 2>, scalar_prefetch = 0 : i64, scratch_operands = 2 : i64, tpu.core_type = #tpu.core_type<tc>, window_params = [{transform_indices = @transform_0, window_bounds = array<i64: 1, 16, 16, 4>}, {pipeline_mode = #tpu.pipeline_mode<synchronous>, transform_indices = @transform_1, window_bounds = array<i64: 36, 128>}, {pipeline_mode = #tpu.pipeline_mode<synchronous>, transform_indices = @transform_2, window_bounds = array<i64: 1, 128>}, {pipeline_mode = #tpu.pipeline_mode<synchronous>, transform_indices = @transform_3, window_bounds = array<i64: 1152, 128>}, {pipeline_mode = #tpu.pipeline_mode<synchronous>, transform_indices = @transform_4, window_bounds = array<i64: 1, 128>}, {transform_indices = @transform_5, window_bounds = array<i64: 1, 16, 16, 128>}]} {
    %cst = arith.constant 0.000000e+00 : f32
    %0 = vector.broadcast %cst : f32 to vector<1x18x128xf32>
    %c0 = arith.constant 0 : index
    %c0_0 = arith.constant 0 : index
    %c0_1 = arith.constant 0 : index
    %1 = vector.load %arg7[%c0, %c0_0, %c0_1] : memref<18x18x128xf32, #tpu.memory_space<vmem>>, vector<1x18x128xf32>
    tpu.vector_store %arg7[%c0, %c0_0, %c0_1], %0 {strides = array<i32>} : memref<18x18x128xf32, #tpu.memory_space<vmem>>, vector<1x18x128xf32>,
    %cst_2 = arith.constant 0.000000e+00 : f32
    %2 = vector.broadcast %cst_2 : f32 to vector<1x18x128xf32>
    %c17 = arith.constant 17 : index
    %c0_3 = arith.constant 0 : index
    %c0_4 = arith.constant 0 : index
    %3 = vector.load %arg7[%c17, %c0_3, %c0_4] : memref<18x18x128xf32, #tpu.memory_space<vmem>>, vector<1x18x128xf32>
    tpu.vector_store %arg7[%c17, %c0_3, %c0_4], %2 {strides = array<i32>} : memref<18x18x128xf32, #tpu.memory_space<vmem>>, vector<1x18x128xf32>,
    %cst_5 = arith.constant 0.000000e+00 : f32
    %4 = vector.broadcast %cst_5 : f32 to vector<16x1x128xf32>
    %c1 = arith.constant 1 : index
    %c0_6 = arith.constant 0 : index
    %c0_7 = arith.constant 0 : index
    %5 = vector.load %arg7[%c1, %c0_6, %c0_7] : memref<18x18x128xf32, #tpu.memory_space<vmem>>, vector<16x1x128xf32>
    tpu.vector_store %arg7[%c1, %c0_6, %c0_7], %4 {strides = array<i32>} : memref<18x18x128xf32, #tpu.memory_space<vmem>>, vector<16x1x128xf32>,
    %cst_8 = arith.constant 0.000000e+00 : f32
    %6 = vector.broadcast %cst_8 : f32 to vector<16x1x128xf32>
    %c1_9 = arith.constant 1 : index
    %c17_10 = arith.constant 17 : index
    %c0_11 = arith.constant 0 : index
    %7 = vector.load %arg7[%c1_9, %c17_10, %c0_11] : memref<18x18x128xf32, #tpu.memory_space<vmem>>, vector<16x1x128xf32>
    tpu.vector_store %arg7[%c1_9, %c17_10, %c0_11], %6 {strides = array<i32>} : memref<18x18x128xf32, #tpu.memory_space<vmem>>, vector<16x1x128xf32>,
    %c0_12 = arith.constant 0 : index
    %c0_13 = arith.constant 0 : index
    %c0_14 = arith.constant 0 : index
    %c0_15 = arith.constant 0 : index
    %8 = vector.load %arg1[%c0_12, %c0_13, %c0_14, %c0_15] : memref<1x16x16x4xf32, #tpu.memory_space<vmem>>, vector<1x16x16x4xf32>
    %9 = vector.shape_cast %8 : vector<1x16x16x4xf32> to vector<16x16x4xf32>
    %c1_16 = arith.constant 1 : index
    %c1_17 = arith.constant 1 : index
    %c0_18 = arith.constant 0 : index
    %10 = vector.load %arg7[%c1_16, %c1_17, %c0_18] : memref<18x18x128xf32, #tpu.memory_space<vmem>>, vector<16x16x4xf32>
    tpu.vector_store %arg7[%c1_16, %c1_17, %c0_18], %9 {strides = array<i32>} : memref<18x18x128xf32, #tpu.memory_space<vmem>>, vector<16x16x4xf32>,
    %c0_19 = arith.constant 0 : index
    %c0_20 = arith.constant 0 : index
    %c0_21 = arith.constant 0 : index
    %11 = vector.load %arg7[%c0_19, %c0_20, %c0_21] : memref<18x18x128xf32, #tpu.memory_space<vmem>>, vector<16x16x4xf32>
    %12 = vector.shape_cast %11 : vector<16x16x4xf32> to vector<256x4xf32>
    %c0_22 = arith.constant 0 : index
    %c0_23 = arith.constant 0 : index
    %13 = vector.load %arg8[%c0_22, %c0_23] : memref<256x1152xf32, #tpu.memory_space<vmem>>, vector<256x4xf32>
    tpu.vector_store %arg8[%c0_22, %c0_23], %12 {strides = array<i32>} : memref<256x1152xf32, #tpu.memory_space<vmem>>, vector<256x4xf32>,
    %c0_24 = arith.constant 0 : index
    %c1_25 = arith.constant 1 : index
    %c0_26 = arith.constant 0 : index
    %14 = vector.load %arg7[%c0_24, %c1_25, %c0_26] : memref<18x18x128xf32, #tpu.memory_space<vmem>>, vector<16x16x4xf32>
    %15 = vector.shape_cast %14 : vector<16x16x4xf32> to vector<256x4xf32>
    %c0_27 = arith.constant 0 : index
    %c4 = arith.constant 4 : index
    %16 = vector.load %arg8[%c0_27, %c4] : memref<256x1152xf32, #tpu.memory_space<vmem>>, vector<256x4xf32>
    tpu.vector_store %arg8[%c0_27, %c4], %15 {strides = array<i32>} : memref<256x1152xf32, #tpu.memory_space<vmem>>, vector<256x4xf32>,
    %c0_28 = arith.constant 0 : index
    %c2 = arith.constant 2 : index
    %c0_29 = arith.constant 0 : index
    %17 = vector.load %arg7[%c0_28, %c2, %c0_29] : memref<18x18x128xf32, #tpu.memory_space<vmem>>, vector<16x16x4xf32>
    %18 = vector.shape_cast %17 : vector<16x16x4xf32> to vector<256x4xf32>
    %c0_30 = arith.constant 0 : index
    %c8 = arith.constant 8 : index
    %19 = vector.load %arg8[%c0_30, %c8] : memref<256x1152xf32, #tpu.memory_space<vmem>>, vector<256x4xf32>
    tpu.vector_store %arg8[%c0_30, %c8], %18 {strides = array<i32>} : memref<256x1152xf32, #tpu.memory_space<vmem>>, vector<256x4xf32>,
    %c1_31 = arith.constant 1 : index
    %c0_32 = arith.constant 0 : index
    %c0_33 = arith.constant 0 : index
    %20 = vector.load %arg7[%c1_31, %c0_32, %c0_33] : memref<18x18x128xf32, #tpu.memory_space<vmem>>, vector<16x16x4xf32>
    %21 = vector.shape_cast %20 : vector<16x16x4xf32> to vector<256x4xf32>
    %c0_34 = arith.constant 0 : index
    %c12 = arith.constant 12 : index
    %22 = vector.load %arg8[%c0_34, %c12] : memref<256x1152xf32, #tpu.memory_space<vmem>>, vector<256x4xf32>
    tpu.vector_store %arg8[%c0_34, %c12], %21 {strides = array<i32>} : memref<256x1152xf32, #tpu.memory_space<vmem>>, vector<256x4xf32>,
    %c1_35 = arith.constant 1 : index
    %c1_36 = arith.constant 1 : index
    %c0_37 = arith.constant 0 : index
    %23 = vector.load %arg7[%c1_35, %c1_36, %c0_37] : memref<18x18x128xf32, #tpu.memory_space<vmem>>, vector<16x16x4xf32>
    %24 = vector.shape_cast %23 : vector<16x16x4xf32> to vector<256x4xf32>
    %c0_38 = arith.constant 0 : index
    %c16 = arith.constant 16 : index
    %25 = vector.load %arg8[%c0_38, %c16] : memref<256x1152xf32, #tpu.memory_space<vmem>>, vector<256x4xf32>
    tpu.vector_store %arg8[%c0_38, %c16], %24 {strides = array<i32>} : memref<256x1152xf32, #tpu.memory_space<vmem>>, vector<256x4xf32>,
    %c1_39 = arith.constant 1 : index
    %c2_40 = arith.constant 2 : index
    %c0_41 = arith.constant 0 : index
    %26 = vector.load %arg7[%c1_39, %c2_40, %c0_41] : memref<18x18x128xf32, #tpu.memory_space<vmem>>, vector<16x16x4xf32>
    %27 = vector.shape_cast %26 : vector<16x16x4xf32> to vector<256x4xf32>
    %c0_42 = arith.constant 0 : index
    %c20 = arith.constant 20 : index
    %28 = vector.load %arg8[%c0_42, %c20] : memref<256x1152xf32, #tpu.memory_space<vmem>>, vector<256x4xf32>
    tpu.vector_store %arg8[%c0_42, %c20], %27 {strides = array<i32>} : memref<256x1152xf32, #tpu.memory_space<vmem>>, vector<256x4xf32>,
    %c2_43 = arith.constant 2 : index
    %c0_44 = arith.constant 0 : index
    %c0_45 = arith.constant 0 : index
    %29 = vector.load %arg7[%c2_43, %c0_44, %c0_45] : memref<18x18x128xf32, #tpu.memory_space<vmem>>, vector<16x16x4xf32>
    %30 = vector.shape_cast %29 : vector<16x16x4xf32> to vector<256x4xf32>
    %c0_46 = arith.constant 0 : index
    %c24 = arith.constant 24 : index
    %31 = vector.load %arg8[%c0_46, %c24] : memref<256x1152xf32, #tpu.memory_space<vmem>>, vector<256x4xf32>
    tpu.vector_store %arg8[%c0_46, %c24], %30 {strides = array<i32>} : memref<256x1152xf32, #tpu.memory_space<vmem>>, vector<256x4xf32>,
    %c2_47 = arith.constant 2 : index
    %c1_48 = arith.constant 1 : index
    %c0_49 = arith.constant 0 : index
    %32 = vector.load %arg7[%c2_47, %c1_48, %c0_49] : memref<18x18x128xf32, #tpu.memory_space<vmem>>, vector<16x16x4xf32>
    %33 = vector.shape_cast %32 : vector<16x16x4xf32> to vector<256x4xf32>
    %c0_50 = arith.constant 0 : index
    %c28 = arith.constant 28 : index
    %34 = vector.load %arg8[%c0_50, %c28] : memref<256x1152xf32, #tpu.memory_space<vmem>>, vector<256x4xf32>
    tpu.vector_store %arg8[%c0_50, %c28], %33 {strides = array<i32>} : memref<256x1152xf32, #tpu.memory_space<vmem>>, vector<256x4xf32>,
    %c2_51 = arith.constant 2 : index
    %c2_52 = arith.constant 2 : index
    %c0_53 = arith.constant 0 : index
    %35 = vector.load %arg7[%c2_51, %c2_52, %c0_53] : memref<18x18x128xf32, #tpu.memory_space<vmem>>, vector<16x16x4xf32>
    %36 = vector.shape_cast %35 : vector<16x16x4xf32> to vector<256x4xf32>
    %c0_54 = arith.constant 0 : index
    %c32 = arith.constant 32 : index
    %37 = vector.load %arg8[%c0_54, %c32] : memref<256x1152xf32, #tpu.memory_space<vmem>>, vector<256x4xf32>
    tpu.vector_store %arg8[%c0_54, %c32], %36 {strides = array<i32>} : memref<256x1152xf32, #tpu.memory_space<vmem>>, vector<256x4xf32>,
    %c0_55 = arith.constant 0 : index
    %c0_56 = arith.constant 0 : index
    %38 = vector.load %arg8[%c0_55, %c0_56] : memref<256x1152xf32, #tpu.memory_space<vmem>>, vector<256x36xf32>
    %c0_57 = arith.constant 0 : index
    %c0_58 = arith.constant 0 : index
    %39 = vector.load %arg2[%c0_57, %c0_58] : memref<36x128xf32, #tpu.memory_space<vmem>>, vector<36x128xf32>
    %cst_59 = arith.constant dense<0.000000e+00> : vector<256x128xf32>
    %40 = tpu.matmul %38, %39, %cst_59 {dimension_numbers = #tpu.dot_dimension_numbers<[1], [0], [0], [1], [0, 0, 1, 1], [], []>} : vector<256x36xf32>, vector<36x128xf32>, vector<256x128xf32> -> vector<256x128xf32>
    %c0_60 = arith.constant 0 : index
    %c0_61 = arith.constant 0 : index
    %41 = vector.load %arg3[%c0_60, %c0_61] : memref<1x128xf32, #tpu.memory_space<vmem>>, vector<1x128xf32>
    %42 = vector.broadcast %41 : vector<1x128xf32> to vector<256x128xf32>
    %43 = arith.addf %40, %42 : vector<256x128xf32>
    %cst_62 = arith.constant 0.000000e+00 : f32
    %44 = vector.broadcast %cst_62 : f32 to vector<256x128xf32>
    %45 = arith.maximumf %43, %44 : vector<256x128xf32>
    %46 = vector.shape_cast %45 : vector<256x128xf32> to vector<16x16x128xf32>
    %c1_63 = arith.constant 1 : index
    %c1_64 = arith.constant 1 : index
    %c0_65 = arith.constant 0 : index
    %47 = vector.load %arg7[%c1_63, %c1_64, %c0_65] : memref<18x18x128xf32, #tpu.memory_space<vmem>>, vector<16x16x128xf32>
    tpu.vector_store %arg7[%c1_63, %c1_64, %c0_65], %46 {strides = array<i32>} : memref<18x18x128xf32, #tpu.memory_space<vmem>>, vector<16x16x128xf32>,
    %c0_66 = arith.constant 0 : index
    %c0_67 = arith.constant 0 : index
    %c0_68 = arith.constant 0 : index
    %48 = vector.load %arg7[%c0_66, %c0_67, %c0_68] : memref<18x18x128xf32, #tpu.memory_space<vmem>>, vector<16x16x128xf32>
    %49 = vector.shape_cast %48 : vector<16x16x128xf32> to vector<256x128xf32>
    %c0_69 = arith.constant 0 : index
    %c0_70 = arith.constant 0 : index
    %50 = vector.load %arg8[%c0_69, %c0_70] : memref<256x1152xf32, #tpu.memory_space<vmem>>, vector<256x128xf32>
    tpu.vector_store %arg8[%c0_69, %c0_70], %49 {strides = array<i32>} : memref<256x1152xf32, #tpu.memory_space<vmem>>, vector<256x128xf32>,
    %c0_71 = arith.constant 0 : index
    %c1_72 = arith.constant 1 : index
    %c0_73 = arith.constant 0 : index
    %51 = vector.load %arg7[%c0_71, %c1_72, %c0_73] : memref<18x18x128xf32, #tpu.memory_space<vmem>>, vector<16x16x128xf32>
    %52 = vector.shape_cast %51 : vector<16x16x128xf32> to vector<256x128xf32>
    %c0_74 = arith.constant 0 : index
    %c128 = arith.constant 128 : index
    %53 = vector.load %arg8[%c0_74, %c128] : memref<256x1152xf32, #tpu.memory_space<vmem>>, vector<256x128xf32>
    tpu.vector_store %arg8[%c0_74, %c128], %52 {strides = array<i32>} : memref<256x1152xf32, #tpu.memory_space<vmem>>, vector<256x128xf32>,
    %c0_75 = arith.constant 0 : index
    %c2_76 = arith.constant 2 : index
    %c0_77 = arith.constant 0 : index
    %54 = vector.load %arg7[%c0_75, %c2_76, %c0_77] : memref<18x18x128xf32, #tpu.memory_space<vmem>>, vector<16x16x128xf32>
    %55 = vector.shape_cast %54 : vector<16x16x128xf32> to vector<256x128xf32>
    %c0_78 = arith.constant 0 : index
    %c256 = arith.constant 256 : index
    %56 = vector.load %arg8[%c0_78, %c256] : memref<256x1152xf32, #tpu.memory_space<vmem>>, vector<256x128xf32>
    tpu.vector_store %arg8[%c0_78, %c256], %55 {strides = array<i32>} : memref<256x1152xf32, #tpu.memory_space<vmem>>, vector<256x128xf32>,
    %c1_79 = arith.constant 1 : index
    %c0_80 = arith.constant 0 : index
    %c0_81 = arith.constant 0 : index
    %57 = vector.load %arg7[%c1_79, %c0_80, %c0_81] : memref<18x18x128xf32, #tpu.memory_space<vmem>>, vector<16x16x128xf32>
    %58 = vector.shape_cast %57 : vector<16x16x128xf32> to vector<256x128xf32>
    %c0_82 = arith.constant 0 : index
    %c384 = arith.constant 384 : index
    %59 = vector.load %arg8[%c0_82, %c384] : memref<256x1152xf32, #tpu.memory_space<vmem>>, vector<256x128xf32>
    tpu.vector_store %arg8[%c0_82, %c384], %58 {strides = array<i32>} : memref<256x1152xf32, #tpu.memory_space<vmem>>, vector<256x128xf32>,
    %c1_83 = arith.constant 1 : index
    %c1_84 = arith.constant 1 : index
    %c0_85 = arith.constant 0 : index
    %60 = vector.load %arg7[%c1_83, %c1_84, %c0_85] : memref<18x18x128xf32, #tpu.memory_space<vmem>>, vector<16x16x128xf32>
    %61 = vector.shape_cast %60 : vector<16x16x128xf32> to vector<256x128xf32>
    %c0_86 = arith.constant 0 : index
    %c512 = arith.constant 512 : index
    %62 = vector.load %arg8[%c0_86, %c512] : memref<256x1152xf32, #tpu.memory_space<vmem>>, vector<256x128xf32>
    tpu.vector_store %arg8[%c0_86, %c512], %61 {strides = array<i32>} : memref<256x1152xf32, #tpu.memory_space<vmem>>, vector<256x128xf32>,
    %c1_87 = arith.constant 1 : index
    %c2_88 = arith.constant 2 : index
    %c0_89 = arith.constant 0 : index
    %63 = vector.load %arg7[%c1_87, %c2_88, %c0_89] : memref<18x18x128xf32, #tpu.memory_space<vmem>>, vector<16x16x128xf32>
    %64 = vector.shape_cast %63 : vector<16x16x128xf32> to vector<256x128xf32>
    %c0_90 = arith.constant 0 : index
    %c640 = arith.constant 640 : index
    %65 = vector.load %arg8[%c0_90, %c640] : memref<256x1152xf32, #tpu.memory_space<vmem>>, vector<256x128xf32>
    tpu.vector_store %arg8[%c0_90, %c640], %64 {strides = array<i32>} : memref<256x1152xf32, #tpu.memory_space<vmem>>, vector<256x128xf32>,
    %c2_91 = arith.constant 2 : index
    %c0_92 = arith.constant 0 : index
    %c0_93 = arith.constant 0 : index
    %66 = vector.load %arg7[%c2_91, %c0_92, %c0_93] : memref<18x18x128xf32, #tpu.memory_space<vmem>>, vector<16x16x128xf32>
    %67 = vector.shape_cast %66 : vector<16x16x128xf32> to vector<256x128xf32>
    %c0_94 = arith.constant 0 : index
    %c768 = arith.constant 768 : index
    %68 = vector.load %arg8[%c0_94, %c768] : memref<256x1152xf32, #tpu.memory_space<vmem>>, vector<256x128xf32>
    tpu.vector_store %arg8[%c0_94, %c768], %67 {strides = array<i32>} : memref<256x1152xf32, #tpu.memory_space<vmem>>, vector<256x128xf32>,
    %c2_95 = arith.constant 2 : index
    %c1_96 = arith.constant 1 : index
    %c0_97 = arith.constant 0 : index
    %69 = vector.load %arg7[%c2_95, %c1_96, %c0_97] : memref<18x18x128xf32, #tpu.memory_space<vmem>>, vector<16x16x128xf32>
    %70 = vector.shape_cast %69 : vector<16x16x128xf32> to vector<256x128xf32>
    %c0_98 = arith.constant 0 : index
    %c896 = arith.constant 896 : index
    %71 = vector.load %arg8[%c0_98, %c896] : memref<256x1152xf32, #tpu.memory_space<vmem>>, vector<256x128xf32>
    tpu.vector_store %arg8[%c0_98, %c896], %70 {strides = array<i32>} : memref<256x1152xf32, #tpu.memory_space<vmem>>, vector<256x128xf32>,
    %c2_99 = arith.constant 2 : index
    %c2_100 = arith.constant 2 : index
    %c0_101 = arith.constant 0 : index
    %72 = vector.load %arg7[%c2_99, %c2_100, %c0_101] : memref<18x18x128xf32, #tpu.memory_space<vmem>>, vector<16x16x128xf32>
    %73 = vector.shape_cast %72 : vector<16x16x128xf32> to vector<256x128xf32>
    %c0_102 = arith.constant 0 : index
    %c1024 = arith.constant 1024 : index
    %74 = vector.load %arg8[%c0_102, %c1024] : memref<256x1152xf32, #tpu.memory_space<vmem>>, vector<256x128xf32>
    tpu.vector_store %arg8[%c0_102, %c1024], %73 {strides = array<i32>} : memref<256x1152xf32, #tpu.memory_space<vmem>>, vector<256x128xf32>,
    %c0_103 = arith.constant 0 : index
    %c0_104 = arith.constant 0 : index
    %75 = vector.load %arg8[%c0_103, %c0_104] : memref<256x1152xf32, #tpu.memory_space<vmem>>, vector<256x1152xf32>
    %c0_105 = arith.constant 0 : index
    %c0_106 = arith.constant 0 : index
    %76 = vector.load %arg4[%c0_105, %c0_106] : memref<1152x128xf32, #tpu.memory_space<vmem>>, vector<1152x128xf32>
    %cst_107 = arith.constant dense<0.000000e+00> : vector<256x128xf32>
    %77 = tpu.matmul %75, %76, %cst_107 {dimension_numbers = #tpu.dot_dimension_numbers<[1], [0], [0], [1], [0, 0, 1, 1], [], []>} : vector<256x1152xf32>, vector<1152x128xf32>, vector<256x128xf32> -> vector<256x128xf32>
    %c0_108 = arith.constant 0 : index
    %c0_109 = arith.constant 0 : index
    %78 = vector.load %arg5[%c0_108, %c0_109] : memref<1x128xf32, #tpu.memory_space<vmem>>, vector<1x128xf32>
    %79 = vector.broadcast %78 : vector<1x128xf32> to vector<256x128xf32>
    %80 = arith.addf %77, %79 : vector<256x128xf32>
    %cst_110 = arith.constant 0.000000e+00 : f32
    %81 = vector.broadcast %cst_110 : f32 to vector<256x128xf32>
    %82 = arith.maximumf %80, %81 : vector<256x128xf32>
    %83 = vector.shape_cast %82 : vector<256x128xf32> to vector<1x16x16x128xf32>
    %c0_111 = arith.constant 0 : index
    %c0_112 = arith.constant 0 : index
    %c0_113 = arith.constant 0 : index
    %c0_114 = arith.constant 0 : index
    %84 = vector.load %arg6[%c0_111, %c0_112, %c0_113, %c0_114] : memref<1x16x16x128xf32, #tpu.memory_space<vmem>>, vector<1x16x16x128xf32>
    tpu.vector_store %arg6[%c0_111, %c0_112, %c0_113, %c0_114], %83 {strides = array<i32>} : memref<1x16x16x128xf32, #tpu.memory_space<vmem>>, vector<1x16x16x128xf32>,
    return
  }
  func.func @transform_0(%arg0: i32) -> (i32, i32, i32, i32) {
    %c0_i32 = arith.constant 0 : i32
    %c0_i32_0 = arith.constant 0 : i32
    %c0_i32_1 = arith.constant 0 : i32
    %c0_i32_2 = arith.constant 0 : i32
    return %arg0, %c0_i32, %c0_i32_0, %c0_i32_1 : i32, i32, i32, i32
  }
  func.func @transform_1(%arg0: i32) -> (i32, i32) {
    %c0_i32 = arith.constant 0 : i32
    %c0_i32_0 = arith.constant 0 : i32
    %c0_i32_1 = arith.constant 0 : i32
    return %c0_i32, %c0_i32_0 : i32, i32
  }
  func.func @transform_2(%arg0: i32) -> (i32, i32) {
    %c0_i32 = arith.constant 0 : i32
    %c0_i32_0 = arith.constant 0 : i32
    %c0_i32_1 = arith.constant 0 : i32
    return %c0_i32, %c0_i32_0 : i32, i32
  }
  func.func @transform_3(%arg0: i32) -> (i32, i32) {
    %c0_i32 = arith.constant 0 : i32
    %c0_i32_0 = arith.constant 0 : i32
    %c0_i32_1 = arith.constant 0 : i32
    return %c0_i32, %c0_i32_0 : i32, i32
  }
  func.func @transform_4(%arg0: i32) -> (i32, i32) {
    %c0_i32 = arith.constant 0 : i32
    %c0_i32_0 = arith.constant 0 : i32
    %c0_i32_1 = arith.constant 0 : i32
    return %c0_i32, %c0_i32_0 : i32, i32
  }
  func.func @transform_5(%arg0: i32) -> (i32, i32, i32, i32) {
    %c0_i32 = arith.constant 0 : i32
    %c0_i32_0 = arith.constant 0 : i32
    %c0_i32_1 = arith.constant 0 : i32
    %c0_i32_2 = arith.constant 0 : i32
    return %arg0, %c0_i32, %c0_i32_0, %c0_i32_1 : i32, i32, i32, i32
  }
}

</mosaic_0001>

<bundles_post_ra>
// kernel: double_conv.1
= control target key start
LH: loop header
LB: loop body
LE: loop exit
PB: predicated region body
PF: predicated region fallthrough
CT: control target
= control target key end

     0   :  { %s4690_s18 = smov 0   ;;  %s7361_s0 = inlined_call_operand.vmem [shape: f32[2,16,16,4], index: 0, kind: input, shape index: {}]   ;;  %s7362_s1 = inlined_call_operand.vmem [shape: f32[36,128], index: 1, kind: input, shape index: {}]   ;;  %s7363_s2 = inlined_call_operand.vmem [shape: f32[1,128], index: 2, kind: input, shape index: {}]   ;;  %s7364_s3 = inlined_call_operand.vmem [shape: f32[1152,128], index: 3, kind: input, shape index: {}]   ;;  %s7365_s4 = inlined_call_operand.vmem [shape: f32[1,128], index: 4, kind: input, shape index: {}]   ;;  %s7366_s5 = inlined_call_operand.vmem [shape: f32[2,16,16,128], index: 5, kind: output, shape index: {}]  }
   0x1 LB: > { %s4406_s19 = sadd.s32 4294967295, %s4649_s18   ;;  %p4410_p0 = scmp.ge.s32.totalorder %s4649_s18, 1  ;;  %s4649_s18 = sphi %s4690_s18, %s15_s18  }
   0x2   : > { %p187_p1 = scmp.lt.s32.totalorder %s4649_s18, 3 }
   0x4   : > { %p188_p2 = pnand %p4410_p0, %p187_p1 }
   0x6   : > { %191 = sbr.rel (%p188_p2) target bundleno = 1607 (0x647), region = 40 }
   0xb   : > { %v4651_v0 = vmov 0.0   ;;  %s4652_s20 = smov 4   ;;  %s4653_s21 = smov 8   ;;  %vm297_vm0 = vcmask 31744   ;;  %vm554_vm1 = vcmask 64544   ;;  %vm747_vm2 = vcmask 97344  }
   0xc   : > { %225 = vst [vmem:[#allocation2] sm:$0xff] %v4651_v0  ;;  %p215_p3 = scmp.lt.s32.totalorder %s4406_s19, 1  ;;  %s4654_s26 = smov 12   ;;  %v1975_v45 = vld [vmem:[%s7362_s1 + $0x20] sm:$0xf]  ;;  %vm2077_vm3 = vcmask 1043456  }
   0xd   : > { %226 = vst [vmem:[#allocation2 + $0x8] sm:$0xff] %v4651_v0  ;;  %s4655_s27 = smov 28   ;;  %s4656_s28 = smov 20   ;;  %v1974_v46 = vld [vmem:[%s7362_s1 + $0x18] sm:$0xff]  ;;  %4415 = vmatpush.msk.msra.mxu0 %vm2077_vm3, %v1975_v45  ;;  %4452 = vmatpush.msk.msra.mxu3 %vm2077_vm3, %v1975_v45  ;;  %v1973_v49 = vld [vmem:[%s7362_s1 + $0x10] sm:$0xff]  ;;  %v1972_v51 = vld [vmem:[%s7362_s1 + $0x8] sm:$0xff] }
   0xe   : > { %227 = vst [vmem:[#allocation2 + $0x10] sm:$0x3] %v4651_v0  ;;  %s7626_s19 = smov (!%p215_p3, %s4406_s19), 1  ;;  %s4657_s29 = smov 16   ;;  %v1971_v52 = vld [vmem:[%s7362_s1] sm:$0xff]  ;;  %vm940_vm4 = vcmask 130144  }
   0xf   : > { %229 = vst [vmem:[#allocation2 + $0x198] sm:$0xff] %v4651_v0  ;;  %s4450_s22 = sshll.u32 %s7626_s19, 8  ;;  %s4658_s30 = smov 24   ;;  %2093 = vmatpush.msra.mxu0 %v1974_v46  ;;  %4453 = vmatpush.msra.mxu3 %v1974_v46  ;;  %vm1133_vm5 = vcmask 162944   ;;  %vm1326_vm6 = vcmask 195744   ;;  %vm1520_vm7 = vcmask 228544  }
  0x10   : > { %230 = vst [vmem:[#allocation2 + $0x1a0] sm:$0xff] %v4651_v0  ;;  %s4745_s25 = scalar_lea.vmem %s7361_s0, %s4450_s22  ;;  %s4659_s6 = smov 32   ;;  %vm1713_vm8 = vcmask 261344   ;;  %vm1906_vm9 = vcmask 294144   ;;  %vm1980_vm10 = vcmask 293888   ;;  %v3136_v46 = vld [vmem:[%s7364_s3 + $0x70] sm:$0xff] }
  0x11   : > { %231 = vst [vmem:[#allocation2 + $0x1a8] sm:$0x3] %v4651_v0  ;;  %v265_v7 = vld [vmem:[%s4745_s25] sm:$0xff]  ;;  %v267_v8 = vld [vmem:[%s4745_s25 + $0x10] sm:$0xff]  ;;  %v268_v9 = vld [vmem:[%s4745_s25 + $0x18] sm:$0xff]  ;;  %2094 = vmatpush.msra.mxu0 %v1973_v49  ;;  %4454 = vmatpush.msra.mxu3 %v1973_v49 }
  0x12   : > { %233 = vst [vmem:[#allocation2 + $0x18] sm:$0x1] %v4651_v0  ;;  %v266_v10 = vld [vmem:[%s4745_s25 + $0x8] sm:$0xff]  ;;  %v269_v17 = vld [vmem:[%s4745_s25 + $0x20] sm:$0xff]  ;;  %v271_v29 = vld [vmem:[%s4745_s25 + $0x30] sm:$0xff] }
  0x13   : > { %234 = vst [vmem:[#allocation2 + $0x30] sm:$0x1] %v4651_v0  ;;  %v270_v19 = vld [vmem:[%s4745_s25 + $0x28] sm:$0xff]  ;;  %v272_v30 = vld [vmem:[%s4745_s25 + $0x38] sm:$0xff]  ;;  %v273_v42 = vld [vmem:[%s4745_s25 + $0x40] sm:$0xff]  ;;  %2095 = vmatpush.msra.mxu0 %v1972_v51  ;;  %4455 = vmatpush.msra.mxu3 %v1972_v51 }
  0x14   : > { %v394_v1 = vld [vmem:[#allocation2 + $0x1] sm:$0xff]  ;;  %235 = vst [vmem:[#allocation2 + $0x48] sm:$0x1] %v4651_v0 }
  0x15   : > { %v395_v2 = vld [vmem:[#allocation2 + $0x9] sm:$0xff]  ;;  %236 = vst [vmem:[#allocation2 + $0x60] sm:$0x1] %v4651_v0  ;;  %2096 = vmatpush.msra.mxu0 %v1971_v52  ;;  %4456 = vmatpush.msra.mxu3 %v1971_v52  ;;  %v3134_v51 = vld [vmem:[%s7364_s3 + $0x60] sm:$0xff] }
  0x16   : > { %v4506_v3 = vpack.i.bf16 %v395_v2, %v394_v1  ;;  %237 = vst [vmem:[#allocation2 + $0x78] sm:$0x1] %v4651_v0  ;;  %v587_v4 = vld [vmem:[#allocation2 + $0x2] sm:$0xff]  ;;  %v588_v5 = vld [vmem:[#allocation2 + $0xa] sm:$0xff] }
  0x17   : > { %238 = vst [vmem:[#allocation2 + $0x90] sm:$0x1] %v4651_v0  ;;  %v4511_v6 = vpack.i.bf16 %v588_v5, %v587_v4  ;;  %v274_v57 = vld [vmem:[%s4745_s25 + $0x48] sm:$0xff] }
  0x18   : > { %4507 = vrot.lane.b32.xlu0 %v4506_v3, %s4652_s20  ;;  %239 = vst [vmem:[#allocation2 + $0xa8] sm:$0x1] %v4651_v0  ;;  %v275_v3 = vld [vmem:[%s4745_s25 + $0x50] sm:$0xff]  ;;  %v3135_v49 = vld [vmem:[%s7364_s3 + $0x68] sm:$0xff] }
  0x19   : > { %240 = vst [vmem:[#allocation2 + $0xc0] sm:$0x1] %v4651_v0 }
  0x1a   : > { %241 = vst [vmem:[#allocation2 + $0xd8] sm:$0x1] %v4651_v0 }
  0x1b   : > { %242 = vst [vmem:[#allocation2 + $0xf0] sm:$0x1] %v4651_v0 }
  0x1c   : > { %243 = vst [vmem:[#allocation2 + $0x108] sm:$0x1] %v4651_v0 }
  0x1d   : > { %244 = vst [vmem:[#allocation2 + $0x120] sm:$0x1] %v4651_v0 }
  0x1e   : > { %245 = vst [vmem:[#allocation2 + $0x138] sm:$0x1] %v4651_v0 }
  0x1f   : > { %246 = vst [vmem:[#allocation2 + $0x150] sm:$0x1] %v4651_v0 }
  0x20   : > { %247 = vst [vmem:[#allocation2 + $0x168] sm:$0x1] %v4651_v0  ;;  %4512 = vrot.lane.b32.xlu0 %v4511_v6, %s4653_s21 }
  0x21   : > { %248 = vst [vmem:[#allocation2 + $0x180] sm:$0x1] %v4651_v0 }
  0x22   : > { %249 = vst [vmem:[#allocation2 + $0x29] sm:$0x1] %v4651_v0 }
  0x23   : > { %250 = vst [vmem:[#allocation2 + $0x41] sm:$0x1] %v4651_v0 }
  0x24   : > { %251 = vst [vmem:[#allocation2 + $0x59] sm:$0x1] %v4651_v0 }
  0x25   : > { %252 = vst [vmem:[#allocation2 + $0x71] sm:$0x1] %v4651_v0 }
  0x26   : > { %253 = vst [vmem:[#allocation2 + $0x89] sm:$0x1] %v4651_v0 }
  0x27   : > { %254 = vst [vmem:[#allocation2 + $0xa1] sm:$0x1] %v4651_v0 }
  0x28   : > { %255 = vst [vmem:[#allocation2 + $0xb9] sm:$0x1] %v4651_v0 }
  0x29   : > { %256 = vst [vmem:[#allocation2 + $0xd1] sm:$0x1] %v4651_v0 }
  0x2a   : > { %257 = vst [vmem:[#allocation2 + $0xe9] sm:$0x1] %v4651_v0 }
  0x2b   : > { %258 = vst [vmem:[#allocation2 + $0x101] sm:$0x1] %v4651_v0 }
  0x2c   : > { %259 = vst [vmem:[#allocation2 + $0x119] sm:$0x1] %v4651_v0 }
  0x2d   : > { %260 = vst [vmem:[#allocation2 + $0x131] sm:$0x1] %v4651_v0 }
  0x2e   : > { %261 = vst [vmem:[#allocation2 + $0x149] sm:$0x1] %v4651_v0 }
  0x2f   : > { %262 = vst [vmem:[#allocation2 + $0x161] sm:$0x1] %v4651_v0 }
  0x30   : > { %263 = vst [vmem:[#allocation2 + $0x179] sm:$0x1] %v4651_v0 }
  0x31   : > { %264 = vst [vmem:[#allocation2 + $0x191] sm:$0x1] %v4651_v0 }
  0x32   : > { %298 = vst.msk [vmem:[#allocation2 + $0x19] sm:$0xff] %vm297_vm0, %v265_v7 }
  0x33   : > { %300 = vst.msk [vmem:[#allocation2 + $0x31] sm:$0xff] %vm297_vm0, %v267_v8 }
  0x34   : > { %301 = vst.msk [vmem:[#allocation2 + $0x39] sm:$0xff] %vm297_vm0, %v268_v9  ;;  %v276_v9 = vld [vmem:[%s4745_s25 + $0x58] sm:$0xff] }
  0x35   : > { %299 = vst.msk [vmem:[#allocation2 + $0x21] sm:$0xff] %vm297_vm0, %v266_v10 }
  0x36   : > { %362 = vst.msk [vmem:[#allocation3] sm:$0xff] %vm297_vm0, %v4651_v0 }
  0x37   : > { %363 = vst.msk [vmem:[#allocation3 + $0x48] sm:$0xff] %vm297_vm0, %v4651_v0 }
  0x38   : > { %302 = vst.msk [vmem:[#allocation2 + $0x49] sm:$0xff] %vm297_vm0, %v269_v17 }
  0x39   : > { %v780_v11 = vld [vmem:[#allocation2 + $0x18] sm:$0xff]  ;;  %303 = vst.msk [vmem:[#allocation2 + $0x51] sm:$0xff] %vm297_vm0, %v270_v19 }
  0x3a   : > { %844 = vrot.lane.b32.xlu1 %v780_v11, %s4654_s26  ;;  %v1553_v12 = vld [vmem:[#allocation2 + $0x31] sm:$0xff]  ;;  %364 = vst.msk [vmem:[#allocation3 + $0x90] sm:$0xff] %vm297_vm0, %v780_v11  ;;  %v973_v15 = vld [vmem:[#allocation2 + $0x19] sm:$0xff] }
  0x3b   : > { %v1360_v13 = vld [vmem:[#allocation2 + $0x30] sm:$0xff]  ;;  %1617 = vrot.lane.b32.xlu0 %v1553_v12, %s4655_s27  ;;  %v4777_v21 = vld [vmem:[#allocation2 + $0x39] sm:$0xff]  ;;  %304 = vst.msk [vmem:[#allocation2 + $0x61] sm:$0xff] %vm297_vm0, %v271_v29 }
  0x3c   : > { %366 = vst.msk [vmem:[#allocation3 + $0x120] sm:$0xff] %vm297_vm0, %v1360_v13  ;;  %v1166_v14 = vld [vmem:[#allocation2 + $0x1a] sm:$0xff]  ;;  %v1746_v20 = vld [vmem:[#allocation2 + $0x32] sm:$0xff]  ;;  %v1167_v24 = vld [vmem:[#allocation2 + $0x22] sm:$0xff] }
  0x3d   : > { %1230 = vrot.lane.b32.xlu2 %v1166_v14, %s4656_s28  ;;  %v974_v16 = vld [vmem:[#allocation2 + $0x21] sm:$0xff]  ;;  %v1361_v23 = vld [vmem:[#allocation2 + $0x38] sm:$0xff]  ;;  %305 = vst.msk [vmem:[#allocation2 + $0x69] sm:$0xff] %vm297_vm0, %v272_v30 }
  0x3e   : > { %v781_v18 = vld [vmem:[#allocation2 + $0x20] sm:$0xff]  ;;  %367 = vst.msk [vmem:[#allocation3 + $0x168] sm:$0xff] %vm297_vm0, %v1361_v23 }
  0x3f   : > { %365 = vst.msk [vmem:[#allocation3 + $0xd8] sm:$0xff] %vm297_vm0, %v781_v18  ;;  %v1362_v22 = vld [vmem:[#allocation2 + $0x48] sm:$0xff]  ;;  %v1747_v25 = vld [vmem:[#allocation2 + $0x3a] sm:$0xff] }
  0x40   : > { %368 = vst.msk [vmem:[#allocation3 + $0x1b0] sm:$0xff] %vm297_vm0, %v1362_v22  ;;  %v4789_v26 = vld [vmem:[#allocation2 + $0x50] sm:$0xff] }
  0x41   : > { %369 = vst.msk [vmem:[#allocation3 + $0x1f8] sm:$0xff] %vm297_vm0, %v4789_v26  ;;  %v4795_v27 = vld [vmem:[#allocation2 + $0x4a] sm:$0xff]  ;;  %v4823_v32 = vld [vmem:[#allocation2 + $0x52] sm:$0xff] }
  0x42   : > { %1037 = vrot.lane.b32.xlu1 %v973_v15, %s4657_s29  ;;  %v4802_v28 = vld [vmem:[#allocation2 + $0x49] sm:$0xff]  ;;  %v4819_v31 = vld [vmem:[#allocation2 + $0x51] sm:$0xff]  ;;  %v4833_v34 = vld [vmem:[#allocation2 + $0x61] sm:$0xff]  ;;  %306 = vst.msk [vmem:[#allocation2 + $0x79] sm:$0xff] %vm297_vm0, %v273_v42 }
  0x43   : > { %1039 = vrot.lane.b32.xlu0 %v974_v16, %s4657_s29  ;;  %v1364_v36 = vld [vmem:[#allocation2 + $0x60] sm:$0xff]  ;;  %307 = vst.msk [vmem:[#allocation2 + $0x81] sm:$0xff] %vm297_vm0, %v274_v57 }
  0x44   : > { %v4825_v33 = vld [vmem:[#allocation2 + $0x68] sm:$0xff]  ;;  %370 = vst.msk [vmem:[#allocation3 + $0x240] sm:$0xff] %vm297_vm0, %v1364_v36 }
  0x45   : > { %1424 = vrot.lane.b32.xlu2 %v1360_v13, %s4658_s30  ;;  %371 = vst.msk [vmem:[#allocation3 + $0x288] sm:$0xff] %vm297_vm0, %v4825_v33  ;;  %v4849_v43 = vld [vmem:[#allocation2 + $0x62] sm:$0xff]  ;;  %v4871_v50 = vld [vmem:[#allocation2 + $0x6a] sm:$0xff] }
  0x46   : > { %v4888_v54 = vld [vmem:[#allocation2 + $0x69] sm:$0xff]  ;;  %308 = vst.msk [vmem:[#allocation2 + $0x91] sm:$0xff] %vm297_vm0, %v275_v3 }
  0x47   : > { %309 = vst.msk [vmem:[#allocation2 + $0x99] sm:$0xff] %vm297_vm0, %v276_v9  ;;  %v3125_v9 = vld [vmem:[%s7364_s3 + $0x18] sm:$0xff] }
  0x49   : > { %v4864_v47 = vld [vmem:[#allocation2 + $0x78] sm:$0xff] }
  0x4a   : > { %1810 = vrot.lane.b32.xlu1 %v1746_v20, %s4659_s6  ;;  %372 = vst.msk [vmem:[#allocation3 + $0x2d0] sm:$0xff] %vm297_vm0, %v4864_v47  ;;  %v4915_v1 = vld [vmem:[#allocation2 + $0x79] sm:$0xff]  ;;  %v4933_v10 = vld [vmem:[#allocation2 + $0x81] sm:$0xff] }
  0x4b   : > { %1619 = vrot.lane.b32.xlu0 %v4777_v21, %s4655_s27  ;;  %v4920_v4 = vld [vmem:[#allocation2 + $0x7a] sm:$0xff]  ;;  %v4958_v19 = vld [vmem:[#allocation2 + $0x82] sm:$0xff] }
  0x4c   : > { %v1367_v11 = vld [vmem:[#allocation2 + $0x80] sm:$0xff] }
  0x4d   : > { %846 = vrot.lane.b32.xlu2 %v781_v18, %s4654_s26  ;;  %373 = vst.msk [vmem:[#allocation3 + $0x318] sm:$0xff] %vm297_vm0, %v1367_v11  ;;  %v4988_v30 = vld [vmem:[#allocation2 + $0x91] sm:$0xff] }
  0x4e   : > { %v5020_v42 = vld [vmem:[#allocation2 + $0x99] sm:$0xff] }
  0x4f   : > { %v5029_v45 = vld [vmem:[#allocation2 + $0x9a] sm:$0xff] }
  0x52   : > { %1232 = vrot.lane.b32.xlu1 %v1167_v24, %s4656_s28 }
  0x53   : > { %655 = vrot.lane.b32.xlu0 %v1166_v14, %s4653_s21 }
  0x55   : > { %1426 = vrot.lane.b32.xlu2 %v1361_v23, %s4658_s30 }
  0x5a   : > { %1812 = vrot.lane.b32.xlu1 %v1747_v25, %s4659_s6 }
  0x5b   : > { %1234 = vrot.lane.b32.xlu0 %v1746_v20, %s4656_s28 }
  0x5d   : > { %462 = vrot.lane.b32.xlu2 %v973_v15, %s4652_s20 }
  0x62   : > { %848 = vrot.lane.b32.xlu1 %v1360_v13, %s4654_s26 }
  0x63   : > { %1814 = vrot.lane.b32.xlu0 %v4795_v27, %s4659_s6 }
  0x65   : > { %1041 = vrot.lane.b32.xlu2 %v1553_v12, %s4657_s29 }
  0x6a   : > { %1428 = vrot.lane.b32.xlu1 %v1362_v22, %s4658_s30 }
  0x6b   : > { %850 = vrot.lane.b32.xlu0 %v1361_v23, %s4654_s26 }
  0x6d   : > { %1621 = vrot.lane.b32.xlu2 %v4802_v28, %s4655_s27 }
  0x72   : > { %464 = vrot.lane.b32.xlu1 %v974_v16, %s4652_s20 }
  0x73   : > { %1430 = vrot.lane.b32.xlu0 %v4789_v26, %s4658_s30 }
  0x75   : > { %657 = vrot.lane.b32.xlu2 %v1167_v24, %s4653_s21  ;;  %v4970_v24 = vld [vmem:[#allocation2 + $0x98] sm:$0xff] }
  0x76   : > { %375 = vst.msk [vmem:[#allocation3 + $0x3a8] sm:$0xff] %vm297_vm0, %v4970_v24 }
  0x7a   : > { %1043 = vrot.lane.b32.xlu1 %v4777_v21, %s4657_s29 }
  0x7b   : > { %466 = vrot.lane.b32.xlu0 %v1553_v12, %s4652_s20  ;;  %v4941_v12 = vld [vmem:[#allocation2 + $0x90] sm:$0xff] }
  0x7c   : > { %374 = vst.msk [vmem:[#allocation3 + $0x360] sm:$0xff] %vm297_vm0, %v4941_v12 }
  0x7d   : > { %1236 = vrot.lane.b32.xlu2 %v1747_v25, %s4656_s28 }
  0x82   : > { %1623 = vrot.lane.b32.xlu1 %v4819_v31, %s4655_s27 }
  0x83   : > { %1045 = vrot.lane.b32.xlu0 %v4802_v28, %s4657_s29 }
  0x85   : > { %1816 = vrot.lane.b32.xlu2 %v4823_v32, %s4659_s6 }
  0x8a   : > { %659 = vrot.lane.b32.xlu1 %v1746_v20, %s4653_s21  ;;  %v4508_v35 = vpop.permute.xlu0 %4507 }
  0x8b   : > { %1625 = vrot.lane.b32.xlu0 %v4833_v34, %s4655_s27  ;;  %v4510_v37 = vunpack.i.h.bf16 %v4508_v35  ;;  %v4509_v38 = vunpack.i.l.bf16 %v4508_v35  ;;  %v278_v35 = vld [vmem:[%s4745_s25 + $0x68] sm:$0xff] }
  0x8c   : > { %311 = vst.msk [vmem:[#allocation2 + $0xb1] sm:$0xff] %vm297_vm0, %v278_v35 }
  0x8d   : > { %852 = vrot.lane.b32.xlu2 %v1362_v22, %s4654_s26  ;;  %555 = vst.msk [vmem:[#allocation3] sm:$0xff] %vm554_vm1, %v4509_v38 }
  0x8e   : > { %556 = vst.msk [vmem:[#allocation3 + $0x48] sm:$0xff] %vm554_vm1, %v4510_v37 }
  0x92   : > { %1238 = vrot.lane.b32.xlu1 %v4795_v27, %s4656_s28  ;;  %v4513_v39 = vpop.permute.xlu0 %4512 }
  0x93   : > { %661 = vrot.lane.b32.xlu0 %v1747_v25, %s4653_s21  ;;  %v4515_v40 = vunpack.i.h.bf16 %v4513_v39  ;;  %v4514_v41 = vunpack.i.l.bf16 %v4513_v39  ;;  %v4972_v25 = vld [vmem:[#allocation2 + $0x92] sm:$0xff] }
  0x95   : > { %1432 = vrot.lane.b32.xlu2 %v1364_v36, %s4658_s30  ;;  %748 = vst.msk [vmem:[#allocation3] sm:$0xff] %vm747_vm2, %v4514_v41 }
  0x96   : > { %749 = vst.msk [vmem:[#allocation3 + $0x48] sm:$0xff] %vm747_vm2, %v4515_v40 }
  0x97   : > { %v1231_v44 = vpop.permute.xlu2 %1230 }
  0x9a   : > { %1818 = vrot.lane.b32.xlu1 %v4849_v43, %s4659_s6 }
  0x9b   : > { %1240 = vrot.lane.b32.xlu0 %v4823_v32, %s4656_s28 }
  0x9d   : > { %468 = vrot.lane.b32.xlu2 %v4777_v21, %s4652_s20 }
  0x9f   : > { %v1425_v48 = vpop.permute.xlu2 %1424 }
  0xa2   : > { %854 = vrot.lane.b32.xlu1 %v4789_v26, %s4654_s26 }
  0xa3   : > { %1820 = vrot.lane.b32.xlu0 %v4871_v50, %s4659_s6 }
  0xa5   : > { %1047 = vrot.lane.b32.xlu2 %v4819_v31, %s4657_s29 }
  0xa7   : > { %v847_v53 = vpop.permute.xlu2 %846 }
  0xa8   : > { %942 = vst.msk [vmem:[#allocation3 + $0x48] sm:$0xff] %vm940_vm4, %v847_v53 }
  0xaa   : > { %1434 = vrot.lane.b32.xlu1 %v4825_v33, %s4658_s30 }
  0xab   : > { %856 = vrot.lane.b32.xlu0 %v1364_v36, %s4654_s26 }
  0xac   : > { %v845_v55 = vpop.permute.xlu1 %844 }
  0xad   : > { %941 = vst.msk [vmem:[#allocation3] sm:$0xff] %vm940_vm4, %v845_v55  ;;  %v1618_v56 = vpop.permute.xlu0 %1617  ;;  %1627 = vrot.lane.b32.xlu2 %v4888_v54, %s4655_s27 }
  0xaf   : > { %v1427_v58 = vpop.permute.xlu2 %1426 }
  0xb2   : > { %470 = vrot.lane.b32.xlu1 %v4802_v28, %s4652_s20 }
  0xb3   : > { %1436 = vrot.lane.b32.xlu0 %v4864_v47, %s4658_s30 }
  0xb4   : > { %v1038_v59 = vpop.permute.xlu1 %1037 }
  0xb5   : > { %1134 = vst.msk [vmem:[#allocation3] sm:$0xff] %vm1133_vm5, %v1038_v59  ;;  %v1040_v60 = vpop.permute.xlu0 %1039  ;;  %663 = vrot.lane.b32.xlu2 %v4795_v27, %s4653_s21  ;;  %v3131_v59 = vld [vmem:[%s7364_s3 + $0x48] sm:$0xff] }
  0xb6   : > { %1327 = vst.msk [vmem:[#allocation3] sm:$0xff] %vm1326_vm6, %v1231_v44  ;;  %v3137_v44 = vld [vmem:[%s7364_s3 + $0x78] sm:$0xff] }
  0xb7   : > { %1521 = vst.msk [vmem:[#allocation3] sm:$0xff] %vm1520_vm7, %v1425_v48  ;;  %v463_v61 = vpop.permute.xlu2 %462  ;;  %3270 = vmatpush.msra.mxu1 %v3137_v44  ;;  %4457 = vmatpush.msra.mxu2 %v3137_v44 }
  0xb8   : > { %1714 = vst.msk [vmem:[#allocation3] sm:$0xff] %vm1713_vm8, %v1618_v56  ;;  %v3132_v56 = vld [vmem:[%s7364_s3 + $0x50] sm:$0xff] }
  0xb9   : > { %1135 = vst.msk [vmem:[#allocation3 + $0x48] sm:$0xff] %vm1133_vm5, %v1040_v60  ;;  %3271 = vmatpush.msra.mxu1 %v3136_v46  ;;  %4458 = vmatpush.msra.mxu2 %v3136_v46 }
  0xba   : > { %1049 = vrot.lane.b32.xlu1 %v4833_v34, %s4657_s29  ;;  %557 = vst.msk [vmem:[#allocation3 + $0x90] sm:$0xff] %vm554_vm1, %v463_v61  ;;  %v3130_v61 = vld [vmem:[%s7364_s3 + $0x40] sm:$0xff] }
  0xbb   : > { %472 = vrot.lane.b32.xlu0 %v4819_v31, %s4652_s20  ;;  %3272 = vmatpush.msra.mxu1 %v3135_v49 }
  0xbc   : > { %v1811_v62 = vpop.permute.xlu1 %1810  ;;  %4459 = vmatpush.msra.mxu2 %v3135_v49 }
  0xbd   : > { %1907 = vst.msk [vmem:[#allocation3] sm:$0xff] %vm1906_vm9, %v1811_v62  ;;  %v1620_v63 = vpop.permute.xlu0 %1619  ;;  %1242 = vrot.lane.b32.xlu2 %v4849_v43, %s4656_s28  ;;  %3273 = vmatpush.msra.mxu1 %v3134_v51  ;;  %v3129_v62 = vld [vmem:[%s7364_s3 + $0x38] sm:$0xff] }
  0xbe   : > { %4460 = vmatpush.msra.mxu2 %v3134_v51 }
  0xbf   : > { %v1042_v2 = vpop.permute.xlu2 %1041 }
  0xc2   : > { %1629 = vrot.lane.b32.xlu1 %v4915_v1, %s4655_s27 }
  0xc3   : > { %1051 = vrot.lane.b32.xlu0 %v4888_v54, %s4657_s29 }
  0xc4   : > { %v1233_v5 = vpop.permute.xlu1 %1232  ;;  %v1939_v6 = vld [vmem:[#allocation3] sm:$0xff] }
  0xc5   : > { %1328 = vst.msk [vmem:[#allocation3 + $0x48] sm:$0xff] %vm1326_vm6, %v1233_v5  ;;  %4416 = vmatmul.msk.f32.vlgmr.msra.gmra.mxu0 %vm1980_vm10, %v1939_v6  ;;  %v656_v7 = vpop.permute.xlu0 %655  ;;  %1822 = vrot.lane.b32.xlu2 %v4920_v4, %s4659_s6  ;;  %v279_v5 = vld [vmem:[%s4745_s25 + $0x70] sm:$0xff] }
  0xc6   : > { %1522 = vst.msk [vmem:[#allocation3 + $0x48] sm:$0xff] %vm1520_vm7, %v1427_v58 }
  0xc7   : > { %2290 = vst [vmem:[#allocation3] sm:$0xff] %v4651_v0  ;;  %v1622_v8 = vpop.permute.xlu2 %1621 }
  0xc8   : > { %1715 = vst.msk [vmem:[#allocation3 + $0x48] sm:$0xff] %vm1713_vm8, %v1620_v63  ;;  %v3128_v63 = vld [vmem:[%s7364_s3 + $0x30] sm:$0xff] }
  0xc9   : > { %750 = vst.msk [vmem:[#allocation3 + $0x90] sm:$0xff] %vm747_vm2, %v656_v7 }
  0xca   : > { %665 = vrot.lane.b32.xlu1 %v4823_v32, %s4653_s21  ;;  %312 = vst.msk [vmem:[#allocation2 + $0xc1] sm:$0xff] %vm297_vm0, %v279_v5 }
  0xcb   : > { %1631 = vrot.lane.b32.xlu0 %v4933_v10, %s4655_s27 }
  0xcc   : > { %v1813_v13 = vpop.permute.xlu1 %1812 }
  0xcd   : > { %1908 = vst.msk [vmem:[#allocation3 + $0x48] sm:$0xff] %vm1906_vm9, %v1813_v13  ;;  %v1235_v14 = vpop.permute.xlu0 %1234  ;;  %858 = vrot.lane.b32.xlu2 %v4825_v33, %s4654_s26  ;;  %v277_v33 = vld [vmem:[%s4745_s25 + $0x60] sm:$0xff] }
  0xce   : > { %310 = vst.msk [vmem:[#allocation2 + $0xa9] sm:$0xff] %vm297_vm0, %v277_v33  ;;  %v5184_v33 = vld [vmem:[%s7363_s2] ss:$0 sm:$0xff] }
  0xcf   : > { %v658_v15 = vpop.permute.xlu2 %657 }
  0xd2   : > { %1244 = vrot.lane.b32.xlu1 %v4871_v50, %s4656_s28 }
  0xd3   : > { %667 = vrot.lane.b32.xlu0 %v4849_v43, %s4653_s21 }
  0xd4   : > { %v849_v16 = vpop.permute.xlu1 %848  ;;  %v1940_v17 = vld [vmem:[#allocation3 + $0x48] sm:$0xff] }
  0xd5   : > { %943 = vst.msk [vmem:[#allocation3 + $0x90] sm:$0xff] %vm940_vm4, %v849_v16  ;;  %4417 = vmatmul.msk.f32.gmra.mxu0 %vm1980_vm10, %v1940_v17  ;;  %v1815_v18 = vpop.permute.xlu0 %1814  ;;  %1438 = vrot.lane.b32.xlu2 %v1367_v11, %s4658_s30  ;;  %v5050_v52 = vld [vmem:[#allocation2 + $0xa9] sm:$0xff]  ;;  %v5125_v16 = vld [vmem:[#allocation2 + $0xc0] sm:$0xff] }
  0xd6   : > { %2291 = vst [vmem:[#allocation3 + $0x48] sm:$0xff] %v4651_v0  ;;  %v5052_v53 = vld [vmem:[#allocation2 + $0xb0] sm:$0xff]  ;;  %v5061_v55 = vld [vmem:[#allocation2 + $0xa8] sm:$0xff]  ;;  %v3122_v17 = vld [vmem:[%s7364_s3] sm:$0xff] }
  0xd7   : > { %1136 = vst.msk [vmem:[#allocation3 + $0x90] sm:$0xff] %vm1133_vm5, %v1042_v2  ;;  %v1237_v20 = vpop.permute.xlu2 %1236  ;;  %v5100_v6 = vld [vmem:[#allocation2 + $0xaa] sm:$0xff] }
  0xd8   : > { %1329 = vst.msk [vmem:[#allocation3 + $0x90] sm:$0xff] %vm1326_vm6, %v1235_v14  ;;  %v3123_v14 = vld [vmem:[%s7364_s3 + $0x8] sm:$0xff] }
  0xd9   : > { %377 = vst.msk [vmem:[#allocation3 + $0x438] sm:$0xff] %vm297_vm0, %v5052_v53 }
  0xda   : > { %1824 = vrot.lane.b32.xlu1 %v4958_v19, %s4659_s6  ;;  %376 = vst.msk [vmem:[#allocation3 + $0x3f0] sm:$0xff] %vm297_vm0, %v5061_v55 }
  0xdb   : > { %1246 = vrot.lane.b32.xlu0 %v4920_v4, %s4656_s28  ;;  %378 = vst.msk [vmem:[#allocation3 + $0x480] sm:$0xff] %vm297_vm0, %v5125_v16 }
  0xdc   : > { %v1429_v21 = vpop.permute.xlu1 %1428 }
  0xdd   : > { %1523 = vst.msk [vmem:[#allocation3 + $0x90] sm:$0xff] %vm1520_vm7, %v1429_v21  ;;  %v851_v22 = vpop.permute.xlu0 %850  ;;  %474 = vrot.lane.b32.xlu2 %v4833_v34, %s4652_s20 }
  0xde   : > { %1716 = vst.msk [vmem:[#allocation3 + $0x90] sm:$0xff] %vm1713_vm8, %v1622_v8  ;;  %v3126_v8 = vld [vmem:[%s7364_s3 + $0x20] sm:$0xff] }
  0xdf   : > { %1909 = vst.msk [vmem:[#allocation3 + $0x90] sm:$0xff] %vm1906_vm9, %v1815_v18  ;;  %v1817_v23 = vpop.permute.xlu2 %1816 }
  0xe2   : > { %860 = vrot.lane.b32.xlu1 %v4864_v47, %s4654_s26 }
  0xe3   : > { %1826 = vrot.lane.b32.xlu0 %v4972_v25, %s4659_s6 }
  0xe4   : > { %v465_v26 = vpop.permute.xlu1 %464 }
  0xe5   : > { %558 = vst.msk [vmem:[#allocation3 + $0xd8] sm:$0xff] %vm554_vm1, %v465_v26  ;;  %v1431_v27 = vpop.permute.xlu0 %1430  ;;  %1053 = vrot.lane.b32.xlu2 %v4915_v1, %s4657_s29  ;;  %v280_v26 = vld [vmem:[%s4745_s25 + $0x78] sm:$0xff] }
  0xe6   : > { %751 = vst.msk [vmem:[#allocation3 + $0xd8] sm:$0xff] %vm747_vm2, %v658_v15  ;;  %v1941_v28 = vld [vmem:[#allocation3 + $0x90] sm:$0xff] }
  0xe7   : > { %944 = vst.msk [vmem:[#allocation3 + $0xd8] sm:$0xff] %vm940_vm4, %v851_v22  ;;  %4418 = vmatmul.msk.f32.gmra.mxu0 %vm1980_vm10, %v1941_v28  ;;  %v853_v29 = vpop.permute.xlu2 %852  ;;  %v5148_v22 = vld [vmem:[#allocation2 + $0xb1] sm:$0xff] }
  0xe8   : > { %313 = vst.msk [vmem:[#allocation2 + $0xc9] sm:$0xff] %vm297_vm0, %v280_v26  ;;  %v283_v26 = vld [vmem:[%s4745_s25 + $0x90] sm:$0xff] }
  0xe9   : > { %316 = vst.msk [vmem:[#allocation2 + $0xf1] sm:$0xff] %vm297_vm0, %v283_v26  ;;  %v286_v26 = vld [vmem:[%s4745_s25 + $0xa8] sm:$0xff] }
  0xea   : > { %1440 = vrot.lane.b32.xlu1 %v4941_v12, %s4658_s30  ;;  %319 = vst.msk [vmem:[#allocation2 + $0x111] sm:$0xff] %vm297_vm0, %v286_v26 }
  0xeb   : > { %862 = vrot.lane.b32.xlu0 %v1367_v11, %s4654_s26  ;;  %v3124_v11 = vld [vmem:[%s7364_s3 + $0x10] sm:$0xff] }
  0xec   : > { %v1044_v31 = vpop.permute.xlu1 %1043 }
  0xed   : > { %1137 = vst.msk [vmem:[#allocation3 + $0xd8] sm:$0xff] %vm1133_vm5, %v1044_v31  ;;  %v467_v32 = vpop.permute.xlu0 %466  ;;  %1633 = vrot.lane.b32.xlu2 %v4988_v30, %s4655_s27 }
  0xee   : > { %1330 = vst.msk [vmem:[#allocation3 + $0xd8] sm:$0xff] %vm1326_vm6, %v1237_v20 }
  0xef   : > { %1524 = vst.msk [vmem:[#allocation3 + $0xd8] sm:$0xff] %vm1520_vm7, %v1431_v27  ;;  %v1433_v34 = vpop.permute.xlu2 %1432  ;;  %v5201_v44 = vld [vmem:[#allocation2 + $0xc9] sm:$0xff] }
  0xf0   : > { %559 = vst.msk [vmem:[#allocation3 + $0x120] sm:$0xff] %vm554_vm1, %v467_v32  ;;  %v5206_v46 = vld [vmem:[#allocation2 + $0xc8] sm:$0xff] }
  0xf1   : > { %379 = vst.msk [vmem:[#allocation3 + $0x4c8] sm:$0xff] %vm297_vm0, %v5206_v46 }
  0xf2   : > { %476 = vrot.lane.b32.xlu1 %v4888_v54, %s4652_s20  ;;  %v3133_v54 = vld [vmem:[%s7364_s3 + $0x58] sm:$0xff] }
  0xf3   : > { %1442 = vrot.lane.b32.xlu0 %v4970_v24, %s4658_s30  ;;  %3274 = vmatpush.msra.mxu1 %v3133_v54 }
  0xf4   : > { %v1624_v36 = vpop.permute.xlu1 %1623  ;;  %4461 = vmatpush.msra.mxu2 %v3133_v54 }
  0xf5   : > { %1717 = vst.msk [vmem:[#allocation3 + $0xd8] sm:$0xff] %vm1713_vm8, %v1624_v36  ;;  %v1046_v37 = vpop.permute.xlu0 %1045  ;;  %669 = vrot.lane.b32.xlu2 %v4871_v50, %s4653_s21  ;;  %3275 = vmatpush.msra.mxu1 %v3132_v56  ;;  %v5188_v36 = vld [vmem:[#allocation2 + $0xc2] sm:$0xff] }
  0xf6   : > { %1910 = vst.msk [vmem:[#allocation3 + $0xd8] sm:$0xff] %vm1906_vm9, %v1817_v23  ;;  %4462 = vmatpush.msra.mxu2 %v3132_v56 }
  0xf7   : > { %v469_v38 = vpop.permute.xlu2 %468  ;;  %3276 = vmatpush.msra.mxu1 %v3131_v59 }
  0xf8   : > { %560 = vst.msk [vmem:[#allocation3 + $0x168] sm:$0xff] %vm554_vm1, %v469_v38  ;;  %4463 = vmatpush.msra.mxu2 %v3131_v59 }
  0xf9   : > { %3277 = vmatpush.msra.mxu1 %v3130_v61 }
  0xfa   : > { %1055 = vrot.lane.b32.xlu1 %v4933_v10, %s4657_s29  ;;  %4464 = vmatpush.msra.mxu2 %v3130_v61  ;;  %v5230_v61 = vld [vmem:[#allocation2 + $0xca] sm:$0xff] }
  0xfb   : > { %478 = vrot.lane.b32.xlu0 %v4915_v1, %s4652_s20  ;;  %3278 = vmatpush.msra.mxu1 %v3129_v62 }
  0xfc   : > { %v660_v39 = vpop.permute.xlu1 %659  ;;  %4465 = vmatpush.msra.mxu2 %v3129_v62 }
  0xfd   : > { %752 = vst.msk [vmem:[#allocation3 + $0x120] sm:$0xff] %vm747_vm2, %v660_v39  ;;  %v1942_v40 = vld [vmem:[#allocation3 + $0xd8] sm:$0xff]  ;;  %v1626_v41 = vpop.permute.xlu0 %1625  ;;  %1248 = vrot.lane.b32.xlu2 %v4958_v19, %s4656_s28  ;;  %3279 = vmatpush.msra.mxu1 %v3128_v63 }
  0xfe   : > { %945 = vst.msk [vmem:[#allocation3 + $0x120] sm:$0xff] %vm940_vm4, %v853_v29  ;;  %4419 = vmatmul.msk.f32.gmra.mxu0 %vm1980_vm10, %v1942_v40  ;;  %4466 = vmatpush.msra.mxu2 %v3128_v63 }
  0xff   : > { %1138 = vst.msk [vmem:[#allocation3 + $0x120] sm:$0xff] %vm1133_vm5, %v1046_v37  ;;  %v5022_v43 = vpop.permute.xlu2 %1047  ;;  %v281_v37 = vld [vmem:[%s4745_s25 + $0x80] sm:$0xff] }
 0x100   : > { %314 = vst.msk [vmem:[#allocation2 + $0xd9] sm:$0xff] %vm297_vm0, %v281_v37 }
 0x102   : > { %1635 = vrot.lane.b32.xlu1 %v5020_v42, %s4655_s27 }
 0x103   : > { %1057 = vrot.lane.b32.xlu0 %v4988_v30, %s4657_s29 }
 0x104   : > { %v1239_v47 = vpop.permute.xlu1 %1238 }
 0x105   : > { %1331 = vst.msk [vmem:[#allocation3 + $0x120] sm:$0xff] %vm1326_vm6, %v1239_v47  ;;  %v662_v48 = vpop.permute.xlu0 %661  ;;  %1828 = vrot.lane.b32.xlu2 %v5029_v45, %s4659_s6 }
 0x106   : > { %1525 = vst.msk [vmem:[#allocation3 + $0x120] sm:$0xff] %vm1520_vm7, %v1433_v34 }
 0x107   : > { %1718 = vst.msk [vmem:[#allocation3 + $0x120] sm:$0xff] %vm1713_vm8, %v1626_v41  ;;  %v5044_v50 = vpop.permute.xlu2 %1627  ;;  %v5211_v47 = vld [vmem:[#allocation2 + $0xd8] sm:$0xff] }
 0x108   : > { %753 = vst.msk [vmem:[#allocation3 + $0x168] sm:$0xff] %vm747_vm2, %v662_v48 }
 0x109   : > { %380 = vst.msk [vmem:[#allocation3 + $0x510] sm:$0xff] %vm297_vm0, %v5211_v47 }
 0x10a   : > { %671 = vrot.lane.b32.xlu1 %v4920_v4, %s4653_s21  ;;  %v3127_v4 = vld [vmem:[%s7364_s3 + $0x28] sm:$0xff] }
 0x10b   : > { %1637 = vrot.lane.b32.xlu0 %v5050_v52, %s4655_s27  ;;  %3280 = vmatpush.msra.mxu1 %v3127_v4 }
 0x10c   : > { %v1819_v57 = vpop.permute.xlu1 %1818  ;;  %4467 = vmatpush.msra.mxu2 %v3127_v4 }
 0x10d   : > { %1911 = vst.msk [vmem:[#allocation3 + $0x120] sm:$0xff] %vm1906_vm9, %v1819_v57  ;;  %v1241_v58 = vpop.permute.xlu0 %1240  ;;  %864 = vrot.lane.b32.xlu2 %v4941_v12, %s4654_s26  ;;  %3281 = vmatpush.msra.mxu1 %v3126_v8 }
 0x10e   : > { %4468 = vmatpush.msra.mxu2 %v3126_v8 }
 0x10f   : > { %v664_v60 = vpop.permute.xlu2 %663  ;;  %3282 = vmatpush.msra.mxu1 %v3125_v9 }
 0x110   : > { %4469 = vmatpush.msra.mxu2 %v3125_v9 }
 0x111   : > { %3283 = vmatpush.msra.mxu1 %v3124_v11 }
 0x112   : > { %1250 = vrot.lane.b32.xlu1 %v4972_v25, %s4656_s28  ;;  %4470 = vmatpush.msra.mxu2 %v3124_v11 }
 0x113   : > { %673 = vrot.lane.b32.xlu0 %v4958_v19, %s4653_s21  ;;  %3284 = vmatpush.msra.mxu1 %v3123_v14 }
 0x114   : > { %v855_v1 = vpop.permute.xlu1 %854  ;;  %v1943_v2 = vld [vmem:[#allocation3 + $0x120] sm:$0xff]  ;;  %4471 = vmatpush.msra.mxu2 %v3123_v14 }
 0x115   : > { %946 = vst.msk [vmem:[#allocation3 + $0x168] sm:$0xff] %vm940_vm4, %v855_v1  ;;  %4420 = vmatmul.msk.f32.gmra.mxu0 %vm1980_vm10, %v1943_v2  ;;  %v1821_v3 = vpop.permute.xlu0 %1820  ;;  %1444 = vrot.lane.b32.xlu2 %v5061_v55, %s4658_s30 }
 0x116   : > { %1139 = vst.msk [vmem:[#allocation3 + $0x168] sm:$0xff] %vm1133_vm5, %v5022_v43  ;;  %3285 = vmatpush.msra.mxu1 %v3122_v17  ;;  %4472 = vmatpush.msra.mxu2 %v3122_v17  ;;  %v282_v43 = vld [vmem:[%s4745_s25 + $0x88] sm:$0xff] }
 0x117   : > { %1332 = vst.msk [vmem:[#allocation3 + $0x168] sm:$0xff] %vm1326_vm6, %v1241_v58  ;;  %v1243_v7 = vpop.permute.xlu2 %1242  ;;  %3286 = vmatmul.f32.vlgmr.msra.gmra.mxu1 %v4651_v0 }
 0x118   : > { %315 = vst.msk [vmem:[#allocation2 + $0xe1] sm:$0xff] %vm297_vm0, %v282_v43 }
 0x11a   : > { %1830 = vrot.lane.b32.xlu1 %v5100_v6, %s4659_s6 }
 0x11b   : > { %1252 = vrot.lane.b32.xlu0 %v5029_v45, %s4656_s28 }
 0x11c   : > { %v1435_v12 = vpop.permute.xlu1 %1434 }
 0x11d   : > { %1526 = vst.msk [vmem:[#allocation3 + $0x168] sm:$0xff] %vm1520_vm7, %v1435_v12  ;;  %v857_v13 = vpop.permute.xlu0 %856  ;;  %480 = vrot.lane.b32.xlu2 %v4933_v10, %s4652_s20  ;;  %v5130_v10 = vld [vmem:[#allocation2 + $0xb2] sm:$0xff] }
 0x11e   : > { %1719 = vst.msk [vmem:[#allocation3 + $0x168] sm:$0xff] %vm1713_vm8, %v5044_v50 }
 0x11f   : > { %1912 = vst.msk [vmem:[#allocation3 + $0x168] sm:$0xff] %vm1906_vm9, %v1821_v3  ;;  %v1823_v15 = vpop.permute.xlu2 %1822  ;;  %3289 = vmatmul.f32.gmra.mxu1 %v4651_v0  ;;  %v5242_v5 = vld [vmem:[#allocation2 + $0xda] sm:$0xff] }
 0x122   : > { %866 = vrot.lane.b32.xlu1 %v4970_v24, %s4654_s26 }
 0x123   : > { %1832 = vrot.lane.b32.xlu0 %v5130_v10, %s4659_s6 }
 0x124   : > { %v471_v18 = vpop.permute.xlu1 %470 }
 0x125   : > { %561 = vst.msk [vmem:[#allocation3 + $0x1b0] sm:$0xff] %vm554_vm1, %v471_v18  ;;  %v1437_v19 = vpop.permute.xlu0 %1436  ;;  %1059 = vrot.lane.b32.xlu2 %v5020_v42, %s4657_s29 }
 0x126   : > { %754 = vst.msk [vmem:[#allocation3 + $0x1b0] sm:$0xff] %vm747_vm2, %v664_v60  ;;  %v1944_v20 = vld [vmem:[#allocation3 + $0x168] sm:$0xff] }
 0x127   : > { %947 = vst.msk [vmem:[#allocation3 + $0x1b0] sm:$0xff] %vm940_vm4, %v857_v13  ;;  %4421 = vmatmul.msk.f32.gmra.mxu0 %vm1980_vm10, %v1944_v20  ;;  %v859_v21 = vpop.permute.xlu2 %858  ;;  %v5261_v20 = vld [vmem:[#allocation2 + $0xd9] sm:$0xff] }
 0x12a   : > { %1446 = vrot.lane.b32.xlu1 %v5052_v53, %s4658_s30 }
 0x12b   : > { %868 = vrot.lane.b32.xlu0 %v5061_v55, %s4654_s26 }
 0x12c   : > { %v1050_v23 = vpop.permute.xlu1 %1049 }
 0x12d   : > { %1140 = vst.msk [vmem:[#allocation3 + $0x1b0] sm:$0xff] %vm1133_vm5, %v1050_v23  ;;  %v473_v24 = vpop.permute.xlu0 %472  ;;  %1639 = vrot.lane.b32.xlu2 %v5148_v22, %s4655_s27 }
 0x12e   : > { %1333 = vst.msk [vmem:[#allocation3 + $0x1b0] sm:$0xff] %vm1326_vm6, %v1243_v7 }
 0x12f   : > { %1527 = vst.msk [vmem:[#allocation3 + $0x1b0] sm:$0xff] %vm1520_vm7, %v1437_v19  ;;  %v1439_v0 = vpop.permute.xlu2 %1438 }
 0x130   : > { %562 = vst.msk [vmem:[#allocation3 + $0x1f8] sm:$0xff] %vm554_vm1, %v473_v24 }
 0x132   : > { %482 = vrot.lane.b32.xlu1 %v4988_v30, %s4652_s20 }
 0x133   : > { %1448 = vrot.lane.b32.xlu0 %v5125_v16, %s4658_s30 }
 0x134   : > { %v1630_v27 = vpop.permute.xlu1 %1629 }
 0x135   : > { %1720 = vst.msk [vmem:[#allocation3 + $0x1b0] sm:$0xff] %vm1713_vm8, %v1630_v27  ;;  %v1052_v28 = vpop.permute.xlu0 %1051  ;;  %675 = vrot.lane.b32.xlu2 %v4972_v25, %s4653_s21  ;;  %v5179_v25 = vld [vmem:[#allocation2 + $0xc1] sm:$0xff] }
 0x136   : > { %1913 = vst.msk [vmem:[#allocation3 + $0x1b0] sm:$0xff] %vm1906_vm9, %v1823_v15 }
 0x137   : > { %v475_v29 = vpop.permute.xlu2 %474 }
 0x138   : > { %563 = vst.msk [vmem:[#allocation3 + $0x240] sm:$0xff] %vm554_vm1, %v475_v29 }
 0x13a   : > { %1061 = vrot.lane.b32.xlu1 %v5050_v52, %s4657_s29 }
 0x13b   : > { %484 = vrot.lane.b32.xlu0 %v5020_v42, %s4652_s20 }
 0x13c   : > { %v666_v30 = vpop.permute.xlu1 %665 }
 0x13d   : > { %755 = vst.msk [vmem:[#allocation3 + $0x1f8] sm:$0xff] %vm747_vm2, %v666_v30  ;;  %v1945_v31 = vld [vmem:[#allocation3 + $0x1b0] sm:$0xff]  ;;  %v1632_v32 = vpop.permute.xlu0 %1631  ;;  %1254 = vrot.lane.b32.xlu2 %v5100_v6, %s4656_s28 }
 0x13e   : > { %948 = vst.msk [vmem:[#allocation3 + $0x1f8] sm:$0xff] %vm940_vm4, %v859_v21  ;;  %4422 = vmatmul.msk.f32.gmra.mxu0 %vm1980_vm10, %v1945_v31 }
 0x13f   : > { %1141 = vst.msk [vmem:[#allocation3 + $0x1f8] sm:$0xff] %vm1133_vm5, %v1052_v28  ;;  %v1054_v34 = vpop.permute.xlu2 %1053  ;;  %v284_v28 = vld [vmem:[%s4745_s25 + $0x98] sm:$0xff] }
 0x140   : > { %317 = vst.msk [vmem:[#allocation2 + $0xf9] sm:$0xff] %vm297_vm0, %v284_v28 }
 0x142   : > { %1641 = vrot.lane.b32.xlu1 %v5179_v25, %s4655_s27  ;;  %v2098_v35 = vpop.f32.mrf.mxu0 }
 0x143   : > { %v2099_v38 = vadd.f32 %v5184_v33, %v2098_v35  ;;  %1063 = vrot.lane.b32.xlu0 %v5148_v22, %s4657_s29 }
 0x144   : > { %v1245_v39 = vpop.permute.xlu1 %1244 }
 0x145   : > { %v2194_v40 = vmax.f32 %v2099_v38, 0.0  ;;  %1334 = vst.msk [vmem:[#allocation3 + $0x1f8] sm:$0xff] %vm1326_vm6, %v1245_v39  ;;  %v668_v41 = vpop.permute.xlu0 %667  ;;  %1834 = vrot.lane.b32.xlu2 %v5188_v36, %s4659_s6 }
 0x146   : > { %1528 = vst.msk [vmem:[#allocation3 + $0x1f8] sm:$0xff] %vm1520_vm7, %v1439_v0 }
 0x147   : > { %2226 = vst [vmem:[#allocation2 + $0x19] sm:$0xff] %v2194_v40  ;;  %v1634_v42 = vpop.permute.xlu2 %1633 }
 0x148   : > { %1721 = vst.msk [vmem:[#allocation3 + $0x1f8] sm:$0xff] %vm1713_vm8, %v1632_v32 }
 0x149   : > { %756 = vst.msk [vmem:[#allocation3 + $0x240] sm:$0xff] %vm747_vm2, %v668_v41  ;;  %v5295_v41 = vld [vmem:[#allocation2 + $0xe1] sm:$0xff] }
 0x14a   : > { %677 = vrot.lane.b32.xlu1 %v5029_v45, %s4653_s21 }
 0x14b   : > { %1643 = vrot.lane.b32.xlu0 %v5201_v44, %s4655_s27 }
 0x14c   : > { %v1825_v48 = vpop.permute.xlu1 %1824 }
 0x14d   : > { %1914 = vst.msk [vmem:[#allocation3 + $0x1f8] sm:$0xff] %vm1906_vm9, %v1825_v48  ;;  %v1247_v49 = vpop.permute.xlu0 %1246  ;;  %870 = vrot.lane.b32.xlu2 %v5052_v53, %s4654_s26 }
 0x14e   : > { %v2260_v45 = vld [vmem:[#allocation2 + $0x18] sm:$0xff] }
 0x14f   : > { %v2450_v50 = vld [vmem:[#allocation2 + $0x18] sm:$0xff]  ;;  %2292 = vst [vmem:[#allocation3 + $0x90] sm:$0xff] %v2260_v45  ;;  %3292 = vmatmul.f32.gmra.mxu1 %v2260_v45  ;;  %v670_v54 = vpop.permute.xlu2 %669 }
 0x150   : > { %v2514_v51 = vld [vmem:[#allocation2 + $0x19] sm:$0xff]  ;;  %2482 = vst [vmem:[#allocation3 + $0x18] sm:$0xff] %v2450_v50  ;;  %v5309_v50 = vld [vmem:[#allocation2 + $0xf1] sm:$0xff] }
 0x151   : > { %v2324_v55 = vld [vmem:[#allocation2 + $0x19] sm:$0xff]  ;;  %2546 = vst [vmem:[#allocation3 + $0x20] sm:$0xff] %v2514_v51 }
 0x152   : > { %1256 = vrot.lane.b32.xlu1 %v5130_v10, %s4656_s28  ;;  %v2101_v56 = vpop.f32.mrf.mxu0  ;;  %2356 = vst [vmem:[#allocation3 + $0x98] sm:$0xff] %v2324_v55 }
 0x153   : > { %v2102_v57 = vadd.f32 %v5184_v33, %v2101_v56  ;;  %679 = vrot.lane.b32.xlu0 %v5100_v6, %s4653_s21  ;;  %v5244_v6 = vld [vmem:[#allocation2 + $0xe0] sm:$0xff] }
 0x154   : > { %v861_v53 = vpop.permute.xlu1 %860  ;;  %v1946_v58 = vld [vmem:[#allocation3 + $0x1f8] sm:$0xff]  ;;  %381 = vst.msk [vmem:[#allocation3 + $0x558] sm:$0xff] %vm297_vm0, %v5244_v6 }
 0x155   : > { %v2195_v59 = vmax.f32 %v2102_v57, 0.0  ;;  %949 = vst.msk [vmem:[#allocation3 + $0x240] sm:$0xff] %vm940_vm4, %v861_v53  ;;  %4423 = vmatmul.msk.f32.gmra.mxu0 %vm1980_vm10, %v1946_v58  ;;  %v1827_v60 = vpop.permute.xlu0 %1826  ;;  %1450 = vrot.lane.b32.xlu2 %v5206_v46, %s4658_s30 }
 0x156   : > { %1142 = vst.msk [vmem:[#allocation3 + $0x240] sm:$0xff] %vm1133_vm5, %v1054_v34 }
 0x157   : > { %2227 = vst [vmem:[#allocation2 + $0x21] sm:$0xff] %v2195_v59  ;;  %v1249_v62 = vpop.permute.xlu2 %1248 }
 0x158   : > { %1335 = vst.msk [vmem:[#allocation3 + $0x240] sm:$0xff] %vm1326_vm6, %v1247_v49 }
 0x15a   : > { %1836 = vrot.lane.b32.xlu1 %v5230_v61, %s4659_s6 }
 0x15b   : > { %1258 = vrot.lane.b32.xlu0 %v5188_v36, %s4656_s28 }
 0x15c   : > { %v1441_v63 = vpop.permute.xlu1 %1440 }
 0x15d   : > { %1529 = vst.msk [vmem:[#allocation3 + $0x240] sm:$0xff] %vm1520_vm7, %v1441_v63  ;;  %v863_v1 = vpop.permute.xlu0 %862  ;;  %486 = vrot.lane.b32.xlu2 %v5050_v52, %s4652_s20 }
 0x15e   : > { %1722 = vst.msk [vmem:[#allocation3 + $0x240] sm:$0xff] %vm1713_vm8, %v1634_v42  ;;  %v2261_v2 = vld [vmem:[#allocation2 + $0x20] sm:$0xff] }
 0x15f   : > { %1915 = vst.msk [vmem:[#allocation3 + $0x240] sm:$0xff] %vm1906_vm9, %v1827_v60  ;;  %3295 = vmatmul.f32.gmra.mxu1 %v2261_v2  ;;  %v1829_v3 = vpop.permute.xlu2 %1828  ;;  %v2451_v4 = vld [vmem:[#allocation2 + $0x20] sm:$0xff] }
 0x160   : > { %2293 = vst [vmem:[#allocation3 + $0xd8] sm:$0xff] %v2261_v2  ;;  %v2515_v7 = vld [vmem:[#allocation2 + $0x21] sm:$0xff] }
 0x161   : > { %v2388_v8 = vld [vmem:[#allocation2 + $0x1a] sm:$0xff]  ;;  %2483 = vst [vmem:[#allocation3 + $0x60] sm:$0xff] %v2451_v4  ;;  %v2389_v13 = vld [vmem:[#allocation2 + $0x22] sm:$0xff]  ;;  %v5332_v4 = vld [vmem:[#allocation2 + $0xf2] sm:$0xff] }
 0x162   : > { %872 = vrot.lane.b32.xlu1 %v5125_v16, %s4654_s26  ;;  %2547 = vst [vmem:[#allocation3 + $0x68] sm:$0xff] %v2515_v7  ;;  %v2325_v17 = vld [vmem:[#allocation2 + $0x21] sm:$0xff] }
 0x163   : > { %1838 = vrot.lane.b32.xlu0 %v5242_v5, %s4659_s6  ;;  %2420 = vst [vmem:[#allocation3 + $0xa0] sm:$0xff] %v2388_v8  ;;  %v2578_v18 = vld [vmem:[#allocation2 + $0x1a] sm:$0xff]  ;;  %v2579_v19 = vld [vmem:[#allocation2 + $0x22] sm:$0xff] }
 0x164   : > { %v477_v52 = vpop.permute.xlu1 %476  ;;  %v2104_v9 = vpop.f32.mrf.mxu0  ;;  %2421 = vst [vmem:[#allocation3 + $0xe8] sm:$0xff] %v2389_v13  ;;  %v5299_v42 = vld [vmem:[#allocation2 + $0xe2] sm:$0xff] }
 0x165   : > { %564 = vst.msk [vmem:[#allocation3 + $0x288] sm:$0xff] %vm554_vm1, %v477_v52  ;;  %v2105_v11 = vadd.f32 %v5184_v33, %v2104_v9  ;;  %v1443_v12 = vpop.permute.xlu0 %1442  ;;  %1065 = vrot.lane.b32.xlu2 %v5179_v25, %s4657_s29  ;;  %v285_v8 = vld [vmem:[%s4745_s25 + $0xa0] sm:$0xff] }
 0x166   : > { %757 = vst.msk [vmem:[#allocation3 + $0x288] sm:$0xff] %vm747_vm2, %v670_v54  ;;  %v1947_v14 = vld [vmem:[#allocation3 + $0x240] sm:$0xff] }
 0x167   : > { %v2196_v15 = vmax.f32 %v2105_v11, 0.0  ;;  %950 = vst.msk [vmem:[#allocation3 + $0x288] sm:$0xff] %vm940_vm4, %v863_v1  ;;  %4424 = vmatmul.msk.f32.gmra.mxu0 %vm1980_vm10, %v1947_v14  ;;  %v865_v16 = vpop.permute.xlu2 %864  ;;  %v5313_v54 = vld [vmem:[#allocation2 + $0xf0] sm:$0xff] }
 0x168   : > { %2357 = vst [vmem:[#allocation3 + $0xe0] sm:$0xff] %v2325_v17 }
 0x169   : > { %2228 = vst [vmem:[#allocation2 + $0x31] sm:$0xff] %v2196_v15 }
 0x16a   : > { %1452 = vrot.lane.b32.xlu1 %v5211_v47, %s4658_s30  ;;  %2610 = vst [vmem:[#allocation3 + $0x28] sm:$0xff] %v2578_v18 }
 0x16b   : > { %874 = vrot.lane.b32.xlu0 %v5206_v46, %s4654_s26  ;;  %2611 = vst [vmem:[#allocation3 + $0x70] sm:$0xff] %v2579_v19 }
 0x16c   : > { %v1056_v21 = vpop.permute.xlu1 %1055  ;;  %382 = vst.msk [vmem:[#allocation3 + $0x5a0] sm:$0xff] %vm297_vm0, %v5313_v54 }
 0x16d   : > { %1143 = vst.msk [vmem:[#allocation3 + $0x288] sm:$0xff] %vm1133_vm5, %v1056_v21  ;;  %v479_v23 = vpop.permute.xlu0 %478  ;;  %1645 = vrot.lane.b32.xlu2 %v5261_v20, %s4655_s27  ;;  %v5359_v21 = vld [vmem:[#allocation2 + $0xf8] sm:$0xff] }
 0x16e   : > { %1336 = vst.msk [vmem:[#allocation3 + $0x288] sm:$0xff] %vm1326_vm6, %v1249_v62 }
 0x16f   : > { %1530 = vst.msk [vmem:[#allocation3 + $0x288] sm:$0xff] %vm1520_vm7, %v1443_v12  ;;  %v1445_v24 = vpop.permute.xlu2 %1444 }
 0x170   : > { %565 = vst.msk [vmem:[#allocation3 + $0x2d0] sm:$0xff] %vm554_vm1, %v479_v23  ;;  %v2262_v0 = vld [vmem:[#allocation2 + $0x30] sm:$0xff] }
 0x171   : > { %2294 = vst [vmem:[#allocation3 + $0x120] sm:$0xff] %v2262_v0  ;;  %3298 = vmatmul.f32.gmra.mxu1 %v2262_v0  ;;  %v2452_v27 = vld [vmem:[#allocation2 + $0x30] sm:$0xff] }
 0x172   : > { %488 = vrot.lane.b32.xlu1 %v5148_v22, %s4652_s20  ;;  %2484 = vst [vmem:[#allocation3 + $0xa8] sm:$0xff] %v2452_v27  ;;  %v2516_v30 = vld [vmem:[#allocation2 + $0x31] sm:$0xff]  ;;  %v5374_v27 = vld [vmem:[#allocation2 + $0xfa] sm:$0xff] }
 0x173   : > { %1454 = vrot.lane.b32.xlu0 %v5244_v6, %s4658_s30  ;;  %v2326_v22 = vld [vmem:[#allocation2 + $0x31] sm:$0xff]  ;;  %2548 = vst [vmem:[#allocation3 + $0xb0] sm:$0xff] %v2516_v30 }
 0x174   : > { %v1636_v29 = vpop.permute.xlu1 %1635  ;;  %v2642_v34 = vld [vmem:[#allocation2 + $0x30] sm:$0xff]  ;;  %2358 = vst [vmem:[#allocation3 + $0x128] sm:$0xff] %v2326_v22 }
 0x175   : > { %1723 = vst.msk [vmem:[#allocation3 + $0x288] sm:$0xff] %vm1713_vm8, %v1636_v29  ;;  %v1058_v31 = vpop.permute.xlu0 %1057  ;;  %681 = vrot.lane.b32.xlu2 %v5130_v10, %s4653_s21 }
 0x176   : > { %1916 = vst.msk [vmem:[#allocation3 + $0x288] sm:$0xff] %vm1906_vm9, %v1829_v3 }
 0x177   : > { %v481_v32 = vpop.permute.xlu2 %480  ;;  %2674 = vst [vmem:[#allocation3 + $0x30] sm:$0xff] %v2642_v34 }
 0x178   : > { %566 = vst.msk [vmem:[#allocation3 + $0x318] sm:$0xff] %vm554_vm1, %v481_v32  ;;  %v5391_v32 = vld [vmem:[#allocation2 + $0xf9] sm:$0xff] }
 0x179   : > { %318 = vst.msk [vmem:[#allocation2 + $0x109] sm:$0xff] %vm297_vm0, %v285_v8 }
 0x17a   : > { %1067 = vrot.lane.b32.xlu1 %v5201_v44, %s4657_s29  ;;  %383 = vst.msk [vmem:[#allocation3 + $0x5e8] sm:$0xff] %vm297_vm0, %v5359_v21 }
 0x17b   : > { %v2107_v35 = vpop.f32.mrf.mxu0  ;;  %490 = vrot.lane.b32.xlu0 %v5179_v25, %s4652_s20 }
 0x17c   : > { %v2108_v37 = vadd.f32 %v5184_v33, %v2107_v35  ;;  %v672_v10 = vpop.permute.xlu1 %671 }
 0x17d   : > { %758 = vst.msk [vmem:[#allocation3 + $0x2d0] sm:$0xff] %vm747_vm2, %v672_v10  ;;  %v1948_v38 = vld [vmem:[#allocation3 + $0x288] sm:$0xff]  ;;  %v1638_v39 = vpop.permute.xlu0 %1637  ;;  %1260 = vrot.lane.b32.xlu2 %v5230_v61, %s4656_s28 }
 0x17e   : > { %v2197_v40 = vmax.f32 %v2108_v37, 0.0  ;;  %951 = vst.msk [vmem:[#allocation3 + $0x2d0] sm:$0xff] %vm940_vm4, %v865_v16  ;;  %4425 = vmatmul.msk.f32.gmra.mxu0 %vm1980_vm10, %v1948_v38 }
 0x17f   : > { %1144 = vst.msk [vmem:[#allocation3 + $0x2d0] sm:$0xff] %vm1133_vm5, %v1058_v31  ;;  %v1060_v25 = vpop.permute.xlu2 %1059 }
 0x180   : > { %2229 = vst [vmem:[#allocation2 + $0x39] sm:$0xff] %v2197_v40  ;;  %v5383_v28 = vld [vmem:[#allocation2 + $0x108] sm:$0xff] }
 0x181   : > { %384 = vst.msk [vmem:[#allocation3 + $0x630] sm:$0xff] %vm297_vm0, %v5383_v28 }
 0x182   : > { %1647 = vrot.lane.b32.xlu1 %v5295_v41, %s4655_s27 }
 0x183   : > { %1069 = vrot.lane.b32.xlu0 %v5261_v20, %s4657_s29 }
 0x184   : > { %v1251_v43 = vpop.permute.xlu1 %1250 }
 0x185   : > { %1337 = vst.msk [vmem:[#allocation3 + $0x2d0] sm:$0xff] %vm1326_vm6, %v1251_v43  ;;  %v674_v46 = vpop.permute.xlu0 %673  ;;  %1840 = vrot.lane.b32.xlu2 %v5299_v42, %s4659_s6 }
 0x186   : > { %1531 = vst.msk [vmem:[#allocation3 + $0x2d0] sm:$0xff] %vm1520_vm7, %v1445_v24 }
 0x187   : > { %1724 = vst.msk [vmem:[#allocation3 + $0x2d0] sm:$0xff] %vm1713_vm8, %v1638_v39  ;;  %v2263_v48 = vld [vmem:[#allocation2 + $0x38] sm:$0xff]  ;;  %v1640_v49 = vpop.permute.xlu2 %1639 }
 0x188   : > { %v2453_v45 = vld [vmem:[#allocation2 + $0x38] sm:$0xff]  ;;  %759 = vst.msk [vmem:[#allocation3 + $0x318] sm:$0xff] %vm747_vm2, %v674_v46  ;;  %3301 = vmatmul.f32.gmra.mxu1 %v2263_v48 }
 0x189   : > { %2295 = vst [vmem:[#allocation3 + $0x168] sm:$0xff] %v2263_v48  ;;  %v2517_v51 = vld [vmem:[#allocation2 + $0x39] sm:$0xff] }
 0x18a   : > { %683 = vrot.lane.b32.xlu1 %v5188_v36, %s4653_s21  ;;  %2485 = vst [vmem:[#allocation3 + $0xf0] sm:$0xff] %v2453_v45  ;;  %v2390_v55 = vld [vmem:[#allocation2 + $0x32] sm:$0xff]  ;;  %v2391_v57 = vld [vmem:[#allocation2 + $0x3a] sm:$0xff] }
 0x18b   : > { %1649 = vrot.lane.b32.xlu0 %v5309_v50, %s4655_s27  ;;  %2549 = vst [vmem:[#allocation3 + $0xf8] sm:$0xff] %v2517_v51  ;;  %v2327_v36 = vld [vmem:[#allocation2 + $0x39] sm:$0xff]  ;;  %v287_v45 = vld [vmem:[%s4745_s25 + $0xb0] sm:$0xff] }
 0x18c   : > { %v1831_v56 = vpop.permute.xlu1 %1830  ;;  %2422 = vst [vmem:[#allocation3 + $0x130] sm:$0xff] %v2390_v55  ;;  %v2643_v59 = vld [vmem:[#allocation2 + $0x38] sm:$0xff] }
 0x18d   : > { %1917 = vst.msk [vmem:[#allocation3 + $0x2d0] sm:$0xff] %vm1906_vm9, %v1831_v56  ;;  %v1253_v53 = vpop.permute.xlu0 %1252  ;;  %876 = vrot.lane.b32.xlu2 %v5211_v47, %s4654_s26  ;;  %v2580_v3 = vld [vmem:[#allocation2 + $0x32] sm:$0xff]  ;;  %v2581_v7 = vld [vmem:[#allocation2 + $0x3a] sm:$0xff] }
 0x18e   : > { %2423 = vst [vmem:[#allocation3 + $0x178] sm:$0xff] %v2391_v57  ;;  %v288_v57 = vld [vmem:[%s4745_s25 + $0xb8] sm:$0xff] }
 0x18f   : > { %v676_v58 = vpop.permute.xlu2 %675  ;;  %2359 = vst [vmem:[#allocation3 + $0x170] sm:$0xff] %v2327_v36  ;;  %v5433_v36 = vld [vmem:[#allocation2 + $0x110] sm:$0xff] }
 0x190   : > { %2675 = vst [vmem:[#allocation3 + $0x78] sm:$0xff] %v2643_v59 }
 0x191   : > { %2612 = vst [vmem:[#allocation3 + $0xb8] sm:$0xff] %v2580_v3 }
 0x192   : > { %1262 = vrot.lane.b32.xlu1 %v5242_v5, %s4656_s28  ;;  %v2110_v60 = vpop.f32.mrf.mxu0  ;;  %2613 = vst [vmem:[#allocation3 + $0x100] sm:$0xff] %v2581_v7 }
 0x193   : > { %v2111_v62 = vadd.f32 %v5184_v33, %v2110_v60  ;;  %685 = vrot.lane.b32.xlu0 %v5230_v61, %s4653_s21  ;;  %320 = vst.msk [vmem:[#allocation2 + $0x121] sm:$0xff] %vm297_vm0, %v287_v45 }
 0x194   : > { %v867_v63 = vpop.permute.xlu1 %866  ;;  %v1949_v1 = vld [vmem:[#allocation3 + $0x2d0] sm:$0xff]  ;;  %321 = vst.msk [vmem:[#allocation2 + $0x129] sm:$0xff] %vm297_vm0, %v288_v57 }
 0x195   : > { %952 = vst.msk [vmem:[#allocation3 + $0x318] sm:$0xff] %vm940_vm4, %v867_v63  ;;  %v2198_v47 = vmax.f32 %v2111_v62, 0.0  ;;  %4426 = vmatmul.msk.f32.gmra.mxu0 %vm1980_vm10, %v1949_v1  ;;  %v1833_v2 = vpop.permute.xlu0 %1832  ;;  %1456 = vrot.lane.b32.xlu2 %v5313_v54, %s4658_s30 }
 0x196   : > { %1145 = vst.msk [vmem:[#allocation3 + $0x318] sm:$0xff] %vm1133_vm5, %v1060_v25 }
 0x197   : > { %2230 = vst [vmem:[#allocation2 + $0x49] sm:$0xff] %v2198_v47  ;;  %v1255_v61 = vpop.permute.xlu2 %1254 }
 0x198   : > { %1338 = vst.msk [vmem:[#allocation3 + $0x318] sm:$0xff] %vm1326_vm6, %v1253_v53  ;;  %v5425_v53 = vld [vmem:[#allocation2 + $0x111] sm:$0xff] }
 0x199   : > { %385 = vst.msk [vmem:[#allocation3 + $0x678] sm:$0xff] %vm297_vm0, %v5433_v36 }
 0x19a   : > { %1842 = vrot.lane.b32.xlu1 %v5332_v4, %s4659_s6  ;;  %v5483_v26 = vld [vmem:[#allocation2 + $0x121] sm:$0xff] }
 0x19b   : > { %687 = vrot.lane.b32.xlu0 %v5242_v5, %s4653_s21 }
 0x19c   : > { %v1447_v52 = vpop.permute.xlu1 %1446 }
 0x19d   : > { %1532 = vst.msk [vmem:[#allocation3 + $0x318] sm:$0xff] %vm1520_vm7, %v1447_v52  ;;  %v869_v9 = vpop.permute.xlu0 %868  ;;  %492 = vrot.lane.b32.xlu2 %v5201_v44, %s4652_s20 }
 0x19e   : > { %1725 = vst.msk [vmem:[#allocation3 + $0x318] sm:$0xff] %vm1713_vm8, %v1640_v49  ;;  %v2264_v11 = vld [vmem:[#allocation2 + $0x48] sm:$0xff] }
 0x19f   : > { %1918 = vst.msk [vmem:[#allocation3 + $0x318] sm:$0xff] %vm1906_vm9, %v1833_v2  ;;  %3304 = vmatmul.f32.gmra.mxu1 %v2264_v11  ;;  %v1835_v12 = vpop.permute.xlu2 %1834  ;;  %v2518_v13 = vld [vmem:[#allocation2 + $0x49] sm:$0xff] }
 0x1a0   : > { %2296 = vst [vmem:[#allocation3 + $0x1b0] sm:$0xff] %v2264_v11  ;;  %v2328_v14 = vld [vmem:[#allocation2 + $0x49] sm:$0xff] }
 0x1a1   : > { %2550 = vst [vmem:[#allocation3 + $0x140] sm:$0xff] %v2518_v13  ;;  %v2644_v17 = vld [vmem:[#allocation2 + $0x48] sm:$0xff] }
 0x1a2   : > { %494 = vrot.lane.b32.xlu1 %v5261_v20, %s4652_s20  ;;  %2360 = vst [vmem:[#allocation3 + $0x1b8] sm:$0xff] %v2328_v14  ;;  %v5409_v49 = vld [vmem:[#allocation2 + $0x10a] sm:$0xff] }
 0x1a3   : > { %1264 = vrot.lane.b32.xlu0 %v5299_v42, %s4656_s28  ;;  %2676 = vst [vmem:[#allocation3 + $0xc0] sm:$0xff] %v2644_v17 }
 0x1a4   : > { %v483_v5 = vpop.permute.xlu1 %482  ;;  %v2113_v44 = vpop.f32.mrf.mxu0 }
 0x1a5   : > { %567 = vst.msk [vmem:[#allocation3 + $0x360] sm:$0xff] %vm554_vm1, %v483_v5  ;;  %v2114_v15 = vadd.f32 %v5184_v33, %v2113_v44  ;;  %v1449_v16 = vpop.permute.xlu0 %1448  ;;  %878 = vrot.lane.b32.xlu2 %v5244_v6, %s4654_s26  ;;  %v5466_v44 = vld [vmem:[#allocation2 + $0x122] sm:$0xff] }
 0x1a6   : > { %760 = vst.msk [vmem:[#allocation3 + $0x360] sm:$0xff] %vm747_vm2, %v676_v58  ;;  %v1950_v18 = vld [vmem:[#allocation3 + $0x318] sm:$0xff] }
 0x1a7   : > { %v2199_v19 = vmax.f32 %v2114_v15, 0.0  ;;  %953 = vst.msk [vmem:[#allocation3 + $0x360] sm:$0xff] %vm940_vm4, %v869_v9  ;;  %4427 = vmatmul.msk.f32.gmra.mxu0 %vm1980_vm10, %v1950_v18  ;;  %v871_v20 = vpop.permute.xlu2 %870  ;;  %v5450_v9 = vld [vmem:[#allocation2 + $0x112] sm:$0xff] }
 0x1a9   : > { %2231 = vst [vmem:[#allocation2 + $0x51] sm:$0xff] %v2199_v19 }
 0x1aa   : > { %1071 = vrot.lane.b32.xlu1 %v5295_v41, %s4657_s29 }
 0x1ab   : > { %1266 = vrot.lane.b32.xlu0 %v5332_v4, %s4656_s28 }
 0x1ac   : > { %v1062_v6 = vpop.permute.xlu1 %1061 }
 0x1ad   : > { %1146 = vst.msk [vmem:[#allocation3 + $0x360] sm:$0xff] %vm1133_vm5, %v1062_v6  ;;  %v485_v23 = vpop.permute.xlu0 %484  ;;  %880 = vrot.lane.b32.xlu2 %v5313_v54, %s4654_s26 }
 0x1ae   : > { %1339 = vst.msk [vmem:[#allocation3 + $0x360] sm:$0xff] %vm1326_vm6, %v1255_v61 }
 0x1af   : > { %1533 = vst.msk [vmem:[#allocation3 + $0x360] sm:$0xff] %vm1520_vm7, %v1449_v16  ;;  %v1451_v24 = vpop.permute.xlu2 %1450 }
 0x1b0   : > { %568 = vst.msk [vmem:[#allocation3 + $0x3a8] sm:$0xff] %vm554_vm1, %v485_v23  ;;  %v5372_v0 = vld [vmem:[#allocation2 + $0x50] sm:$0xff]  ;;  %v5479_v23 = vld [vmem:[#allocation2 + $0x120] sm:$0xff] }
 0x1b1   : > { %2297 = vst [vmem:[#allocation3 + $0x1f8] sm:$0xff] %v5372_v0  ;;  %3307 = vmatmul.f32.gmra.mxu1 %v5372_v0  ;;  %v2519_v30 = vld [vmem:[#allocation2 + $0x51] sm:$0xff] }
 0x1b2   : > { %1073 = vrot.lane.b32.xlu1 %v5309_v50, %s4657_s29  ;;  %v2392_v22 = vld [vmem:[#allocation2 + $0x4a] sm:$0xff]  ;;  %2551 = vst [vmem:[#allocation3 + $0x188] sm:$0xff] %v2519_v30  ;;  %v2393_v35 = vld [vmem:[#allocation2 + $0x52] sm:$0xff] }
 0x1b3   : > { %1844 = vrot.lane.b32.xlu0 %v5374_v27, %s4659_s6  ;;  %v2329_v37 = vld [vmem:[#allocation2 + $0x51] sm:$0xff]  ;;  %2424 = vst [vmem:[#allocation3 + $0x1c0] sm:$0xff] %v2392_v22 }
 0x1b4   : > { %v1642_v29 = vpop.permute.xlu1 %1641  ;;  %2425 = vst [vmem:[#allocation3 + $0x208] sm:$0xff] %v2393_v35  ;;  %v2645_v48 = vld [vmem:[#allocation2 + $0x50] sm:$0xff]  ;;  %v290_v35 = vld [vmem:[%s4745_s25 + $0xc8] sm:$0xff] }
 0x1b5   : > { %1726 = vst.msk [vmem:[#allocation3 + $0x360] sm:$0xff] %vm1713_vm8, %v1642_v29  ;;  %v1064_v31 = vpop.permute.xlu0 %1063  ;;  %1458 = vrot.lane.b32.xlu2 %v5359_v21, %s4658_s30  ;;  %v2582_v1 = vld [vmem:[#allocation2 + $0x4a] sm:$0xff]  ;;  %v2583_v47 = vld [vmem:[#allocation2 + $0x52] sm:$0xff] }
 0x1b6   : > { %1919 = vst.msk [vmem:[#allocation3 + $0x360] sm:$0xff] %vm1906_vm9, %v1835_v12 }
 0x1b7   : > { %v487_v34 = vpop.permute.xlu2 %486  ;;  %2361 = vst [vmem:[#allocation3 + $0x200] sm:$0xff] %v2329_v37 }
 0x1b8   : > { %569 = vst.msk [vmem:[#allocation3 + $0x3f0] sm:$0xff] %vm554_vm1, %v487_v34  ;;  %v5496_v34 = vld [vmem:[#allocation2 + $0x128] sm:$0xff] }
 0x1b9   : > { %2677 = vst [vmem:[#allocation3 + $0x108] sm:$0xff] %v2645_v48 }
 0x1ba   : > { %1651 = vrot.lane.b32.xlu1 %v5391_v32, %s4655_s27  ;;  %2614 = vst [vmem:[#allocation3 + $0x148] sm:$0xff] %v2582_v1 }
 0x1bb   : > { %v2116_v10 = vpop.f32.mrf.mxu0  ;;  %496 = vrot.lane.b32.xlu0 %v5295_v41, %s4652_s20  ;;  %v5405_v41 = vld [vmem:[#allocation2 + $0x109] sm:$0xff]  ;;  %2615 = vst [vmem:[#allocation3 + $0x190] sm:$0xff] %v2583_v47  ;;  %v3182_v47 = vld [vmem:[%s7364_s3 + $0x1e0] sm:$0xff] }
 0x1bc   : > { %v678_v38 = vpop.permute.xlu1 %677  ;;  %v2117_v39 = vadd.f32 %v5184_v33, %v2116_v10  ;;  %323 = vst.msk [vmem:[#allocation2 + $0x141] sm:$0xff] %vm297_vm0, %v290_v35 }
 0x1bd   : > { %761 = vst.msk [vmem:[#allocation3 + $0x3a8] sm:$0xff] %vm747_vm2, %v678_v38  ;;  %v1951_v40 = vld [vmem:[#allocation3 + $0x360] sm:$0xff]  ;;  %v1644_v25 = vpop.permute.xlu0 %1643  ;;  %1460 = vrot.lane.b32.xlu2 %v5383_v28, %s4658_s30 }
 0x1be   : > { %954 = vst.msk [vmem:[#allocation3 + $0x3a8] sm:$0xff] %vm940_vm4, %v871_v20  ;;  %v2200_v43 = vmax.f32 %v2117_v39, 0.0  ;;  %4428 = vmatmul.msk.f32.gmra.mxu0 %vm1980_vm10, %v1951_v40 }
 0x1bf   : > { %1147 = vst.msk [vmem:[#allocation3 + $0x3a8] sm:$0xff] %vm1133_vm5, %v1064_v31  ;;  %v1066_v46 = vpop.permute.xlu2 %1065  ;;  %v289_v31 = vld [vmem:[%s4745_s25 + $0xc0] sm:$0xff] }
 0x1c0   : > { %2232 = vst [vmem:[#allocation2 + $0x61] sm:$0xff] %v2200_v43 }
 0x1c1   : > { %322 = vst.msk [vmem:[#allocation2 + $0x139] sm:$0xff] %vm297_vm0, %v289_v31 }
 0x1c2   : > { %1653 = vrot.lane.b32.xlu1 %v5405_v41, %s4655_s27 }
 0x1c3   : > { %1075 = vrot.lane.b32.xlu0 %v5391_v32, %s4657_s29 }
 0x1c4   : > { %v1257_v51 = vpop.permute.xlu1 %1256 }
 0x1c5   : > { %1340 = vst.msk [vmem:[#allocation3 + $0x3a8] sm:$0xff] %vm1326_vm6, %v1257_v51  ;;  %v680_v54 = vpop.permute.xlu0 %679  ;;  %1846 = vrot.lane.b32.xlu2 %v5409_v49, %s4659_s6 }
 0x1c6   : > { %1534 = vst.msk [vmem:[#allocation3 + $0x3a8] sm:$0xff] %vm1520_vm7, %v1451_v24 }
 0x1c7   : > { %1727 = vst.msk [vmem:[#allocation3 + $0x3a8] sm:$0xff] %vm1713_vm8, %v1644_v25  ;;  %v5420_v55 = vld [vmem:[#allocation2 + $0x60] sm:$0xff]  ;;  %v1646_v56 = vpop.permute.xlu2 %1645 }
 0x1c8   : > { %762 = vst.msk [vmem:[#allocation3 + $0x3f0] sm:$0xff] %vm747_vm2, %v680_v54  ;;  %3310 = vmatmul.f32.gmra.mxu1 %v5420_v55  ;;  %v2520_v58 = vld [vmem:[#allocation2 + $0x61] sm:$0xff]  ;;  %v5551_v1 = vld [vmem:[#allocation2 + $0x139] sm:$0xff] }
 0x1c9   : > { %2298 = vst [vmem:[#allocation3 + $0x240] sm:$0xff] %v5420_v55  ;;  %v2330_v60 = vld [vmem:[#allocation2 + $0x61] sm:$0xff] }
 0x1ca   : > { %689 = vrot.lane.b32.xlu1 %v5299_v42, %s4653_s21  ;;  %2552 = vst [vmem:[#allocation3 + $0x1d0] sm:$0xff] %v2520_v58  ;;  %v2646_v42 = vld [vmem:[#allocation2 + $0x60] sm:$0xff]  ;;  %v3184_v58 = vld [vmem:[%s7364_s3 + $0x1f0] sm:$0xff] }
 0x1cb   : > { %1655 = vrot.lane.b32.xlu0 %v5425_v53, %s4655_s27  ;;  %2362 = vst [vmem:[#allocation3 + $0x248] sm:$0xff] %v2330_v60 }
 0x1cc   : > { %v1837_v59 = vpop.permute.xlu1 %1836  ;;  %2678 = vst [vmem:[#allocation3 + $0x150] sm:$0xff] %v2646_v42 }
 0x1cd   : > { %1920 = vst.msk [vmem:[#allocation3 + $0x3a8] sm:$0xff] %vm1906_vm9, %v1837_v59  ;;  %v1259_v62 = vpop.permute.xlu0 %1258  ;;  %882 = vrot.lane.b32.xlu2 %v5359_v21, %s4654_s26 }
 0x1cf   : > { %v682_v63 = vpop.permute.xlu2 %681 }
 0x1d2   : > { %1268 = vrot.lane.b32.xlu1 %v5374_v27, %s4656_s28  ;;  %v2119_v2 = vpop.f32.mrf.mxu0 }
 0x1d3   : > { %v2120_v3 = vadd.f32 %v5184_v33, %v2119_v2  ;;  %691 = vrot.lane.b32.xlu0 %v5332_v4, %s4653_s21  ;;  %v3181_v2 = vld [vmem:[%s7364_s3 + $0x1d8] sm:$0xff] }
 0x1d4   : > { %v873_v61 = vpop.permute.xlu1 %872  ;;  %v1952_v7 = vld [vmem:[#allocation3 + $0x3a8] sm:$0xff] }
 0x1d5   : > { %v2201_v8 = vmax.f32 %v2120_v3, 0.0  ;;  %955 = vst.msk [vmem:[#allocation3 + $0x3f0] sm:$0xff] %vm940_vm4, %v873_v61  ;;  %4429 = vmatmul.msk.f32.gmra.mxu0 %vm1980_vm10, %v1952_v7  ;;  %v1839_v52 = vpop.permute.xlu0 %1838  ;;  %1462 = vrot.lane.b32.xlu2 %v5433_v36, %s4658_s30  ;;  %v3180_v61 = vld [vmem:[%s7364_s3 + $0x1d0] sm:$0xff] }
 0x1d6   : > { %1148 = vst.msk [vmem:[#allocation3 + $0x3f0] sm:$0xff] %vm1133_vm5, %v1066_v46 }
 0x1d7   : > { %2233 = vst [vmem:[#allocation2 + $0x69] sm:$0xff] %v2201_v8  ;;  %v1261_v11 = vpop.permute.xlu2 %1260 }
 0x1d8   : > { %1341 = vst.msk [vmem:[#allocation3 + $0x3f0] sm:$0xff] %vm1326_vm6, %v1259_v62  ;;  %v3183_v62 = vld [vmem:[%s7364_s3 + $0x1e8] sm:$0xff] }
 0x1da   : > { %1848 = vrot.lane.b32.xlu1 %v5450_v9, %s4659_s6 }
 0x1db   : > { %1270 = vrot.lane.b32.xlu0 %v5409_v49, %s4656_s28 }
 0x1dc   : > { %v1453_v4 = vpop.permute.xlu1 %1452 }
 0x1dd   : > { %1535 = vst.msk [vmem:[#allocation3 + $0x3f0] sm:$0xff] %vm1520_vm7, %v1453_v4  ;;  %v875_v12 = vpop.permute.xlu0 %874  ;;  %498 = vrot.lane.b32.xlu2 %v5309_v50, %s4652_s20 }
 0x1de   : > { %1728 = vst.msk [vmem:[#allocation3 + $0x3f0] sm:$0xff] %vm1713_vm8, %v1646_v56  ;;  %v5461_v13 = vld [vmem:[#allocation2 + $0x68] sm:$0xff] }
 0x1df   : > { %1921 = vst.msk [vmem:[#allocation3 + $0x3f0] sm:$0xff] %vm1906_vm9, %v1839_v52  ;;  %3313 = vmatmul.f32.gmra.mxu1 %v5461_v13  ;;  %v1841_v14 = vpop.permute.xlu2 %1840  ;;  %v2521_v5 = vld [vmem:[#allocation2 + $0x69] sm:$0xff] }
 0x1e0   : > { %2299 = vst [vmem:[#allocation3 + $0x288] sm:$0xff] %v5461_v13  ;;  %v2394_v15 = vld [vmem:[#allocation2 + $0x62] sm:$0xff]  ;;  %v2395_v16 = vld [vmem:[#allocation2 + $0x6a] sm:$0xff] }
 0x1e1   : > { %2553 = vst [vmem:[#allocation3 + $0x218] sm:$0xff] %v2521_v5  ;;  %v2331_v20 = vld [vmem:[#allocation2 + $0x69] sm:$0xff]  ;;  %v3177_v5 = vld [vmem:[%s7364_s3 + $0x1b8] sm:$0xff] }
 0x1e2   : > { %884 = vrot.lane.b32.xlu1 %v5383_v28, %s4654_s26  ;;  %2426 = vst [vmem:[#allocation3 + $0x250] sm:$0xff] %v2394_v15  ;;  %v2647_v40 = vld [vmem:[#allocation2 + $0x68] sm:$0xff] }
 0x1e3   : > { %1850 = vrot.lane.b32.xlu0 %v5466_v44, %s4659_s6  ;;  %2427 = vst [vmem:[#allocation3 + $0x298] sm:$0xff] %v2395_v16  ;;  %v2584_v54 = vld [vmem:[#allocation2 + $0x62] sm:$0xff]  ;;  %v2585_v57 = vld [vmem:[#allocation2 + $0x6a] sm:$0xff] }
 0x1e4   : > { %v489_v50 = vpop.permute.xlu1 %488  ;;  %v2122_v17 = vpop.f32.mrf.mxu0  ;;  %2363 = vst [vmem:[#allocation3 + $0x290] sm:$0xff] %v2331_v20 }
 0x1e5   : > { %570 = vst.msk [vmem:[#allocation3 + $0x438] sm:$0xff] %vm554_vm1, %v489_v50  ;;  %v2123_v18 = vadd.f32 %v5184_v33, %v2122_v17  ;;  %v1455_v19 = vpop.permute.xlu0 %1454  ;;  %1077 = vrot.lane.b32.xlu2 %v5405_v41, %s4657_s29  ;;  %v5584_v50 = vld [vmem:[#allocation2 + $0x138] sm:$0xff]  ;;  %v5589_v17 = vld [vmem:[%s7363_s2] ss:$0 sm:$0xff] }
 0x1e6   : > { %763 = vst.msk [vmem:[#allocation3 + $0x438] sm:$0xff] %vm747_vm2, %v682_v63  ;;  %v1953_v21 = vld [vmem:[#allocation3 + $0x3f0] sm:$0xff] }
 0x1e7   : > { %v2202_v6 = vmax.f32 %v2123_v18, 0.0  ;;  %956 = vst.msk [vmem:[#allocation3 + $0x438] sm:$0xff] %vm940_vm4, %v875_v12  ;;  %4430 = vmatmul.msk.f32.gmra.mxu0 %vm1980_vm10, %v1953_v21  ;;  %v877_v24 = vpop.permute.xlu2 %876  ;;  %v3178_v12 = vld [vmem:[%s7364_s3 + $0x1c0] sm:$0xff] }
 0x1e8   : > { %2679 = vst [vmem:[#allocation3 + $0x198] sm:$0xff] %v2647_v40 }
 0x1e9   : > { %2234 = vst [vmem:[#allocation2 + $0x79] sm:$0xff] %v2202_v6 }
 0x1ea   : > { %1464 = vrot.lane.b32.xlu1 %v5479_v23, %s4658_s30  ;;  %2616 = vst [vmem:[#allocation3 + $0x1d8] sm:$0xff] %v2584_v54 }
 0x1eb   : > { %886 = vrot.lane.b32.xlu0 %v5433_v36, %s4654_s26  ;;  %v5532_v36 = vld [vmem:[#allocation2 + $0x12a] sm:$0xff]  ;;  %2617 = vst [vmem:[#allocation3 + $0x220] sm:$0xff] %v2585_v57 }
 0x1ec   : > { %v1068_v28 = vpop.permute.xlu1 %1067 }
 0x1ed   : > { %1149 = vst.msk [vmem:[#allocation3 + $0x438] sm:$0xff] %vm1133_vm5, %v1068_v28  ;;  %v491_v29 = vpop.permute.xlu0 %490  ;;  %1657 = vrot.lane.b32.xlu2 %v5483_v26, %s4655_s27 }
 0x1ee   : > { %1342 = vst.msk [vmem:[#allocation3 + $0x438] sm:$0xff] %vm1326_vm6, %v1261_v11 }
 0x1ef   : > { %1536 = vst.msk [vmem:[#allocation3 + $0x438] sm:$0xff] %vm1520_vm7, %v1455_v19  ;;  %v1457_v30 = vpop.permute.xlu2 %1456  ;;  %v3176_v19 = vld [vmem:[%s7364_s3 + $0x1b0] sm:$0xff] }
 0x1f0   : > { %571 = vst.msk [vmem:[#allocation3 + $0x480] sm:$0xff] %vm554_vm1, %v491_v29  ;;  %v5494_v22 = vld [vmem:[#allocation2 + $0x78] sm:$0xff]  ;;  %v3174_v29 = vld [vmem:[%s7364_s3 + $0x1a0] sm:$0xff] }
 0x1f1   : > { %2300 = vst [vmem:[#allocation3 + $0x2d0] sm:$0xff] %v5494_v22  ;;  %3316 = vmatmul.f32.gmra.mxu1 %v5494_v22  ;;  %v5507_v10 = vld [vmem:[#allocation2 + $0x79] sm:$0xff] }
 0x1f2   : > { %500 = vrot.lane.b32.xlu1 %v5391_v32, %s4652_s20  ;;  %v2332_v32 = vld [vmem:[#allocation2 + $0x79] sm:$0xff] }
 0x1f3   : > { %1466 = vrot.lane.b32.xlu0 %v5496_v34, %s4658_s30  ;;  %2364 = vst [vmem:[#allocation3 + $0x2d8] sm:$0xff] %v2332_v32  ;;  %v2648_v25 = vld [vmem:[#allocation2 + $0x78] sm:$0xff] }
 0x1f4   : > { %v1648_v37 = vpop.permute.xlu1 %1647  ;;  %2680 = vst [vmem:[#allocation3 + $0x1e0] sm:$0xff] %v2648_v25  ;;  %v3171_v25 = vld [vmem:[%s7364_s3 + $0x188] sm:$0xff] }
 0x1f5   : > { %1729 = vst.msk [vmem:[#allocation3 + $0x438] sm:$0xff] %vm1713_vm8, %v1648_v37  ;;  %v1070_v38 = vpop.permute.xlu0 %1069  ;;  %693 = vrot.lane.b32.xlu2 %v5374_v27, %s4653_s21  ;;  %v3173_v37 = vld [vmem:[%s7364_s3 + $0x198] sm:$0xff] }
 0x1f6   : > { %1922 = vst.msk [vmem:[#allocation3 + $0x438] sm:$0xff] %vm1906_vm9, %v1841_v14 }
 0x1f7   : > { %v493_v39 = vpop.permute.xlu2 %492 }
 0x1f8   : > { %572 = vst.msk [vmem:[#allocation3 + $0x4c8] sm:$0xff] %vm554_vm1, %v493_v39 }
 0x1fa   : > { %1079 = vrot.lane.b32.xlu1 %v5425_v53, %s4657_s29 }
 0x1fb   : > { %v2125_v43 = vpop.f32.mrf.mxu0  ;;  %502 = vrot.lane.b32.xlu0 %v5405_v41, %s4652_s20  ;;  %v3185_v41 = vld [vmem:[%s7364_s3 + $0x1f8] sm:$0xff] }
 0x1fc   : > { %v2126_v46 = vadd.f32 %v5184_v33, %v2125_v43  ;;  %v684_v27 = vpop.permute.xlu1 %683  ;;  %v5528_v33 = vld [vmem:[#allocation2 + $0x129] sm:$0xff]  ;;  %3609 = vmatpush.msrb.mxu0 %v3185_v41 }
 0x1fd   : > { %764 = vst.msk [vmem:[#allocation3 + $0x480] sm:$0xff] %vm747_vm2, %v684_v27  ;;  %v1954_v48 = vld [vmem:[#allocation3 + $0x438] sm:$0xff]  ;;  %v1650_v45 = vpop.permute.xlu0 %1649  ;;  %1272 = vrot.lane.b32.xlu2 %v5450_v9, %s4656_s28 }
 0x1fe   : > { %v2203_v51 = vmax.f32 %v2126_v46, 0.0  ;;  %957 = vst.msk [vmem:[#allocation3 + $0x480] sm:$0xff] %vm940_vm4, %v877_v24  ;;  %4431 = vmatmul.msk.f32.gmra.mxu0 %vm1980_vm10, %v1954_v48  ;;  %v3175_v24 = vld [vmem:[%s7364_s3 + $0x1a8] sm:$0xff] }
 0x1ff   : > { %1150 = vst.msk [vmem:[#allocation3 + $0x480] sm:$0xff] %vm1133_vm5, %v1070_v38  ;;  %v879_v56 = vpop.permute.xlu2 %878  ;;  %3610 = vmatpush.msrb.mxu0 %v3184_v58  ;;  %v3172_v38 = vld [vmem:[%s7364_s3 + $0x190] sm:$0xff]  ;;  %v5637_v27 = vld [vmem:[#allocation2 + $0x142] sm:$0xff] }
 0x200   : > { %2235 = vst [vmem:[#allocation2 + $0x81] sm:$0xff] %v2203_v51 }
 0x201   : > { %3611 = vmatpush.msrb.mxu0 %v3183_v62 }
 0x202   : > { %1659 = vrot.lane.b32.xlu1 %v5528_v33, %s4655_s27 }
 0x203   : > { %1081 = vrot.lane.b32.xlu0 %v5483_v26, %s4657_s29  ;;  %3612 = vmatpush.msrb.mxu0 %v3182_v47 }
 0x204   : > { %v1263_v59 = vpop.permute.xlu1 %1262 }
 0x205   : > { %1343 = vst.msk [vmem:[#allocation3 + $0x480] sm:$0xff] %vm1326_vm6, %v1263_v59  ;;  %v686_v60 = vpop.permute.xlu0 %685  ;;  %1852 = vrot.lane.b32.xlu2 %v5532_v36, %s4659_s6  ;;  %3613 = vmatpush.msrb.mxu0 %v3181_v2  ;;  %v5658_v59 = vld [vmem:[#allocation2 + $0x141] sm:$0xff] }
 0x206   : > { %1537 = vst.msk [vmem:[#allocation3 + $0x480] sm:$0xff] %vm1520_vm7, %v1457_v30  ;;  %v291_v30 = vld [vmem:[%s4745_s25 + $0xd0] sm:$0xff]  ;;  %v3199_v2 = vld [vmem:[%s7364_s3 + $0x268] sm:$0xff] }
 0x207   : > { %1730 = vst.msk [vmem:[#allocation3 + $0x480] sm:$0xff] %vm1713_vm8, %v1650_v45  ;;  %v5547_v42 = vld [vmem:[#allocation2 + $0x80] sm:$0xff]  ;;  %v881_v63 = vpop.permute.xlu2 %880  ;;  %3614 = vmatpush.msrb.mxu0 %v3180_v61 }
 0x208   : > { %765 = vst.msk [vmem:[#allocation3 + $0x4c8] sm:$0xff] %vm747_vm2, %v686_v60  ;;  %3319 = vmatmul.f32.gmra.mxu1 %v5547_v42  ;;  %v5560_v3 = vld [vmem:[#allocation2 + $0x81] sm:$0xff]  ;;  %v3201_v60 = vld [vmem:[%s7364_s3 + $0x278] sm:$0xff] }
 0x209   : > { %2301 = vst [vmem:[#allocation3 + $0x318] sm:$0xff] %v5547_v42  ;;  %v2396_v7 = vld [vmem:[#allocation2 + $0x7a] sm:$0xff]  ;;  %v2397_v52 = vld [vmem:[#allocation2 + $0x82] sm:$0xff]  ;;  %3722 = vmatpush.msrb.mxu1 %v3201_v60 }
 0x20a   : > { %695 = vrot.lane.b32.xlu1 %v5409_v49, %s4653_s21  ;;  %958 = vst.msk [vmem:[#allocation3 + $0x4c8] sm:$0xff] %vm940_vm4, %v879_v56  ;;  %v3179_v49 = vld [vmem:[%s7364_s3 + $0x1c8] sm:$0xff]  ;;  %v2649_v15 = vld [vmem:[#allocation2 + $0x80] sm:$0xff] }
 0x20b   : > { %1661 = vrot.lane.b32.xlu0 %v5551_v1, %s4655_s27  ;;  %v2333_v4 = vld [vmem:[#allocation2 + $0x81] sm:$0xff]  ;;  %2428 = vst [vmem:[#allocation3 + $0x2e0] sm:$0xff] %v2396_v7  ;;  %3615 = vmatpush.msrb.mxu0 %v3179_v49 }
 0x20c   : > { %v1843_v8 = vpop.permute.xlu1 %1842  ;;  %2429 = vst [vmem:[#allocation3 + $0x328] sm:$0xff] %v2397_v52  ;;  %v2586_v31 = vld [vmem:[#allocation2 + $0x7a] sm:$0xff]  ;;  %v2587_v35 = vld [vmem:[#allocation2 + $0x82] sm:$0xff] }
 0x20d   : > { %1923 = vst.msk [vmem:[#allocation3 + $0x480] sm:$0xff] %vm1906_vm9, %v1843_v8  ;;  %v688_v11 = vpop.permute.xlu0 %687  ;;  %888 = vrot.lane.b32.xlu2 %v5479_v23, %s4654_s26  ;;  %3616 = vmatpush.msrb.mxu0 %v3178_v12  ;;  %v3198_v52 = vld [vmem:[%s7364_s3 + $0x260] sm:$0xff] }
 0x20e   : > { %2365 = vst [vmem:[#allocation3 + $0x320] sm:$0xff] %v2333_v4  ;;  %v3197_v4 = vld [vmem:[%s7364_s3 + $0x258] sm:$0xff]  ;;  %v3186_v60 = vld [vmem:[%s7364_s3 + $0x200] sm:$0xff] }
 0x20f   : > { %v1459_v14 = vpop.permute.xlu2 %1458  ;;  %3617 = vmatpush.msrb.mxu0 %v3177_v5  ;;  %2681 = vst [vmem:[#allocation3 + $0x228] sm:$0xff] %v2649_v15 }
 0x210   : > { %324 = vst.msk [vmem:[#allocation2 + $0x151] sm:$0xff] %vm297_vm0, %v291_v30  ;;  %v4519_v30 = vld [vmem:[#allocation3 + $0x18] sm:$0xff] }
 0x211   : > { %3618 = vmatpush.msrb.mxu0 %v3176_v19  ;;  %2618 = vst [vmem:[#allocation3 + $0x268] sm:$0xff] %v2586_v31  ;;  %v3191_v31 = vld [vmem:[%s7364_s3 + $0x228] sm:$0xff] }
 0x212   : > { %1274 = vrot.lane.b32.xlu1 %v5466_v44, %s4656_s28  ;;  %v2128_v16 = vpop.f32.mrf.mxu0  ;;  %2619 = vst [vmem:[#allocation3 + $0x2b0] sm:$0xff] %v2587_v35 }
 0x213   : > { %v2129_v18 = vadd.f32 %v5589_v17, %v2128_v16  ;;  %697 = vrot.lane.b32.xlu0 %v5450_v9, %s4653_s21  ;;  %v5602_v9 = vld [vmem:[#allocation2 + $0x13a] sm:$0xff]  ;;  %3619 = vmatpush.msrb.mxu0 %v3175_v24  ;;  %v3195_v16 = vld [vmem:[%s7364_s3 + $0x248] sm:$0xff]  ;;  %v3192_v24 = vld [vmem:[%s7364_s3 + $0x230] sm:$0xff] }
 0x214   : > { %v495_v20 = vpop.permute.xlu1 %494  ;;  %v1955_v21 = vld [vmem:[#allocation3 + $0x480] sm:$0xff] }
 0x215   : > { %573 = vst.msk [vmem:[#allocation3 + $0x510] sm:$0xff] %vm554_vm1, %v495_v20  ;;  %v2204_v6 = vmax.f32 %v2129_v18, 0.0  ;;  %4432 = vmatmul.msk.f32.gmra.mxu0 %vm1980_vm10, %v1955_v21  ;;  %v1265_v23 = vpop.permute.xlu0 %1264  ;;  %1468 = vrot.lane.b32.xlu2 %v5584_v50, %s4658_s30  ;;  %v3193_v20 = vld [vmem:[%s7364_s3 + $0x238] sm:$0xff] }
 0x216   : > { %766 = vst.msk [vmem:[#allocation3 + $0x510] sm:$0xff] %vm747_vm2, %v688_v11  ;;  %3620 = vmatpush.msrb.mxu0 %v3174_v29  ;;  %v292_v11 = vld [vmem:[%s4745_s25 + $0xd8] sm:$0xff] }
 0x217   : > { %2236 = vst [vmem:[#allocation2 + $0x91] sm:$0xff] %v2204_v6  ;;  %v1461_v28 = vpop.permute.xlu2 %1460  ;;  %v5676_v61 = vld [vmem:[#allocation2 + $0x150] sm:$0xff] }
 0x218   : > { %959 = vst.msk [vmem:[#allocation3 + $0x510] sm:$0xff] %vm940_vm4, %v881_v63  ;;  %3621 = vmatpush.msrb.mxu0 %v3173_v37  ;;  %v3200_v63 = vld [vmem:[%s7364_s3 + $0x270] sm:$0xff] }
 0x219   : > { %3723 = vmatpush.msrb.mxu1 %v3200_v63  ;;  %325 = vst.msk [vmem:[#allocation2 + $0x159] sm:$0xff] %vm297_vm0, %v292_v11  ;;  %v5737_v35 = vld [vmem:[#allocation2 + $0x151] sm:$0xff] }
 0x21a   : > { %1854 = vrot.lane.b32.xlu1 %v5602_v9, %s4659_s6  ;;  %3622 = vmatpush.msrb.mxu0 %v3172_v38  ;;  %v3190_v38 = vld [vmem:[%s7364_s3 + $0x220] sm:$0xff] }
 0x21b   : > { %1276 = vrot.lane.b32.xlu0 %v5532_v36, %s4656_s28  ;;  %3724 = vmatpush.msrb.mxu1 %v3199_v2 }
 0x21c   : > { %v1072_v32 = vpop.permute.xlu1 %1071  ;;  %3623 = vmatpush.msrb.mxu0 %v3171_v25 }
 0x21d   : > { %1151 = vst.msk [vmem:[#allocation3 + $0x4c8] sm:$0xff] %vm1133_vm5, %v1072_v32  ;;  %v1267_v39 = vpop.permute.xlu0 %1266  ;;  %504 = vrot.lane.b32.xlu2 %v5425_v53, %s4652_s20  ;;  %v3170_v53 = vld [vmem:[%s7364_s3 + $0x180] sm:$0xff]  ;;  %3725 = vmatpush.msrb.mxu1 %v3198_v52  ;;  %v4521_v52 = vld [vmem:[#allocation3 + $0xa8] sm:$0xff] }
 0x21e   : > { %1344 = vst.msk [vmem:[#allocation3 + $0x4c8] sm:$0xff] %vm1326_vm6, %v1265_v23  ;;  %v5627_v40 = vld [vmem:[#allocation2 + $0x90] sm:$0xff]  ;;  %3624 = vmatpush.msrb.mxu0 %v3170_v53 }
 0x21f   : > { %1538 = vst.msk [vmem:[#allocation3 + $0x4c8] sm:$0xff] %vm1520_vm7, %v1459_v14  ;;  %3322 = vmatmul.f32.gmra.mxu1 %v5627_v40  ;;  %v1847_v43 = vpop.permute.xlu2 %1846  ;;  %v5634_v46 = vld [vmem:[#allocation2 + $0x91] sm:$0xff] }
 0x220   : > { %2302 = vst [vmem:[#allocation3 + $0x360] sm:$0xff] %v5627_v40  ;;  %v2334_v48 = vld [vmem:[#allocation2 + $0x91] sm:$0xff]  ;;  %3726 = vmatpush.msrb.mxu1 %v3197_v4 }
 0x221   : > { %2366 = vst [vmem:[#allocation3 + $0x368] sm:$0xff] %v2334_v48  ;;  %v2650_v56 = vld [vmem:[#allocation2 + $0x90] sm:$0xff] }
 0x222   : > { %890 = vrot.lane.b32.xlu1 %v5496_v34, %s4654_s26  ;;  %v5651_v34 = vld [vmem:[#allocation2 + $0x140] sm:$0xff]  ;;  %2682 = vst [vmem:[#allocation3 + $0x270] sm:$0xff] %v2650_v56  ;;  %v3196_v14 = vld [vmem:[%s7364_s3 + $0x250] sm:$0xff] }
 0x223   : > { %1856 = vrot.lane.b32.xlu0 %v5637_v27, %s4659_s6  ;;  %3727 = vmatpush.msrb.mxu1 %v3196_v14  ;;  %v5748_v25 = vld [vmem:[#allocation2 + $0x152] sm:$0xff] }
 0x224   : > { %v1074_v45 = vpop.permute.xlu1 %1073  ;;  %v2131_v51 = vpop.f32.mrf.mxu0  ;;  %v3188_v48 = vld [vmem:[%s7364_s3 + $0x210] sm:$0xff] }
 0x225   : > { %1152 = vst.msk [vmem:[#allocation3 + $0x510] sm:$0xff] %vm1133_vm5, %v1074_v45  ;;  %v2132_v41 = vadd.f32 %v5589_v17, %v2131_v51  ;;  %v1845_v54 = vpop.permute.xlu0 %1844  ;;  %1083 = vrot.lane.b32.xlu2 %v5528_v33, %s4657_s29  ;;  %3728 = vmatpush.msrb.mxu1 %v3195_v16  ;;  %v4520_v51 = vld [vmem:[#allocation3 + $0x60] sm:$0xff]  ;;  %v4522_v16 = vld [vmem:[#allocation3 + $0xf0] sm:$0xff] }
 0x226   : > { %1345 = vst.msk [vmem:[#allocation3 + $0x510] sm:$0xff] %vm1326_vm6, %v1267_v39 }
 0x227   : > { %v2205_v57 = vmax.f32 %v2132_v41, 0.0  ;;  %1539 = vst.msk [vmem:[#allocation3 + $0x510] sm:$0xff] %vm1520_vm7, %v1461_v28  ;;  %v5654_v58 = vpop.permute.xlu2 %882  ;;  %v3187_v41 = vld [vmem:[%s7364_s3 + $0x208] sm:$0xff] }
 0x229   : > { %2237 = vst [vmem:[#allocation2 + $0x99] sm:$0xff] %v2205_v57  ;;  %v293_v57 = vld [vmem:[%s4745_s25 + $0xe0] sm:$0xff] }
 0x22a   : > { %1470 = vrot.lane.b32.xlu1 %v5651_v34, %s4658_s30  ;;  %326 = vst.msk [vmem:[#allocation2 + $0x169] sm:$0xff] %vm297_vm0, %v293_v57  ;;  %v295_v57 = vld [vmem:[%s4745_s25 + $0xf0] sm:$0xff] }
 0x22b   : > { %892 = vrot.lane.b32.xlu0 %v5584_v50, %s4654_s26  ;;  %328 = vst.msk [vmem:[#allocation2 + $0x181] sm:$0xff] %vm297_vm0, %v295_v57 }
 0x22c   : > { %v1652_v62 = vpop.permute.xlu1 %1651 }
 0x22d   : > { %1731 = vst.msk [vmem:[#allocation3 + $0x4c8] sm:$0xff] %vm1713_vm8, %v1652_v62  ;;  %v497_v47 = vpop.permute.xlu0 %496  ;;  %1663 = vrot.lane.b32.xlu2 %v5658_v59, %s4655_s27  ;;  %v294_v62 = vld [vmem:[%s4745_s25 + $0xe8] sm:$0xff] }
 0x22e   : > { %1924 = vst.msk [vmem:[#allocation3 + $0x4c8] sm:$0xff] %vm1906_vm9, %v1845_v54 }
 0x22f   : > { %574 = vst.msk [vmem:[#allocation3 + $0x558] sm:$0xff] %vm554_vm1, %v497_v47  ;;  %v5678_v7 = vpop.permute.xlu2 %1462 }
 0x230   : > { %v5680_v8 = vld [vmem:[#allocation2 + $0x98] sm:$0xff]  ;;  %327 = vst.msk [vmem:[#allocation2 + $0x171] sm:$0xff] %vm297_vm0, %v294_v62 }
 0x231   : > { %2303 = vst [vmem:[#allocation3 + $0x3a8] sm:$0xff] %v5680_v8  ;;  %3325 = vmatmul.f32.gmra.mxu1 %v5680_v8  ;;  %v5688_v49 = vld [vmem:[#allocation2 + $0x99] sm:$0xff] }
 0x232   : > { %506 = vrot.lane.b32.xlu1 %v5483_v26, %s4652_s20  ;;  %v2398_v5 = vld [vmem:[#allocation2 + $0x92] sm:$0xff]  ;;  %v2399_v50 = vld [vmem:[#allocation2 + $0x9a] sm:$0xff] }
 0x233   : > { %1472 = vrot.lane.b32.xlu0 %v5676_v61, %s4658_s30  ;;  %2430 = vst [vmem:[#allocation3 + $0x370] sm:$0xff] %v2398_v5  ;;  %v2335_v19 = vld [vmem:[#allocation2 + $0x99] sm:$0xff] }
 0x234   : > { %v1654_v12 = vpop.permute.xlu1 %1653  ;;  %2431 = vst [vmem:[#allocation3 + $0x3b8] sm:$0xff] %v2399_v50  ;;  %v2651_v32 = vld [vmem:[#allocation2 + $0x98] sm:$0xff] }
 0x235   : > { %1732 = vst.msk [vmem:[#allocation3 + $0x510] sm:$0xff] %vm1713_vm8, %v1654_v12  ;;  %v1956_v26 = vld [vmem:[#allocation3 + $0x4c8] sm:$0xff]  ;;  %v1076_v15 = vpop.permute.xlu0 %1075  ;;  %699 = vrot.lane.b32.xlu2 %v5466_v44, %s4653_s21  ;;  %v3194_v44 = vld [vmem:[%s7364_s3 + $0x240] sm:$0xff] }
 0x236   : > { %1925 = vst.msk [vmem:[#allocation3 + $0x510] sm:$0xff] %vm1906_vm9, %v1847_v43  ;;  %4433 = vmatmul.msk.f32.gmra.mxu0 %vm1980_vm10, %v1956_v26  ;;  %3729 = vmatpush.msrb.mxu1 %v3194_v44  ;;  %v2588_v39 = vld [vmem:[#allocation2 + $0x92] sm:$0xff]  ;;  %v2589_v4 = vld [vmem:[#allocation2 + $0x9a] sm:$0xff] }
 0x237   : > { %v499_v18 = vpop.permute.xlu2 %498  ;;  %2367 = vst [vmem:[#allocation3 + $0x3b0] sm:$0xff] %v2335_v19  ;;  %v3189_v43 = vld [vmem:[%s7364_s3 + $0x218] sm:$0xff]  ;;  %v4523_v44 = vld [vmem:[#allocation3 + $0x1b0] sm:$0xff] }
 0x238   : > { %575 = vst.msk [vmem:[#allocation3 + $0x5a0] sm:$0xff] %vm554_vm1, %v499_v18  ;;  %3730 = vmatpush.msrb.mxu1 %v3193_v20 }
 0x239   : > { %2683 = vst [vmem:[#allocation3 + $0x2b8] sm:$0xff] %v2651_v32 }
 0x23a   : > { %1085 = vrot.lane.b32.xlu1 %v5551_v1, %s4657_s29  ;;  %3731 = vmatpush.msrb.mxu1 %v3192_v24  ;;  %2620 = vst [vmem:[#allocation3 + $0x2f8] sm:$0xff] %v2588_v39  ;;  %v5845_v39 = vld [vmem:[#allocation2 + $0x168] sm:$0xff] }
 0x23b   : > { %v2134_v21 = vpop.f32.mrf.mxu0  ;;  %508 = vrot.lane.b32.xlu0 %v5528_v33, %s4652_s20  ;;  %2621 = vst [vmem:[#allocation3 + $0x340] sm:$0xff] %v2589_v4 }
 0x23c   : > { %v690_v6 = vpop.permute.xlu1 %689  ;;  %v5721_v23 = vadd.f32 %v5589_v17, %v2134_v21  ;;  %3732 = vmatpush.msrb.mxu1 %v3191_v31 }
 0x23d   : > { %767 = vst.msk [vmem:[#allocation3 + $0x558] sm:$0xff] %vm747_vm2, %v690_v6  ;;  %v1957_v28 = vld [vmem:[#allocation3 + $0x510] sm:$0xff]  ;;  %v1656_v29 = vpop.permute.xlu0 %1655  ;;  %1278 = vrot.lane.b32.xlu2 %v5602_v9, %s4656_s28  ;;  %v5824_v6 = vld [vmem:[#allocation2 + $0x16a] sm:$0xff] }
 0x23e   : > { %960 = vst.msk [vmem:[#allocation3 + $0x558] sm:$0xff] %vm940_vm4, %v5654_v58  ;;  %v2206_v33 = vmax.f32 %v5721_v23, 0.0  ;;  %4434 = vmatmul.msk.f32.vlgmr.msra.gmra.mxu3 %vm1980_vm10, %v1957_v28  ;;  %3625 = vmatmul.f32.vlgmr.msrb.gmra.mxu0 %v4519_v30  ;;  %v5772_v58 = vld [vmem:[#allocation2 + $0x159] sm:$0xff]  ;;  %v5826_v28 = vld [vmem:[#allocation2 + $0x170] sm:$0xff] }
 0x23f   : > { %1153 = vst.msk [vmem:[#allocation3 + $0x558] sm:$0xff] %vm1133_vm5, %v1076_v15  ;;  %v5739_v37 = vpop.permute.xlu2 %1077  ;;  %3733 = vmatpush.msrb.mxu1 %v3190_v38 }
 0x240   : > { %2238 = vst [vmem:[#allocation2 + $0xa9] sm:$0xff] %v2206_v33 }
 0x241   : > { %3734 = vmatpush.msrb.mxu1 %v3189_v43  ;;  %393 = vst.msk [vmem:[#allocation3 + $0x8b8] sm:$0xff] %vm297_vm0, %v5826_v28  ;;  %v4524_v43 = vld [vmem:[#allocation3 + $0x20] sm:$0xff] }
 0x242   : > { %1665 = vrot.lane.b32.xlu1 %v5737_v35, %s4655_s27 }
 0x243   : > { %1087 = vrot.lane.b32.xlu0 %v5658_v59, %s4657_s29  ;;  %3735 = vmatpush.msrb.mxu1 %v3188_v48  ;;  %v5851_v48 = vld [vmem:[#allocation2 + $0x169] sm:$0xff] }
 0x244   : > { %v1269_v53 = vpop.permute.xlu1 %1268 }
 0x245   : > { %1346 = vst.msk [vmem:[#allocation3 + $0x558] sm:$0xff] %vm1326_vm6, %v1269_v53  ;;  %v692_v45 = vpop.permute.xlu0 %691  ;;  %1858 = vrot.lane.b32.xlu2 %v5748_v25, %s4659_s6  ;;  %3736 = vmatpush.msrb.mxu1 %v3187_v41 }
 0x246   : > { %1540 = vst.msk [vmem:[#allocation3 + $0x558] sm:$0xff] %vm1520_vm7, %v5678_v7  ;;  %3628 = vmatmul.f32.gmra.mxu0 %v4520_v51  ;;  %v5788_v7 = vld [vmem:[#allocation2 + $0x158] sm:$0xff] }
 0x247   : > { %1733 = vst.msk [vmem:[#allocation3 + $0x558] sm:$0xff] %vm1713_vm8, %v1656_v29  ;;  %v5767_v54 = vld [vmem:[#allocation2 + $0xa8] sm:$0xff]  ;;  %v1658_v56 = vpop.permute.xlu2 %1657  ;;  %3737 = vmatpush.msrb.mxu1 %v3186_v60  ;;  %v4525_v51 = vld [vmem:[#allocation3 + $0x68] sm:$0xff] }
 0x248   : > { %768 = vst.msk [vmem:[#allocation3 + $0x5a0] sm:$0xff] %vm747_vm2, %v692_v45  ;;  %3328 = vmatmul.f32.gmra.mxu1 %v5767_v54  ;;  %v2336_v47 = vld [vmem:[#allocation2 + $0xa9] sm:$0xff] }
 0x249   : > { %2304 = vst [vmem:[#allocation3 + $0x3f0] sm:$0xff] %v5767_v54 }
 0x24a   : > { %701 = vrot.lane.b32.xlu1 %v5532_v36, %s4653_s21  ;;  %391 = vst.msk [vmem:[#allocation3 + $0x828] sm:$0xff] %vm297_vm0, %v5788_v7  ;;  %v2652_v36 = vld [vmem:[#allocation2 + $0xa8] sm:$0xff] }
 0x24b   : > { %1667 = vrot.lane.b32.xlu0 %v5772_v58, %s4655_s27  ;;  %2368 = vst [vmem:[#allocation3 + $0x3f8] sm:$0xff] %v2336_v47  ;;  %v4526_v47 = vld [vmem:[#allocation3 + $0xb0] sm:$0xff] }
 0x24c   : > { %v1849_v63 = vpop.permute.xlu1 %1848  ;;  %2684 = vst [vmem:[#allocation3 + $0x300] sm:$0xff] %v2652_v36 }
 0x24d   : > { %1926 = vst.msk [vmem:[#allocation3 + $0x558] sm:$0xff] %vm1906_vm9, %v1849_v63  ;;  %v1271_v2 = vpop.permute.xlu0 %1270  ;;  %894 = vrot.lane.b32.xlu2 %v5651_v34, %s4654_s26  ;;  %v296_v63 = vld [vmem:[%s4745_s25 + $0xf8] sm:$0xff]  ;;  %s7042_s25 = scalar_lea.vmem %s7366_s5, %s4450_s22 }
 0x24e   : > { %3631 = vmatmul.f32.gmra.mxu0 %v4521_v52  ;;  %329 = vst.msk [vmem:[#allocation2 + $0x189] sm:$0xff] %vm297_vm0, %v296_v63 }
 0x24f   : > { %v694_v11 = vpop.permute.xlu2 %693 }
 0x252   : > { %1280 = vrot.lane.b32.xlu1 %v5637_v27, %s4656_s28  ;;  %v2137_v12 = vpop.f32.mrf.mxu0 }
 0x253   : > { %v5795_v14 = vadd.f32 %v5589_v17, %v2137_v12  ;;  %703 = vrot.lane.b32.xlu0 %v5602_v9, %s4653_s21  ;;  %v5808_v9 = vld [vmem:[#allocation2 + $0x15a] sm:$0xff]  ;;  %v4527_v12 = vld [vmem:[#allocation3 + $0xf8] sm:$0xff] }
 0x254   : > { %v885_v34 = vpop.permute.xlu1 %884  ;;  %v1958_v5 = vld [vmem:[#allocation3 + $0x558] sm:$0xff] }
 0x255   : > { %v2207_v26 = vmax.f32 %v5795_v14, 0.0  ;;  %961 = vst.msk [vmem:[#allocation3 + $0x5a0] sm:$0xff] %vm940_vm4, %v885_v34  ;;  %4435 = vmatmul.msk.f32.gmra.mxu3 %vm1980_vm10, %v1958_v5  ;;  %v1851_v15 = vpop.permute.xlu0 %1850  ;;  %1474 = vrot.lane.b32.xlu2 %v5788_v7, %s4658_s30  ;;  %v358_v14 = vld [vmem:[#allocation2 + $0x150] sm:$0xff] }
 0x256   : > { %1154 = vst.msk [vmem:[#allocation3 + $0x5a0] sm:$0xff] %vm1133_vm5, %v5739_v37  ;;  %3634 = vmatmul.f32.gmra.mxu0 %v4522_v16  ;;  %v5901_v16 = vld [vmem:[#allocation2 + $0x172] sm:$0xff] }
 0x257   : > { %2239 = vst [vmem:[#allocation2 + $0xb1] sm:$0xff] %v2207_v26  ;;  %v1273_v50 = vpop.permute.xlu2 %1272 }
 0x258   : > { %1347 = vst.msk [vmem:[#allocation3 + $0x5a0] sm:$0xff] %vm1326_vm6, %v1271_v2 }
 0x259   : > { %390 = vst.msk [vmem:[#allocation3 + $0x7e0] sm:$0xff] %vm297_vm0, %v358_v14 }
 0x25a   : > { %1860 = vrot.lane.b32.xlu1 %v5808_v9, %s4659_s6 }
 0x25b   : > { %1282 = vrot.lane.b32.xlu0 %v5748_v25, %s4656_s28 }
 0x25c   : > { %v1465_v18 = vpop.permute.xlu1 %1464 }
 0x25d   : > { %1541 = vst.msk [vmem:[#allocation3 + $0x5a0] sm:$0xff] %vm1520_vm7, %v1465_v18  ;;  %v887_v19 = vpop.permute.xlu0 %886  ;;  %510 = vrot.lane.b32.xlu2 %v5551_v1, %s4652_s20 }
 0x25e   : > { %1734 = vst.msk [vmem:[#allocation3 + $0x5a0] sm:$0xff] %vm1713_vm8, %v1658_v56  ;;  %3637 = vmatmul.f32.gmra.mxu0 %v4523_v44  ;;  %v5819_v20 = vld [vmem:[#allocation2 + $0xb0] sm:$0xff] }
 0x25f   : > { %1927 = vst.msk [vmem:[#allocation3 + $0x5a0] sm:$0xff] %vm1906_vm9, %v1851_v15  ;;  %3331 = vmatmul.f32.gmra.mxu1 %v5819_v20  ;;  %v1853_v21 = vpop.permute.xlu2 %1852  ;;  %v2400_v24 = vld [vmem:[#allocation2 + $0xaa] sm:$0xff]  ;;  %v2401_v29 = vld [vmem:[#allocation2 + $0xb2] sm:$0xff] }
 0x260   : > { %2305 = vst [vmem:[#allocation3 + $0x438] sm:$0xff] %v5819_v20  ;;  %v2653_v2 = vld [vmem:[#allocation2 + $0xb0] sm:$0xff] }
 0x261   : > { %2432 = vst [vmem:[#allocation3 + $0x400] sm:$0xff] %v2400_v24  ;;  %v2590_v5 = vld [vmem:[#allocation2 + $0xaa] sm:$0xff]  ;;  %v2591_v15 = vld [vmem:[#allocation2 + $0xb2] sm:$0xff]  ;;  %v5916_v24 = vld [vmem:[#allocation2 + $0x181] sm:$0xff] }
 0x262   : > { %896 = vrot.lane.b32.xlu1 %v5676_v61, %s4654_s26  ;;  %2433 = vst [vmem:[#allocation3 + $0x448] sm:$0xff] %v2401_v29  ;;  %v2337_v61 = vld [vmem:[#allocation2 + $0xb1] sm:$0xff] }
 0x263   : > { %1862 = vrot.lane.b32.xlu0 %v5824_v6, %s4659_s6  ;;  %2369 = vst [vmem:[#allocation3 + $0x440] sm:$0xff] %v2337_v61  ;;  %v4529_v61 = vld [vmem:[#allocation3 + $0x188] sm:$0xff] }
 0x264   : > { %v501_v1 = vpop.permute.xlu1 %500  ;;  %v2140_v30 = vpop.f32.mrf.mxu0  ;;  %2685 = vst [vmem:[#allocation3 + $0x348] sm:$0xff] %v2653_v2 }
 0x265   : > { %576 = vst.msk [vmem:[#allocation3 + $0x5e8] sm:$0xff] %vm554_vm1, %v501_v1  ;;  %v5836_v31 = vadd.f32 %v5589_v17, %v2140_v30  ;;  %v1467_v37 = vpop.permute.xlu0 %1466  ;;  %1089 = vrot.lane.b32.xlu2 %v5737_v35, %s4657_s29 }
 0x266   : > { %769 = vst.msk [vmem:[#allocation3 + $0x5e8] sm:$0xff] %vm747_vm2, %v694_v11  ;;  %v1959_v38 = vld [vmem:[#allocation3 + $0x5a0] sm:$0xff]  ;;  %3640 = vmatmul.f32.gmra.mxu0 %v5372_v0 }
 0x267   : > { %v2208_v32 = vmax.f32 %v5836_v31, 0.0  ;;  %962 = vst.msk [vmem:[#allocation3 + $0x5e8] sm:$0xff] %vm940_vm4, %v887_v19  ;;  %4436 = vmatmul.msk.f32.gmra.mxu3 %vm1980_vm10, %v1959_v38  ;;  %3738 = vmatmul.f32.vlgmr.msrb.gmra.mxu1 %v4524_v43  ;;  %v889_v53 = vpop.permute.xlu2 %888  ;;  %v4528_v19 = vld [vmem:[#allocation3 + $0x140] sm:$0xff] }
 0x268   : > { %2622 = vst [vmem:[#allocation3 + $0x388] sm:$0xff] %v2590_v5 }
 0x269   : > { %2240 = vst [vmem:[#allocation2 + $0xc1] sm:$0xff] %v2208_v32 }
 0x26a   : > { %1476 = vrot.lane.b32.xlu1 %v5845_v39, %s4658_s30  ;;  %2623 = vst [vmem:[#allocation3 + $0x3d0] sm:$0xff] %v2591_v15 }
 0x26b   : > { %898 = vrot.lane.b32.xlu0 %v5788_v7, %s4654_s26 }
 0x26c   : > { %v1080_v0 = vpop.permute.xlu1 %1079 }
 0x26d   : > { %1155 = vst.msk [vmem:[#allocation3 + $0x5e8] sm:$0xff] %vm1133_vm5, %v1080_v0  ;;  %v503_v45 = vpop.permute.xlu0 %502  ;;  %1669 = vrot.lane.b32.xlu2 %v5851_v48, %s4655_s27 }
 0x26e   : > { %1348 = vst.msk [vmem:[#allocation3 + $0x5e8] sm:$0xff] %vm1326_vm6, %v1273_v50  ;;  %3643 = vmatmul.f32.gmra.mxu0 %v5420_v55  ;;  %v354_v50 = vld [vmem:[#allocation2 + $0x120] sm:$0xff] }
 0x26f   : > { %1542 = vst.msk [vmem:[#allocation3 + $0x5e8] sm:$0xff] %vm1520_vm7, %v1467_v37  ;;  %3741 = vmatmul.f32.gmra.mxu1 %v4525_v51  ;;  %v1469_v41 = vpop.permute.xlu2 %1468 }
 0x270   : > { %577 = vst.msk [vmem:[#allocation3 + $0x630] sm:$0xff] %vm554_vm1, %v503_v45  ;;  %v5862_v56 = vld [vmem:[#allocation2 + $0xc0] sm:$0xff] }
 0x271   : > { %2306 = vst [vmem:[#allocation3 + $0x480] sm:$0xff] %v5862_v56  ;;  %3334 = vmatmul.f32.vlgmr.msra.gmra.mxu2 %v5862_v56  ;;  %v2338_v60 = vld [vmem:[#allocation2 + $0xc1] sm:$0xff] }
 0x272   : > { %512 = vrot.lane.b32.xlu1 %v5658_v59, %s4652_s20  ;;  %2370 = vst [vmem:[#allocation3 + $0x488] sm:$0xff] %v2338_v60  ;;  %v2654_v7 = vld [vmem:[#allocation2 + $0xc0] sm:$0xff] }
 0x273   : > { %1478 = vrot.lane.b32.xlu0 %v5826_v28, %s4658_s30  ;;  %2686 = vst [vmem:[#allocation3 + $0x390] sm:$0xff] %v2654_v7  ;;  %v1388_v45 = vld [vmem:[#allocation2 + $0x180] sm:$0xff] }
 0x274   : > { %v1660_v55 = vpop.permute.xlu1 %1659  ;;  %386 = vst.msk [vmem:[#allocation3 + $0x6c0] sm:$0xff] %vm297_vm0, %v354_v50  ;;  %v4530_v60 = vld [vmem:[#allocation3 + $0x1d0] sm:$0xff] }
 0x275   : > { %1735 = vst.msk [vmem:[#allocation3 + $0x5e8] sm:$0xff] %vm1713_vm8, %v1660_v55  ;;  %v1082_v62 = vpop.permute.xlu0 %1081  ;;  %705 = vrot.lane.b32.xlu2 %v5637_v27, %s4653_s21 }
 0x276   : > { %1928 = vst.msk [vmem:[#allocation3 + $0x5e8] sm:$0xff] %vm1906_vm9, %v1853_v21  ;;  %3646 = vmatmul.f32.gmra.mxu0 %v5461_v13 }
 0x277   : > { %3744 = vmatmul.f32.gmra.mxu1 %v4526_v47  ;;  %v505_v59 = vpop.permute.xlu2 %504 }
 0x278   : > { %578 = vst.msk [vmem:[#allocation3 + $0x678] sm:$0xff] %vm554_vm1, %v505_v59  ;;  %v4531_v59 = vld [vmem:[#allocation3 + $0x218] sm:$0xff] }
 0x27a   : > { %1091 = vrot.lane.b32.xlu1 %v5772_v58, %s4657_s29 }
 0x27b   : > { %v2143_v52 = vpop.f32.mrf.mxu0  ;;  %514 = vrot.lane.b32.xlu0 %v5737_v35, %s4652_s20  ;;  %v5895_v35 = vld [vmem:[#allocation2 + $0x171] sm:$0xff] }
 0x27c   : > { %v5885_v27 = vadd.f32 %v5589_v17, %v2143_v52  ;;  %v696_v13 = vpop.permute.xlu1 %695  ;;  %v5960_v52 = vld [vmem:[#allocation2 + $0x18a] sm:$0xff] }
 0x27d   : > { %770 = vst.msk [vmem:[#allocation3 + $0x630] sm:$0xff] %vm747_vm2, %v696_v13  ;;  %v1960_v36 = vld [vmem:[#allocation3 + $0x5e8] sm:$0xff]  ;;  %v1662_v11 = vpop.permute.xlu0 %1661  ;;  %1284 = vrot.lane.b32.xlu2 %v5808_v9, %s4656_s28 }
 0x27e   : > { %v2209_v4 = vmax.f32 %v5885_v27, 0.0  ;;  %963 = vst.msk [vmem:[#allocation3 + $0x630] sm:$0xff] %vm940_vm4, %v889_v53  ;;  %4437 = vmatmul.msk.f32.gmra.mxu3 %vm1980_vm10, %v1960_v36  ;;  %3649 = vmatmul.f32.gmra.mxu0 %v5494_v22 }
 0x27f   : > { %1156 = vst.msk [vmem:[#allocation3 + $0x630] sm:$0xff] %vm1133_vm5, %v1082_v62  ;;  %3747 = vmatmul.f32.gmra.mxu1 %v4527_v12  ;;  %v1084_v34 = vpop.permute.xlu2 %1083  ;;  %v355_v62 = vld [vmem:[#allocation2 + $0x128] sm:$0xff] }
 0x280   : > { %2241 = vst [vmem:[#allocation2 + $0xc9] sm:$0xff] %v2209_v4 }
 0x281   : > { %387 = vst.msk [vmem:[#allocation3 + $0x708] sm:$0xff] %vm297_vm0, %v355_v62 }
 0x282   : > { %1671 = vrot.lane.b32.xlu1 %v5895_v35, %s4655_s27 }
 0x283   : > { %1093 = vrot.lane.b32.xlu0 %v5851_v48, %s4657_s29 }
 0x284   : > { %v1275_v22 = vpop.permute.xlu1 %1274 }
 0x285   : > { %1349 = vst.msk [vmem:[#allocation3 + $0x630] sm:$0xff] %vm1326_vm6, %v1275_v22  ;;  %v698_v18 = vpop.permute.xlu0 %697  ;;  %1864 = vrot.lane.b32.xlu2 %v5901_v16, %s4659_s6 }
 0x286   : > { %1543 = vst.msk [vmem:[#allocation3 + $0x630] sm:$0xff] %vm1520_vm7, %v1469_v41  ;;  %3652 = vmatmul.f32.gmra.mxu0 %v5547_v42 }
 0x287   : > { %1736 = vst.msk [vmem:[#allocation3 + $0x630] sm:$0xff] %vm1713_vm8, %v1662_v11  ;;  %3750 = vmatmul.f32.gmra.mxu1 %v4528_v19  ;;  %v5912_v44 = vld [vmem:[#allocation2 + $0xc8] sm:$0xff]  ;;  %v1664_v21 = vpop.permute.xlu2 %1663 }
 0x288   : > { %771 = vst.msk [vmem:[#allocation3 + $0x678] sm:$0xff] %vm747_vm2, %v698_v18  ;;  %3337 = vmatmul.f32.gmra.mxu2 %v5912_v44  ;;  %v2402_v29 = vld [vmem:[#allocation2 + $0xc2] sm:$0xff]  ;;  %v2403_v1 = vld [vmem:[#allocation2 + $0xca] sm:$0xff] }
 0x289   : > { %2307 = vst [vmem:[#allocation3 + $0x4c8] sm:$0xff] %v5912_v44  ;;  %v2339_v42 = vld [vmem:[#allocation2 + $0xc9] sm:$0xff]  ;;  %v5993_v18 = vld [vmem:[#allocation2] sm:$0xff] }
 0x28a   : > { %707 = vrot.lane.b32.xlu1 %v5748_v25, %s4653_s21  ;;  %2434 = vst [vmem:[#allocation3 + $0x490] sm:$0xff] %v2402_v29  ;;  %v2655_v25 = vld [vmem:[#allocation2 + $0xc8] sm:$0xff] }
 0x28b   : > { %1673 = vrot.lane.b32.xlu0 %v5916_v24, %s4655_s27  ;;  %2435 = vst [vmem:[#allocation3 + $0x4d8] sm:$0xff] %v2403_v1  ;;  %v2592_v43 = vld [vmem:[#allocation2 + $0xc2] sm:$0xff]  ;;  %v2593_v53 = vld [vmem:[#allocation2 + $0xca] sm:$0xff] }
 0x28c   : > { %v1855_v30 = vpop.permute.xlu1 %1854  ;;  %2371 = vst [vmem:[#allocation3 + $0x4d0] sm:$0xff] %v2339_v42 }
 0x28d   : > { %1929 = vst.msk [vmem:[#allocation3 + $0x630] sm:$0xff] %vm1906_vm9, %v1855_v30  ;;  %v1277_v37 = vpop.permute.xlu0 %1276  ;;  %900 = vrot.lane.b32.xlu2 %v5845_v39, %s4654_s26  ;;  %v357_v30 = vld [vmem:[#allocation2 + $0x140] sm:$0xff] }
 0x28e   : > { %3655 = vmatmul.f32.gmra.mxu0 %v5627_v40  ;;  %2687 = vst [vmem:[#allocation3 + $0x3d8] sm:$0xff] %v2655_v25 }
 0x28f   : > { %3753 = vmatmul.f32.gmra.mxu1 %v4529_v61  ;;  %v700_v38 = vpop.permute.xlu2 %699  ;;  %2624 = vst [vmem:[#allocation3 + $0x418] sm:$0xff] %v2592_v43  ;;  %v1776_v43 = vld [vmem:[#allocation2 + $0x19a] sm:$0xff] }
 0x290   : > { %2625 = vst [vmem:[#allocation3 + $0x460] sm:$0xff] %v2593_v53 }
 0x291   : > { %389 = vst.msk [vmem:[#allocation3 + $0x798] sm:$0xff] %vm297_vm0, %v357_v30 }
 0x292   : > { %1286 = vrot.lane.b32.xlu1 %v5824_v6, %s4656_s28  ;;  %v2146_v0 = vpop.f32.mrf.mxu0 }
 0x293   : > { %v5930_v51 = vadd.f32 %v5589_v17, %v2146_v0  ;;  %709 = vrot.lane.b32.xlu0 %v5808_v9, %s4653_s21  ;;  %v5942_v9 = vld [vmem:[#allocation2 + $0x182] sm:$0xff] }
 0x294   : > { %v891_v40 = vpop.permute.xlu1 %890  ;;  %v1961_v39 = vld [vmem:[#allocation3 + $0x630] sm:$0xff] }
 0x295   : > { %964 = vst.msk [vmem:[#allocation3 + $0x678] sm:$0xff] %vm940_vm4, %v891_v40  ;;  %v2210_v41 = vmax.f32 %v5930_v51, 0.0  ;;  %4438 = vmatmul.msk.f32.gmra.mxu3 %vm1980_vm10, %v1961_v39  ;;  %v1857_v57 = vpop.permute.xlu0 %1856  ;;  %1480 = vrot.lane.b32.xlu2 %v1388_v45, %s4658_s30  ;;  %v1584_v40 = vld [vmem:[#allocation2 + $0x1a1] sm:$0xff] }
 0x296   : > { %1157 = vst.msk [vmem:[#allocation3 + $0x678] sm:$0xff] %vm1133_vm5, %v1084_v34  ;;  %3658 = vmatmul.f32.gmra.mxu0 %v5680_v8  ;;  %v1582_v34 = vld [vmem:[#allocation2 + $0x189] sm:$0xff] }
 0x297   : > { %2242 = vst [vmem:[#allocation2 + $0xd9] sm:$0xff] %v2210_v41  ;;  %3756 = vmatmul.f32.gmra.mxu1 %v4530_v60  ;;  %v1279_v55 = vpop.permute.xlu2 %1278 }
 0x298   : > { %1350 = vst.msk [vmem:[#allocation3 + $0x678] sm:$0xff] %vm1326_vm6, %v1277_v37 }
 0x29a   : > { %1866 = vrot.lane.b32.xlu1 %v5942_v9, %s4659_s6 }
 0x29b   : > { %1288 = vrot.lane.b32.xlu0 %v5901_v16, %s4656_s28 }
 0x29c   : > { %v1471_v8 = vpop.permute.xlu1 %1470 }
 0x29d   : > { %1544 = vst.msk [vmem:[#allocation3 + $0x678] sm:$0xff] %vm1520_vm7, %v1471_v8  ;;  %v893_v63 = vpop.permute.xlu0 %892  ;;  %516 = vrot.lane.b32.xlu2 %v5772_v58, %s4652_s20 }
 0x29e   : > { %1737 = vst.msk [vmem:[#allocation3 + $0x678] sm:$0xff] %vm1713_vm8, %v1664_v21  ;;  %3661 = vmatmul.f32.gmra.mxu0 %v5767_v54  ;;  %v5955_v47 = vld [vmem:[#allocation2 + $0xd8] sm:$0xff]  ;;  %v5964_v54 = vpop.f32.mrf.mxu1 }
 0x29f   : > { %1930 = vst.msk [vmem:[#allocation3 + $0x678] sm:$0xff] %vm1906_vm9, %v1857_v57  ;;  %3759 = vmatmul.f32.gmra.mxu1 %v4531_v59  ;;  %3340 = vmatmul.f32.gmra.mxu2 %v5955_v47  ;;  %v1859_v2 = vpop.permute.xlu2 %1858  ;;  %v2340_v7 = vld [vmem:[#allocation2 + $0xd9] sm:$0xff]  ;;  %v1777_v59 = vld [vmem:[#allocation2 + $0x1a2] sm:$0xff] }
 0x2a0   : > { %2308 = vst [vmem:[#allocation3 + $0x510] sm:$0xff] %v5955_v47  ;;  %v2656_v13 = vld [vmem:[#allocation2 + $0xd8] sm:$0xff] }
 0x2a1   : > { %2372 = vst [vmem:[#allocation3 + $0x518] sm:$0xff] %v2340_v7 }
 0x2a2   : > { %902 = vrot.lane.b32.xlu1 %v5826_v28, %s4654_s26  ;;  %2688 = vst [vmem:[#allocation3 + $0x420] sm:$0xff] %v2656_v13  ;;  %v5975_v28 = vld [vmem:[#allocation2 + $0x188] sm:$0xff] }
 0x2a3   : > { %1868 = vrot.lane.b32.xlu0 %v5960_v52, %s4659_s6 }
 0x2a4   : > { %v507_v58 = vpop.permute.xlu1 %506 }
 0x2a5   : > { %579 = vst.msk [vmem:[#allocation3 + $0x6c0] sm:$0xff] %vm554_vm1, %v507_v58  ;;  %v1473_v36 = vpop.permute.xlu0 %1472  ;;  %1095 = vrot.lane.b32.xlu2 %v5895_v35, %s4657_s29  ;;  %v6070_v58 = vld [vmem:[%s7363_s2] ss:$0 sm:$0xff] }
 0x2a6   : > { %772 = vst.msk [vmem:[#allocation3 + $0x6c0] sm:$0xff] %vm747_vm2, %v700_v38  ;;  %v1962_v11 = vld [vmem:[#allocation3 + $0x678] sm:$0xff]  ;;  %3664 = vmatmul.f32.gmra.mxu0 %v5819_v20  ;;  %v5981_v15 = vpop.f32.mrf.mxu1 }
 0x2a7   : > { %965 = vst.msk [vmem:[#allocation3 + $0x6c0] sm:$0xff] %vm940_vm4, %v893_v63  ;;  %4439 = vmatmul.msk.f32.gmra.mxu3 %vm1980_vm10, %v1962_v11  ;;  %3762 = vmatmul.f32.gmra.mxu1 %v5507_v10  ;;  %v895_v12 = vpop.permute.xlu2 %894  ;;  %v356_v10 = vld [vmem:[#allocation2 + $0x138] sm:$0xff] }
 0x2a8   : > { %388 = vst.msk [vmem:[#allocation3 + $0x750] sm:$0xff] %vm297_vm0, %v356_v10 }
 0x2aa   : > { %1482 = vrot.lane.b32.xlu1 %v5975_v28, %s4658_s30 }
 0x2ab   : > { %904 = vrot.lane.b32.xlu0 %v1388_v45, %s4654_s26 }
 0x2ac   : > { %v1086_v5 = vpop.permute.xlu1 %1085 }
 0x2ad   : > { %1158 = vst.msk [vmem:[#allocation3 + $0x6c0] sm:$0xff] %vm1133_vm5, %v1086_v5  ;;  %v509_v20 = vpop.permute.xlu0 %508  ;;  %1675 = vrot.lane.b32.xlu2 %v1582_v34, %s4655_s27 }
 0x2ae   : > { %1351 = vst.msk [vmem:[#allocation3 + $0x6c0] sm:$0xff] %vm1326_vm6, %v1279_v55  ;;  %3667 = vmatmul.f32.gmra.mxu0 %v5862_v56  ;;  %v6006_v21 = vpop.f32.mrf.mxu1 }
 0x2af   : > { %1545 = vst.msk [vmem:[#allocation3 + $0x6c0] sm:$0xff] %vm1520_vm7, %v1473_v36  ;;  %3765 = vmatmul.f32.gmra.mxu1 %v5560_v3  ;;  %v1475_v50 = vpop.permute.xlu2 %1474 }
 0x2b0   : > { %580 = vst.msk [vmem:[#allocation3 + $0x708] sm:$0xff] %vm554_vm1, %v509_v20 }
 0x2b2   : > { %518 = vrot.lane.b32.xlu1 %v5851_v48, %s4652_s20 }
 0x2b3   : > { %v2149_v22 = vpop.f32.mrf.mxu0  ;;  %1484 = vrot.lane.b32.xlu0 %v5993_v18, %s4658_s30 }
 0x2b4   : > { %v1666_v56 = vpop.permute.xlu1 %1665  ;;  %v5998_v19 = vadd.f32 %v5589_v17, %v2149_v22 }
 0x2b5   : > { %1738 = vst.msk [vmem:[#allocation3 + $0x6c0] sm:$0xff] %vm1713_vm8, %v1666_v56  ;;  %v1088_v3 = vpop.permute.xlu0 %1087  ;;  %711 = vrot.lane.b32.xlu2 %v5824_v6, %s4653_s21 }
 0x2b6   : > { %1931 = vst.msk [vmem:[#allocation3 + $0x6c0] sm:$0xff] %vm1906_vm9, %v1859_v2  ;;  %v2211_v48 = vmax.f32 %v5998_v19, 0.0  ;;  %3670 = vmatmul.f32.gmra.mxu0 %v5912_v44 }
 0x2b7   : > { %3768 = vmatmul.f32.gmra.mxu1 %v5634_v46  ;;  %v511_v29 = vpop.permute.xlu2 %510  ;;  %v6022_v46 = vpop.f32.mrf.mxu1 }
 0x2b8   : > { %2243 = vst [vmem:[#allocation2 + $0xe1] sm:$0xff] %v2211_v48 }
 0x2b9   : > { %581 = vst.msk [vmem:[#allocation3 + $0x750] sm:$0xff] %vm554_vm1, %v511_v29 }
 0x2ba   : > { %1097 = vrot.lane.b32.xlu1 %v5916_v24, %s4657_s29  ;;  %7369 = vst [vmem:[#allocation4_spill] sm:$0xff] %v6022_v46  ;;  %v1583_v24 = vld [vmem:[#allocation2 + $0x199] sm:$0xff] }
 0x2bb   : > { %520 = vrot.lane.b32.xlu0 %v5895_v35, %s4652_s20 }
 0x2bc   : > { %v702_v6 = vpop.permute.xlu1 %701 }
 0x2bd   : > { %773 = vst.msk [vmem:[#allocation3 + $0x708] sm:$0xff] %vm747_vm2, %v702_v6  ;;  %v1963_v44 = vld [vmem:[#allocation3 + $0x6c0] sm:$0xff]  ;;  %v1668_v1 = vpop.permute.xlu0 %1667  ;;  %1290 = vrot.lane.b32.xlu2 %v5942_v9, %s4656_s28 }
 0x2be   : > { %966 = vst.msk [vmem:[#allocation3 + $0x708] sm:$0xff] %vm940_vm4, %v895_v12  ;;  %4440 = vmatmul.msk.f32.gmra.mxu3 %vm1980_vm10, %v1963_v44  ;;  %3673 = vmatmul.f32.gmra.mxu0 %v5955_v47 }
 0x2bf   : > { %1159 = vst.msk [vmem:[#allocation3 + $0x708] sm:$0xff] %vm1133_vm5, %v1088_v3  ;;  %3771 = vmatmul.f32.gmra.mxu1 %v5688_v49  ;;  %v2277_v35 = vld [vmem:[#allocation2 + $0xe0] sm:$0xff]  ;;  %v1090_v42 = vpop.permute.xlu2 %1089 }
 0x2c0   : > { %2309 = vst [vmem:[#allocation3 + $0x558] sm:$0xff] %v2277_v35  ;;  %3343 = vmatmul.f32.gmra.mxu2 %v2277_v35  ;;  %v2404_v37 = vld [vmem:[#allocation2 + $0xda] sm:$0xff]  ;;  %v2405_v38 = vld [vmem:[#allocation2 + $0xe2] sm:$0xff] }
 0x2c1   : > { %v2152_v61 = vpop.f32.mrf.mxu3  ;;  %2436 = vst [vmem:[#allocation3 + $0x520] sm:$0xff] %v2404_v37  ;;  %v2341_v39 = vld [vmem:[#allocation2 + $0xe1] sm:$0xff] }
 0x2c2   : > { %1677 = vrot.lane.b32.xlu1 %v1583_v24, %s4655_s27  ;;  %v6028_v25 = vadd.f32 %v5589_v17, %v2152_v61  ;;  %2437 = vst [vmem:[#allocation3 + $0x568] sm:$0xff] %v2405_v38  ;;  %v6037_v17 = vpop.f32.mrf.mxu1  ;;  %v2657_v55 = vld [vmem:[#allocation2 + $0xe0] sm:$0xff] }
 0x2c3   : > { %1099 = vrot.lane.b32.xlu0 %v1582_v34, %s4657_s29  ;;  %7370 = vst [vmem:[#allocation5_spill] sm:$0xff] %v6037_v17  ;;  %v2594_v7 = vld [vmem:[#allocation2 + $0xda] sm:$0xff]  ;;  %v2595_v13 = vld [vmem:[#allocation2 + $0xe2] sm:$0xff] }
 0x2c4   : > { %v2212_v49 = vmax.f32 %v6028_v25, 0.0  ;;  %v1281_v53 = vpop.permute.xlu1 %1280  ;;  %2373 = vst [vmem:[#allocation3 + $0x560] sm:$0xff] %v2341_v39 }
 0x2c5   : > { %1352 = vst.msk [vmem:[#allocation3 + $0x708] sm:$0xff] %vm1326_vm6, %v1281_v53  ;;  %v704_v0 = vpop.permute.xlu0 %703  ;;  %1870 = vrot.lane.b32.xlu2 %v1776_v43, %s4659_s6 }
 0x2c6   : > { %2244 = vst [vmem:[#allocation2 + $0xf1] sm:$0xff] %v2212_v49  ;;  %3676 = vmatmul.f32.gmra.mxu0 %v2277_v35 }
 0x2c7   : > { %1546 = vst.msk [vmem:[#allocation3 + $0x708] sm:$0xff] %vm1520_vm7, %v1475_v50  ;;  %3774 = vmatmul.f32.gmra.mxu1 %v2206_v33  ;;  %v1670_v45 = vpop.permute.xlu2 %1669 }
 0x2c8   : > { %1739 = vst.msk [vmem:[#allocation3 + $0x708] sm:$0xff] %vm1713_vm8, %v1668_v1 }
 0x2c9   : > { %774 = vst.msk [vmem:[#allocation3 + $0x750] sm:$0xff] %vm747_vm2, %v704_v0 }
 0x2ca   : > { %713 = vrot.lane.b32.xlu1 %v5901_v16, %s4653_s21  ;;  %v6050_v33 = vpop.f32.mrf.mxu1  ;;  %2689 = vst [vmem:[#allocation3 + $0x468] sm:$0xff] %v2657_v55 }
 0x2cb   : > { %1679 = vrot.lane.b32.xlu0 %v1584_v40, %s4655_s27  ;;  %7371 = vst [vmem:[#allocation6_spill] sm:$0xff] %v6050_v33  ;;  %v6550_v33 = vld [vmem:[#allocation3 + $0x448] sm:$0xff] }
 0x2cc   : > { %v1861_v57 = vpop.permute.xlu1 %1860  ;;  %2626 = vst [vmem:[#allocation3 + $0x4a8] sm:$0xff] %v2594_v7 }
 0x2cd   : > { %1932 = vst.msk [vmem:[#allocation3 + $0x708] sm:$0xff] %vm1906_vm9, %v1861_v57  ;;  %v1283_v9 = vpop.permute.xlu0 %1282  ;;  %v2278_v60 = vld [vmem:[#allocation2 + $0xf0] sm:$0xff]  ;;  %906 = vrot.lane.b32.xlu2 %v5975_v28, %s4654_s26 }
 0x2ce   : > { %v2342_v23 = vld [vmem:[#allocation2 + $0xf1] sm:$0xff]  ;;  %2310 = vst [vmem:[#allocation3 + $0x5a0] sm:$0xff] %v2278_v60  ;;  %3346 = vmatmul.f32.gmra.mxu2 %v2278_v60  ;;  %3679 = vmatmul.f32.gmra.mxu0 %v2278_v60 }
 0x2cf   : > { %3777 = vmatmul.f32.gmra.mxu1 %v2207_v26  ;;  %v706_v16 = vpop.permute.xlu2 %705  ;;  %2374 = vst [vmem:[#allocation3 + $0x5a8] sm:$0xff] %v2342_v23  ;;  %v2658_v26 = vld [vmem:[#allocation2 + $0xf0] sm:$0xff] }
 0x2d0   : > { %2690 = vst [vmem:[#allocation3 + $0x4b0] sm:$0xff] %v2658_v26 }
 0x2d1   : > { %2627 = vst [vmem:[#allocation3 + $0x4f0] sm:$0xff] %v2595_v13 }
 0x2d2   : > { %1292 = vrot.lane.b32.xlu1 %v5960_v52, %s4656_s28  ;;  %v6061_v47 = vpop.f32.mrf.mxu1 }
 0x2d3   : > { %7372 = vst [vmem:[#allocation7_spill] sm:$0xff] %v6061_v47 }
 0x2d4   : > { %v897_v62 = vpop.permute.xlu1 %896  ;;  %v1964_v8 = vld [vmem:[#allocation3 + $0x708] sm:$0xff] }
 0x2d5   : > { %967 = vst.msk [vmem:[#allocation3 + $0x750] sm:$0xff] %vm940_vm4, %v897_v62  ;;  %4441 = vmatmul.msk.f32.gmra.mxu3 %vm1980_vm10, %v1964_v8  ;;  %v1863_v63 = vpop.permute.xlu0 %1862  ;;  %1486 = vrot.lane.b32.xlu2 %v5993_v18, %s4658_s30 }
 0x2d6   : > { %1160 = vst.msk [vmem:[#allocation3 + $0x750] sm:$0xff] %vm1133_vm5, %v1090_v42 }
 0x2d7   : > { %1353 = vst.msk [vmem:[#allocation3 + $0x750] sm:$0xff] %vm1326_vm6, %v1283_v9  ;;  %3780 = vmatmul.f32.gmra.mxu1 %v2208_v32  ;;  %v1285_v2 = vpop.permute.xlu2 %1284 }
 0x2d8   : > { %v2155_v52 = vpop.f32.mrf.mxu3 }
 0x2d9   : > { %v6073_v36 = vadd.f32 %v6070_v58, %v2155_v52 }
 0x2da   : > { %1872 = vrot.lane.b32.xlu1 %v1777_v59, %s4659_s6  ;;  %v6080_v28 = vpop.f32.mrf.mxu1 }
 0x2db   : > { %v2213_v31 = vmax.f32 %v6073_v36, 0.0  ;;  %7373 = vst [vmem:[#allocation8_spill] sm:$0xff] %v6080_v28 }
 0x2dc   : > { %v1477_v32 = vpop.permute.xlu1 %1476 }
 0x2dd   : > { %2245 = vst [vmem:[#allocation2 + $0xf9] sm:$0xff] %v2213_v31  ;;  %v899_v11 = vpop.permute.xlu0 %898 }
 0x2de   : > { %1547 = vst.msk [vmem:[#allocation3 + $0x750] sm:$0xff] %vm1520_vm7, %v1477_v32 }
 0x2df   : > { %1740 = vst.msk [vmem:[#allocation3 + $0x750] sm:$0xff] %vm1713_vm8, %v1670_v45  ;;  %3783 = vmatmul.f32.gmra.mxu1 %v2209_v4  ;;  %v1865_v12 = vpop.permute.xlu2 %1864 }
 0x2e0   : > { %1933 = vst.msk [vmem:[#allocation3 + $0x750] sm:$0xff] %vm1906_vm9, %v1863_v63 }
 0x2e2   : > { %v6088_v10 = vpop.f32.mrf.mxu1 }
 0x2e3   : > { %7374 = vst [vmem:[#allocation9_spill] sm:$0xff] %v6088_v10  ;;  %v6445_v10 = vld [vmem:[%s7364_s3 + $0x438] sm:$0xff] }
 0x2e4   : > { %v513_v34 = vpop.permute.xlu1 %512  ;;  %v2279_v5 = vld [vmem:[#allocation2 + $0xf8] sm:$0xff] }
 0x2e5   : > { %582 = vst.msk [vmem:[#allocation3 + $0x798] sm:$0xff] %vm554_vm1, %v513_v34  ;;  %3349 = vmatmul.f32.gmra.mxu2 %v2279_v5  ;;  %3682 = vmatmul.f32.gmra.mxu0 %v2279_v5  ;;  %v1479_v20 = vpop.permute.xlu0 %1478  ;;  %v2406_v4 = vld [vmem:[#allocation2 + $0xf2] sm:$0xff]  ;;  %v2407_v22 = vld [vmem:[#allocation2 + $0xfa] sm:$0xff] }
 0x2e6   : > { %775 = vst.msk [vmem:[#allocation3 + $0x798] sm:$0xff] %vm747_vm2, %v706_v16  ;;  %v2343_v18 = vld [vmem:[#allocation2 + $0xf9] sm:$0xff] }
 0x2e7   : > { %968 = vst.msk [vmem:[#allocation3 + $0x798] sm:$0xff] %vm940_vm4, %v899_v11  ;;  %v1965_v50 = vld [vmem:[#allocation3 + $0x750] sm:$0xff]  ;;  %3786 = vmatmul.f32.gmra.mxu1 %v2210_v41  ;;  %v901_v27 = vpop.permute.xlu2 %900  ;;  %v2659_v38 = vld [vmem:[#allocation2 + $0xf8] sm:$0xff] }
 0x2e8   : > { %4442 = vmatmul.msk.f32.gmra.mxu3 %vm1980_vm10, %v1965_v50  ;;  %2311 = vst [vmem:[#allocation3 + $0x5e8] sm:$0xff] %v2279_v5  ;;  %v2596_v53 = vld [vmem:[#allocation2 + $0xf2] sm:$0xff]  ;;  %v2597_v45 = vld [vmem:[#allocation2 + $0xfa] sm:$0xff] }
 0x2e9   : > { %2438 = vst [vmem:[#allocation3 + $0x5b0] sm:$0xff] %v2406_v4  ;;  %v3168_v4 = vld [vmem:[%s7364_s3 + $0x170] sm:$0xff] }
 0x2ea   : > { %v2158_v56 = vpop.f32.mrf.mxu3  ;;  %2439 = vst [vmem:[#allocation3 + $0x5f8] sm:$0xff] %v2407_v22  ;;  %v6097_v51 = vpop.f32.mrf.mxu1  ;;  %v3167_v22 = vld [vmem:[%s7364_s3 + $0x168] sm:$0xff] }
 0x2eb   : > { %v2159_v3 = vadd.f32 %v6070_v58, %v2158_v56  ;;  %2375 = vst [vmem:[#allocation3 + $0x5f0] sm:$0xff] %v2343_v18 }
 0x2ec   : > { %v1092_v29 = vpop.permute.xlu1 %1091  ;;  %7375 = vst [vmem:[#allocation10_spill] sm:$0xff] %v6097_v51 }
 0x2ed   : > { %1161 = vst.msk [vmem:[#allocation3 + $0x798] sm:$0xff] %vm1133_vm5, %v1092_v29  ;;  %v2214_v6 = vmax.f32 %v2159_v3, 0.0  ;;  %v515_v44 = vpop.permute.xlu0 %514 }
 0x2ee   : > { %1354 = vst.msk [vmem:[#allocation3 + $0x798] sm:$0xff] %vm1326_vm6, %v1285_v2 }
 0x2ef   : > { %2246 = vst [vmem:[#allocation2 + $0x109] sm:$0xff] %v2214_v6  ;;  %3789 = vmatmul.f32.gmra.mxu1 %v2211_v48  ;;  %v1481_v41 = vpop.permute.xlu2 %1480 }
 0x2f0   : > { %1548 = vst.msk [vmem:[#allocation3 + $0x798] sm:$0xff] %vm1520_vm7, %v1479_v20 }
 0x2f1   : > { %583 = vst.msk [vmem:[#allocation3 + $0x7e0] sm:$0xff] %vm554_vm1, %v515_v44  ;;  %v3165_v44 = vld [vmem:[%s7364_s3 + $0x158] sm:$0xff] }
 0x2f2   : > { %v6105_v42 = vpop.f32.mrf.mxu1  ;;  %2691 = vst [vmem:[#allocation3 + $0x4f8] sm:$0xff] %v2659_v38  ;;  %v3162_v38 = vld [vmem:[%s7364_s3 + $0x140] sm:$0xff] }
 0x2f3   : > { %7376 = vst [vmem:[#allocation11_spill] sm:$0xff] %v6105_v42  ;;  %v3216_v42 = vld [vmem:[%s7364_s3 + $0x2f0] sm:$0xff] }
 0x2f4   : > { %v1672_v1 = vpop.permute.xlu1 %1671  ;;  %2628 = vst [vmem:[#allocation3 + $0x538] sm:$0xff] %v2596_v53  ;;  %v3161_v53 = vld [vmem:[%s7364_s3 + $0x138] sm:$0xff] }
 0x2f5   : > { %1741 = vst.msk [vmem:[#allocation3 + $0x798] sm:$0xff] %vm1713_vm8, %v1672_v1  ;;  %v1094_v24 = vpop.permute.xlu0 %1093  ;;  %v3153_v1 = vld [vmem:[%s7364_s3 + $0xf8] sm:$0xff] }
 0x2f6   : > { %1934 = vst.msk [vmem:[#allocation3 + $0x798] sm:$0xff] %vm1906_vm9, %v1865_v12  ;;  %v2280_v35 = vld [vmem:[#allocation2 + $0x108] sm:$0xff]  ;;  %3383 = vmatpush.msrb.mxu2 %v3153_v1 }
 0x2f7   : > { %3792 = vmatmul.f32.gmra.mxu1 %v2212_v49  ;;  %2312 = vst [vmem:[#allocation3 + $0x630] sm:$0xff] %v2280_v35  ;;  %3352 = vmatmul.f32.gmra.mxu2 %v2280_v35  ;;  %v517_v19 = vpop.permute.xlu2 %516  ;;  %v2344_v48 = vld [vmem:[#allocation2 + $0x109] sm:$0xff] }
 0x2f8   : > { %3685 = vmatmul.f32.gmra.mxu0 %v2280_v35  ;;  %584 = vst.msk [vmem:[#allocation3 + $0x828] sm:$0xff] %vm554_vm1, %v517_v19  ;;  %v2660_v43 = vld [vmem:[#allocation2 + $0x108] sm:$0xff]  ;;  %v3164_v35 = vld [vmem:[%s7364_s3 + $0x150] sm:$0xff] }
 0x2f9   : > { %2376 = vst [vmem:[#allocation3 + $0x638] sm:$0xff] %v2344_v48  ;;  %v360_v49 = vld [vmem:[#allocation2 + $0x168] sm:$0xff] }
 0x2fa   : > { %v6113_v25 = vpop.f32.mrf.mxu1  ;;  %392 = vst.msk [vmem:[#allocation3 + $0x870] sm:$0xff] %vm297_vm0, %v360_v49  ;;  %v3152_v49 = vld [vmem:[%s7364_s3 + $0xf0] sm:$0xff] }
 0x2fb   : > { %7377 = vst [vmem:[#allocation12_spill] sm:$0xff] %v6113_v25  ;;  %3384 = vmatpush.msrb.mxu2 %v3152_v49  ;;  %v6428_v25 = vld [vmem:[#allocation3 + $0x370] sm:$0xff] }
 0x2fc   : > { %v708_v30 = vpop.permute.xlu1 %707  ;;  %2692 = vst [vmem:[#allocation3 + $0x540] sm:$0xff] %v2660_v43 }
 0x2fd   : > { %776 = vst.msk [vmem:[#allocation3 + $0x7e0] sm:$0xff] %vm747_vm2, %v708_v30  ;;  %v1966_v37 = vld [vmem:[#allocation3 + $0x798] sm:$0xff]  ;;  %v1674_v61 = vpop.permute.xlu0 %1673 }
 0x2fe   : > { %4443 = vmatmul.msk.f32.gmra.mxu3 %vm1980_vm10, %v1966_v37  ;;  %969 = vst.msk [vmem:[#allocation3 + $0x7e0] sm:$0xff] %vm940_vm4, %v901_v27  ;;  %v3169_v27 = vld [vmem:[%s7364_s3 + $0x178] sm:$0xff]  ;;  %v3163_v30 = vld [vmem:[%s7364_s3 + $0x148] sm:$0xff] }
 0x2ff   : > { %1162 = vst.msk [vmem:[#allocation3 + $0x7e0] sm:$0xff] %vm1133_vm5, %v1094_v24  ;;  %3795 = vmatmul.f32.gmra.mxu1 %v2213_v31  ;;  %v1096_v23 = vpop.permute.xlu2 %1095  ;;  %3496 = vmatpush.msrb.mxu3 %v3169_v27 }
 0x300   : > { %2629 = vst [vmem:[#allocation3 + $0x580] sm:$0xff] %v2597_v45 }
 0x301   : > { %v2161_v0 = vpop.f32.mrf.mxu3  ;;  %3497 = vmatpush.msrb.mxu3 %v3168_v4 }
 0x302   : > { %v2162_v40 = vadd.f32 %v6070_v58, %v2161_v0  ;;  %v6121_v60 = vpop.f32.mrf.mxu1 }
 0x303   : > { %7378 = vst [vmem:[#allocation13_spill] sm:$0xff] %v6121_v60  ;;  %3498 = vmatpush.msrb.mxu3 %v3167_v22  ;;  %v6417_v60 = vld [vmem:[%s7364_s3 + $0x448] sm:$0xff] }
 0x304   : > { %v2215_v39 = vmax.f32 %v2162_v40, 0.0  ;;  %v1287_v57 = vpop.permute.xlu1 %1286 }
 0x305   : > { %1355 = vst.msk [vmem:[#allocation3 + $0x7e0] sm:$0xff] %vm1326_vm6, %v1287_v57  ;;  %v710_v9 = vpop.permute.xlu0 %709  ;;  %v3159_v57 = vld [vmem:[%s7364_s3 + $0x128] sm:$0xff] }
 0x306   : > { %2247 = vst [vmem:[#allocation2 + $0x111] sm:$0xff] %v2215_v39 }
 0x307   : > { %1549 = vst.msk [vmem:[#allocation3 + $0x7e0] sm:$0xff] %vm1520_vm7, %v1481_v41  ;;  %3798 = vmatmul.f32.gmra.mxu1 %v2214_v6  ;;  %v1676_v7 = vpop.permute.xlu2 %1675  ;;  %v3166_v6 = vld [vmem:[%s7364_s3 + $0x160] sm:$0xff] }
 0x308   : > { %1742 = vst.msk [vmem:[#allocation3 + $0x7e0] sm:$0xff] %vm1713_vm8, %v1674_v61  ;;  %3499 = vmatpush.msrb.mxu3 %v3166_v6 }
 0x309   : > { %777 = vst.msk [vmem:[#allocation3 + $0x828] sm:$0xff] %vm747_vm2, %v710_v9 }
 0x30a   : > { %v6131_v14 = vpop.f32.mrf.mxu1  ;;  %3500 = vmatpush.msrb.mxu3 %v3165_v44 }
 0x30b   : > { %7379 = vst [vmem:[#allocation14_spill] sm:$0xff] %v6131_v14 }
 0x30c   : > { %v1867_v16 = vpop.permute.xlu1 %1866  ;;  %3501 = vmatpush.msrb.mxu3 %v3164_v35 }
 0x30d   : > { %1935 = vst.msk [vmem:[#allocation3 + $0x7e0] sm:$0xff] %vm1906_vm9, %v1867_v16  ;;  %v2281_v55 = vld [vmem:[#allocation2 + $0x110] sm:$0xff]  ;;  %v1289_v62 = vpop.permute.xlu0 %1288 }
 0x30e   : > { %v6127_v8 = vld [vmem:[#allocation2 + $0x10a] sm:$0xff]  ;;  %2313 = vst [vmem:[#allocation3 + $0x678] sm:$0xff] %v2281_v55  ;;  %3355 = vmatmul.f32.gmra.mxu2 %v2281_v55  ;;  %3688 = vmatmul.f32.gmra.mxu0 %v2281_v55  ;;  %v6129_v63 = vld [vmem:[#allocation2 + $0x112] sm:$0xff] }
 0x30f   : > { %3801 = vmatmul.f32.gmra.mxu1 %v2215_v39  ;;  %v2345_v26 = vld [vmem:[#allocation2 + $0x111] sm:$0xff]  ;;  %2440 = vst [vmem:[#allocation3 + $0x640] sm:$0xff] %v6127_v8  ;;  %v712_v5 = vpop.permute.xlu2 %711  ;;  %3502 = vmatpush.msrb.mxu3 %v3163_v30 }
 0x310   : > { %2441 = vst [vmem:[#allocation3 + $0x688] sm:$0xff] %v6129_v63  ;;  %v2661_v13 = vld [vmem:[#allocation2 + $0x110] sm:$0xff] }
 0x311   : > { %2377 = vst [vmem:[#allocation3 + $0x680] sm:$0xff] %v2345_v26  ;;  %v2598_v36 = vld [vmem:[#allocation2 + $0x10a] sm:$0xff]  ;;  %v2599_v32 = vld [vmem:[#allocation2 + $0x112] sm:$0xff]  ;;  %3503 = vmatpush.msrb.mxu3 %v3162_v38 }
 0x312   : > { %2693 = vst [vmem:[#allocation3 + $0x588] sm:$0xff] %v2661_v13  ;;  %v6140_v20 = vpop.f32.mrf.mxu1  ;;  %v3160_v39 = vld [vmem:[%s7364_s3 + $0x130] sm:$0xff] }
 0x313   : > { %2630 = vst [vmem:[#allocation3 + $0x5c8] sm:$0xff] %v2598_v36  ;;  %3504 = vmatpush.msrb.mxu3 %v3161_v53 }
 0x314   : > { %v903_v59 = vpop.permute.xlu1 %902  ;;  %v1967_v2 = vld [vmem:[#allocation3 + $0x7e0] sm:$0xff]  ;;  %2631 = vst [vmem:[#allocation3 + $0x610] sm:$0xff] %v2599_v32  ;;  %v3155_v32 = vld [vmem:[%s7364_s3 + $0x108] sm:$0xff] }
 0x315   : > { %970 = vst.msk [vmem:[#allocation3 + $0x828] sm:$0xff] %vm940_vm4, %v903_v59  ;;  %4444 = vmatmul.msk.f32.gmra.mxu3 %vm1980_vm10, %v1967_v2  ;;  %v1869_v52 = vpop.permute.xlu0 %1868 }
 0x316   : > { %1163 = vst.msk [vmem:[#allocation3 + $0x828] sm:$0xff] %vm1133_vm5, %v1096_v23  ;;  %3505 = vmatpush.msrb.mxu3 %v3160_v39  ;;  %v3158_v23 = vld [vmem:[%s7364_s3 + $0x120] sm:$0xff] }
 0x317   : > { %1356 = vst.msk [vmem:[#allocation3 + $0x828] sm:$0xff] %vm1326_vm6, %v1289_v62  ;;  %v1291_v3 = vpop.permute.xlu2 %1290  ;;  %v3157_v62 = vld [vmem:[%s7364_s3 + $0x118] sm:$0xff] }
 0x318   : > { %v2164_v31 = vpop.f32.mrf.mxu3  ;;  %7380 = vst [vmem:[#allocation15_spill] sm:$0xff] %v6140_v20  ;;  %3506 = vmatpush.msrb.mxu3 %v3159_v57 }
 0x319   : > { %v2165_v11 = vadd.f32 %v6070_v58, %v2164_v31  ;;  %v3151_v31 = vld [vmem:[%s7364_s3 + $0xe8] sm:$0xff] }
 0x31a   : > { %v6185_v0 = vpop.f32.mrf.mxu1  ;;  %3507 = vmatpush.msrb.mxu3 %v3158_v23  ;;  %3385 = vmatpush.msrb.mxu2 %v3151_v31  ;;  %v3145_v23 = vld [vmem:[%s7364_s3 + $0xb8] sm:$0xff] }
 0x31b   : > { %v2216_v12 = vmax.f32 %v2165_v11, 0.0  ;;  %7381 = vst [vmem:[#allocation16_spill] sm:$0xff] %v6185_v0  ;;  %v3154_v11 = vld [vmem:[%s7364_s3 + $0x100] sm:$0xff] }
 0x31c   : > { %v1483_v34 = vpop.permute.xlu1 %1482  ;;  %3508 = vmatpush.msrb.mxu3 %v3157_v62 }
 0x31d   : > { %2248 = vst [vmem:[#allocation2 + $0x121] sm:$0xff] %v2216_v12  ;;  %v905_v50 = vpop.permute.xlu0 %904  ;;  %3804 = vmatmul.f32.gmra.mxu1 %v2216_v12  ;;  %v3150_v12 = vld [vmem:[%s7364_s3 + $0xe0] sm:$0xff] }
 0x31e   : > { %1550 = vst.msk [vmem:[#allocation3 + $0x828] sm:$0xff] %vm1520_vm7, %v1483_v34  ;;  %v2386_v34 = vld [vmem:[#allocation2 + $0x2] sm:$0xff]  ;;  %3386 = vmatpush.msrb.mxu2 %v3150_v12 }
 0x31f   : > { %1743 = vst.msk [vmem:[#allocation3 + $0x828] sm:$0xff] %vm1713_vm8, %v1676_v7  ;;  %v1871_v45 = vpop.permute.xlu2 %1870  ;;  %v3143_v12 = vld [vmem:[%s7364_s3 + $0xa8] sm:$0xff] }
 0x320   : > { %1936 = vst.msk [vmem:[#allocation3 + $0x828] sm:$0xff] %vm1906_vm9, %v1869_v52  ;;  %v3156_v52 = vld [vmem:[%s7364_s3 + $0x110] sm:$0xff] }
 0x321   : > { %3509 = vmatpush.msrb.mxu3 %v3156_v52 }
 0x322   : > { %v6233_v6 = vpop.f32.mrf.mxu1 }
 0x323   : > { %3510 = vmatpush.msrb.mxu3 %v3155_v32 }
 0x324   : > { %v519_v18 = vpop.permute.xlu1 %518  ;;  %v2282_v56 = vld [vmem:[#allocation2 + $0x120] sm:$0xff] }
 0x325   : > { %585 = vst.msk [vmem:[#allocation3 + $0x870] sm:$0xff] %vm554_vm1, %v519_v18  ;;  %3358 = vmatmul.f32.gmra.mxu2 %v2282_v56  ;;  %3691 = vmatmul.f32.gmra.mxu0 %v2282_v56  ;;  %v1485_v29 = vpop.permute.xlu0 %1484  ;;  %v2346_v24 = vld [vmem:[#allocation2 + $0x121] sm:$0xff] }
 0x326   : > { %778 = vst.msk [vmem:[#allocation3 + $0x870] sm:$0xff] %vm747_vm2, %v712_v5  ;;  %v2662_v19 = vld [vmem:[#allocation2 + $0x120] sm:$0xff]  ;;  %v2387_v5 = vld [vmem:[#allocation2 + $0xa] sm:$0xff]  ;;  %3511 = vmatpush.msrb.mxu3 %v3154_v11  ;;  %v4535_v11 = vld [vmem:[#allocation3 + $0xe8] sm:$0xff] }
 0x327   : > { %v1968_v41 = vld [vmem:[#allocation3 + $0x828] sm:$0xff]  ;;  %971 = vst.msk [vmem:[#allocation3 + $0x870] sm:$0xff] %vm940_vm4, %v905_v50  ;;  %v907_v2 = vpop.permute.xlu2 %906 }
 0x328   : > { %4445 = vmatmul.msk.f32.gmra.mxu3 %vm1980_vm10, %v1968_v41  ;;  %2314 = vst [vmem:[#allocation3 + $0x6c0] sm:$0xff] %v2282_v56 }
 0x329   : > { %2378 = vst [vmem:[#allocation3 + $0x6c8] sm:$0xff] %v2346_v24 }
 0x32a   : > { %v2167_v48 = vpop.f32.mrf.mxu3  ;;  %2694 = vst [vmem:[#allocation3 + $0x5d0] sm:$0xff] %v2662_v19  ;;  %v6238_v19 = vpop.f32.mrf.mxu0 }
 0x32b   : > { %v2168_v37 = vadd.f32 %v6070_v58, %v2167_v48  ;;  %v3148_v48 = vld [vmem:[%s7364_s3 + $0xd0] sm:$0xff]  ;;  %v6248_v53 = vpop.f32.mrf.mxu1 }
 0x32c   : > { %v1098_v61 = vpop.permute.xlu1 %1097  ;;  %7382 = vst [vmem:[#allocation17_spill] sm:$0xff] %v6248_v53 }
 0x32d   : > { %1164 = vst.msk [vmem:[#allocation3 + $0x870] sm:$0xff] %vm1133_vm5, %v1098_v61  ;;  %v2217_v43 = vmax.f32 %v2168_v37, 0.0  ;;  %v521_v40 = vpop.permute.xlu0 %520  ;;  %v3147_v61 = vld [vmem:[%s7364_s3 + $0xc8] sm:$0xff] }
 0x32e   : > { %1357 = vst.msk [vmem:[#allocation3 + $0x870] sm:$0xff] %vm1326_vm6, %v1291_v3 }
 0x32f   : > { %2249 = vst [vmem:[#allocation2 + $0x129] sm:$0xff] %v2217_v43  ;;  %3807 = vmatmul.f32.gmra.mxu1 %v2217_v43  ;;  %v1487_v56 = vpop.permute.xlu2 %1486 }
 0x330   : > { %1551 = vst.msk [vmem:[#allocation3 + $0x870] sm:$0xff] %vm1520_vm7, %v1485_v29  ;;  %v3149_v29 = vld [vmem:[%s7364_s3 + $0xd8] sm:$0xff] }
 0x331   : > { %586 = vst.msk [vmem:[#allocation3 + $0x8b8] sm:$0xff] %vm554_vm1, %v521_v40  ;;  %3387 = vmatpush.msrb.mxu2 %v3149_v29  ;;  %v6286_v29 = vld [vmem:[#allocation3 + $0x178] sm:$0xff] }
 0x332   : > { %v6254_v57 = vpop.f32.mrf.mxu0 }
 0x333   : > { %3388 = vmatpush.msrb.mxu2 %v3148_v48  ;;  %7383 = vst [vmem:[#allocation18_spill] sm:$0xff] %v6254_v57  ;;  %v6270_v32 = vpop.f32.mrf.mxu1 }
 0x334   : > { %v1678_v9 = vpop.permute.xlu1 %1677  ;;  %7384 = vst [vmem:[#allocation19_spill] sm:$0xff] %v6270_v32 }
 0x335   : > { %1744 = vst.msk [vmem:[#allocation3 + $0x870] sm:$0xff] %vm1713_vm8, %v1678_v9  ;;  %v1100_v7 = vpop.permute.xlu0 %1099  ;;  %3389 = vmatpush.msrb.mxu2 %v3147_v61  ;;  %v3146_v9 = vld [vmem:[%s7364_s3 + $0xc0] sm:$0xff]  ;;  %v3140_v61 = vld [vmem:[%s7364_s3 + $0x90] sm:$0xff] }
 0x336   : > { %1937 = vst.msk [vmem:[#allocation3 + $0x870] sm:$0xff] %vm1906_vm9, %v1871_v45  ;;  %v2283_v16 = vld [vmem:[#allocation2 + $0x128] sm:$0xff] }
 0x337   : > { %v6200_v55 = vld [vmem:[#allocation2 + $0x122] sm:$0xff]  ;;  %2315 = vst [vmem:[#allocation3 + $0x708] sm:$0xff] %v2283_v16  ;;  %3361 = vmatmul.f32.gmra.mxu2 %v2283_v16  ;;  %3694 = vmatmul.f32.gmra.mxu0 %v2283_v16  ;;  %v6205_v26 = vld [vmem:[#allocation2 + $0x12a] sm:$0xff] }
 0x338   : > { %v2347_v59 = vld [vmem:[#allocation2 + $0x129] sm:$0xff]  ;;  %2442 = vst [vmem:[#allocation3 + $0x6d0] sm:$0xff] %v6200_v55  ;;  %3390 = vmatpush.msrb.mxu2 %v3146_v9 }
 0x339   : > { %2443 = vst [vmem:[#allocation3 + $0x718] sm:$0xff] %v6205_v26  ;;  %v2663_v27 = vld [vmem:[#allocation2 + $0x128] sm:$0xff] }
 0x33a   : > { %2379 = vst [vmem:[#allocation3 + $0x710] sm:$0xff] %v2347_v59  ;;  %v2600_v44 = vld [vmem:[#allocation2 + $0x122] sm:$0xff]  ;;  %v2601_v41 = vld [vmem:[#allocation2 + $0x12a] sm:$0xff]  ;;  %3391 = vmatpush.msrb.mxu2 %v3145_v23 }
 0x33b   : > { %2695 = vst [vmem:[#allocation3 + $0x618] sm:$0xff] %v2663_v27 }
 0x33c   : > { %v714_v13 = vpop.permute.xlu1 %713  ;;  %2632 = vst [vmem:[#allocation3 + $0x658] sm:$0xff] %v2600_v44  ;;  %v3141_v44 = vld [vmem:[%s7364_s3 + $0x98] sm:$0xff] }
 0x33d   : > { %779 = vst.msk [vmem:[#allocation3 + $0x8b8] sm:$0xff] %vm747_vm2, %v714_v13  ;;  %v1969_v36 = vld [vmem:[#allocation3 + $0x870] sm:$0xff]  ;;  %v1680_v3 = vpop.permute.xlu0 %1679  ;;  %v4534_v13 = vld [vmem:[#allocation3 + $0xa0] sm:$0xff] }
 0x33e   : > { %972 = vst.msk [vmem:[#allocation3 + $0x8b8] sm:$0xff] %vm940_vm4, %v907_v2  ;;  %4446 = vmatmul.msk.f32.gmra.mxu3 %vm1980_vm10, %v1969_v36  ;;  %v3144_v36 = vld [vmem:[%s7364_s3 + $0xb0] sm:$0xff] }
 0x33f   : > { %1165 = vst.msk [vmem:[#allocation3 + $0x8b8] sm:$0xff] %vm1133_vm5, %v1100_v7  ;;  %3392 = vmatpush.msrb.mxu2 %v3144_v36 }
 0x340   : > { %2633 = vst [vmem:[#allocation3 + $0x6a0] sm:$0xff] %v2601_v41  ;;  %v6292_v41 = vpop.f32.mrf.mxu1 }
 0x341   : > { %v2170_v50 = vpop.f32.mrf.mxu3  ;;  %3393 = vmatpush.msrb.mxu2 %v3143_v12  ;;  %7386 = vst [vmem:[#allocation21_spill] sm:$0xff] %v6292_v41  ;;  %v3233_v12 = vld [vmem:[%s7364_s3 + $0x378] sm:$0xff]  ;;  %v4549_v41 = vld [vmem:[#allocation3 + $0xe0] sm:$0xff] }
 0x342   : > { %v2171_v4 = vadd.f32 %v6070_v58, %v2170_v50  ;;  %v6277_v50 = vpop.f32.mrf.mxu0  ;;  %3948 = vmatpush.msra.mxu3 %v3233_v12  ;;  %v6384_v12 = vld [vmem:[#allocation3 + $0x328] sm:$0xff] }
 0x343   : > { %7385 = vst [vmem:[#allocation20_spill] sm:$0xff] %v6277_v50  ;;  %v4552_v50 = vld [vmem:[#allocation3 + $0x128] sm:$0xff] }
 0x344   : > { %v2218_v22 = vmax.f32 %v2171_v4, 0.0  ;;  %v1293_v18 = vpop.permute.xlu1 %1292  ;;  %v6279_v4 = vld [vmem:[#allocation3 + $0x130] sm:$0xff] }
 0x345   : > { %1358 = vst.msk [vmem:[#allocation3 + $0x8b8] sm:$0xff] %vm1326_vm6, %v1293_v18 }
 0x346   : > { %2250 = vst [vmem:[#allocation2 + $0x139] sm:$0xff] %v2218_v22  ;;  %3810 = vmatmul.f32.gmra.mxu1 %v2218_v22  ;;  %v3142_v22 = vld [vmem:[%s7364_s3 + $0xa0] sm:$0xff] }
 0x347   : > { %1552 = vst.msk [vmem:[#allocation3 + $0x8b8] sm:$0xff] %vm1520_vm7, %v1487_v56  ;;  %3394 = vmatpush.msrb.mxu2 %v3142_v22  ;;  %v2322_v22 = vld [vmem:[#allocation2 + $0x1] sm:$0xff] }
 0x348   : > { %1745 = vst.msk [vmem:[#allocation3 + $0x8b8] sm:$0xff] %vm1713_vm8, %v1680_v3  ;;  %v6314_v23 = vpop.f32.mrf.mxu1 }
 0x349   : > { %3395 = vmatpush.msrb.mxu2 %v3141_v44  ;;  %7388 = vst [vmem:[#allocation23_spill] sm:$0xff] %v6314_v23  ;;  %v3236_v23 = vld [vmem:[%s7364_s3 + $0x390] sm:$0xff] }
 0x34a   : > { %v6299_v48 = vpop.f32.mrf.mxu0 }
 0x34b   : > { %7387 = vst [vmem:[#allocation22_spill] sm:$0xff] %v6299_v48  ;;  %3396 = vmatpush.msrb.mxu2 %v3140_v61 }
 0x34c   : > { %v1873_v1 = vpop.permute.xlu1 %1872 }
 0x34d   : > { %1938 = vst.msk [vmem:[#allocation3 + $0x8b8] sm:$0xff] %vm1906_vm9, %v1873_v1  ;;  %v2284_v24 = vld [vmem:[#allocation2 + $0x138] sm:$0xff]  ;;  %v6294_v1 = vld [vmem:[#allocation3 + $0x1c0] sm:$0xff] }
 0x34e   : > { %v2348_v35 = vld [vmem:[#allocation2 + $0x139] sm:$0xff]  ;;  %2316 = vst [vmem:[#allocation3 + $0x750] sm:$0xff] %v2284_v24  ;;  %3364 = vmatmul.f32.gmra.mxu2 %v2284_v24  ;;  %3697 = vmatmul.f32.gmra.mxu0 %v2284_v24 }
 0x34f   : > { %2380 = vst [vmem:[#allocation3 + $0x758] sm:$0xff] %v2348_v35  ;;  %v2664_v30 = vld [vmem:[#allocation2 + $0x138] sm:$0xff] }
 0x350   : > { %2696 = vst [vmem:[#allocation3 + $0x660] sm:$0xff] %v2664_v30 }
 0x352   : > { %v6325_v36 = vpop.f32.mrf.mxu0 }
 0x353   : > { %7390 = vst [vmem:[#allocation25_spill] sm:$0xff] %v6325_v36 }
 0x354   : > { %v1970_v37 = vld [vmem:[#allocation3 + $0x8b8] sm:$0xff] }
 0x355   : > { %4447 = vmatmul.msk.f32.gmra.mxu3 %vm1980_vm10, %v1970_v37 }
 0x358   : > { %v2173_v38 = vpop.f32.mrf.mxu3 }
 0x359   : > { %v2174_v43 = vadd.f32 %v6070_v58, %v2173_v38 }
 0x35a   : > { %v6348_v61 = vpop.f32.mrf.mxu0 }
 0x35b   : > { %v2219_v49 = vmax.f32 %v2174_v43, 0.0  ;;  %7392 = vst [vmem:[#allocation27_spill] sm:$0xff] %v6348_v61  ;;  %v6468_v61 = vpop.f32.mrf.mxu2 }
 0x35c   : > { %7397 = vst [vmem:[#allocation32_spill] sm:$0xff] %v6468_v61 }
 0x35d   : > { %2251 = vst [vmem:[#allocation2 + $0x141] sm:$0xff] %v2219_v49  ;;  %3512 = vmatmul.f32.vlgmr.msrb.gmra.mxu3 %v2386_v34  ;;  %3813 = vmatmul.f32.gmra.mxu1 %v2219_v49  ;;  %v6308_v49 = vld [vmem:[#allocation3 + $0x208] sm:$0xff] }
 0x364   : > { %v2285_v45 = vld [vmem:[#allocation2 + $0x140] sm:$0xff] }
 0x365   : > { %v6250_v40 = vld [vmem:[#allocation2 + $0x13a] sm:$0xff]  ;;  %3515 = vmatmul.f32.gmra.mxu3 %v2387_v5  ;;  %2317 = vst [vmem:[#allocation3 + $0x798] sm:$0xff] %v2285_v45  ;;  %3367 = vmatmul.f32.gmra.mxu2 %v2285_v45  ;;  %v6252_v39 = vld [vmem:[#allocation2 + $0x142] sm:$0xff] }
 0x366   : > { %3700 = vmatmul.f32.gmra.mxu0 %v2285_v45  ;;  %v6262_v16 = vld [vmem:[#allocation2 + $0x141] sm:$0xff]  ;;  %2445 = vst [vmem:[#allocation3 + $0x7a8] sm:$0xff] %v6252_v39 }
 0x367   : > { %2381 = vst [vmem:[#allocation3 + $0x7a0] sm:$0xff] %v6262_v16  ;;  %v2665_v62 = vld [vmem:[#allocation2 + $0x140] sm:$0xff]  ;;  %v3139_v45 = vld [vmem:[%s7364_s3 + $0x88] sm:$0xff] }
 0x368   : > { %v2602_v2 = vld [vmem:[#allocation2 + $0x13a] sm:$0xff]  ;;  %v2603_v52 = vld [vmem:[#allocation2 + $0x142] sm:$0xff]  ;;  %2697 = vst [vmem:[#allocation3 + $0x6a8] sm:$0xff] %v2665_v62  ;;  %3397 = vmatpush.msrb.mxu2 %v3139_v45 }
 0x369   : > { %2634 = vst [vmem:[#allocation3 + $0x6e8] sm:$0xff] %v2602_v2  ;;  %v3249_v45 = vld [vmem:[%s7364_s3 + $0x3f8] sm:$0xff] }
 0x36a   : > { %2635 = vst [vmem:[#allocation3 + $0x730] sm:$0xff] %v2603_v52  ;;  %v3138_v52 = vld [vmem:[%s7364_s3 + $0x80] sm:$0xff]  ;;  %4061 = vmatpush.msra.mxu0 %v3249_v45  ;;  %v6399_v45 = vpop.f32.mrf.mxu0 }
 0x36b   : > { %v2176_v59 = vpop.f32.mrf.mxu3  ;;  %3398 = vmatpush.msrb.mxu2 %v3138_v52  ;;  %7394 = vst [vmem:[#allocation29_spill] sm:$0xff] %v6399_v45 }
 0x36c   : > { %v2177_v7 = vadd.f32 %v6070_v58, %v2176_v59 }
 0x36d   : > { %3518 = vmatmul.f32.gmra.mxu3 %v4534_v13  ;;  %v6323_v13 = vpop.f32.mrf.mxu1 }
 0x36e   : > { %v2220_v31 = vmax.f32 %v2177_v7, 0.0  ;;  %v6317_v7 = vld [vmem:[#allocation3 + $0x250] sm:$0xff]  ;;  %7389 = vst [vmem:[#allocation24_spill] sm:$0xff] %v6323_v13  ;;  %v6466_v13 = vld [vmem:[%s7364_s3 + $0x428] sm:$0xff] }
 0x370   : > { %2252 = vst [vmem:[#allocation2 + $0x151] sm:$0xff] %v2220_v31  ;;  %3816 = vmatmul.f32.gmra.mxu1 %v2220_v31 }
 0x372   : > { %v6459_v28 = vpop.f32.mrf.mxu0 }
 0x373   : > { %7396 = vst [vmem:[#allocation31_spill] sm:$0xff] %v6459_v28 }
 0x375   : > { %3521 = vmatmul.f32.gmra.mxu3 %v4535_v11  ;;  %v6327_v11 = vld [vmem:[#allocation3 + $0x298] sm:$0xff] }
 0x377   : > { %v2286_v34 = vld [vmem:[#allocation2 + $0x150] sm:$0xff] }
 0x378   : > { %v6275_v5 = vld [vmem:[#allocation2 + $0x151] sm:$0xff]  ;;  %2318 = vst [vmem:[#allocation3 + $0x7e0] sm:$0xff] %v2286_v34  ;;  %3370 = vmatmul.f32.gmra.mxu2 %v2286_v34  ;;  %3703 = vmatmul.f32.gmra.mxu0 %v2286_v34 }
 0x379   : > { %v2666_v27 = vld [vmem:[#allocation2 + $0x150] sm:$0xff]  ;;  %v3217_v34 = vld [vmem:[%s7364_s3 + $0x2f8] sm:$0xff] }
 0x37a   : > { %2698 = vst [vmem:[#allocation3 + $0x6f0] sm:$0xff] %v2666_v27  ;;  %3835 = vmatpush.msra.mxu2 %v3217_v34  ;;  %v3232_v34 = vld [vmem:[%s7364_s3 + $0x370] sm:$0xff]  ;;  %v6512_v61 = vpop.f32.mrf.mxu0 }
 0x37b   : > { %3949 = vmatpush.msra.mxu3 %v3232_v34  ;;  %v3247_v34 = vld [vmem:[%s7364_s3 + $0x3e8] sm:$0xff]  ;;  %7399 = vst [vmem:[#allocation34_spill] sm:$0xff] %v6512_v61  ;;  %v3237_v61 = vld [vmem:[%s7364_s3 + $0x398] sm:$0xff] }
 0x37c   : > { %3836 = vmatpush.msra.mxu2 %v3216_v42  ;;  %v3242_v42 = vld [vmem:[%s7364_s3 + $0x3c0] sm:$0xff] }
 0x37d   : > { %3524 = vmatmul.f32.gmra.mxu3 %v6279_v4 }
 0x381   : > { %v2179_v18 = vpop.f32.mrf.mxu3 }
 0x382   : > { %v2180_v56 = vadd.f32 %v6070_v58, %v2179_v18 }
 0x384   : > { %v2221_v3 = vmax.f32 %v2180_v56, 0.0  ;;  %v6340_v56 = vpop.f32.mrf.mxu1 }
 0x385   : > { %3527 = vmatmul.f32.gmra.mxu3 %v6286_v29  ;;  %7391 = vst [vmem:[#allocation26_spill] sm:$0xff] %v6340_v56 }
 0x386   : > { %2253 = vst [vmem:[#allocation2 + $0x159] sm:$0xff] %v2221_v3  ;;  %3819 = vmatmul.f32.gmra.mxu1 %v2221_v3 }
 0x38c   : > { %v6377_v52 = vpop.f32.mrf.mxu1 }
 0x38d   : > { %3530 = vmatmul.f32.gmra.mxu3 %v6294_v1  ;;  %v2287_v24 = vld [vmem:[#allocation2 + $0x158] sm:$0xff]  ;;  %7393 = vst [vmem:[#allocation28_spill] sm:$0xff] %v6377_v52  ;;  %v3244_v52 = vld [vmem:[%s7364_s3 + $0x3d0] sm:$0xff] }
 0x38e   : > { %v6297_v35 = vld [vmem:[#allocation2 + $0x152] sm:$0xff]  ;;  %2319 = vst [vmem:[#allocation3 + $0x828] sm:$0xff] %v2287_v24  ;;  %3373 = vmatmul.f32.gmra.mxu2 %v2287_v24  ;;  %3706 = vmatmul.f32.gmra.mxu0 %v2287_v24  ;;  %v6301_v30 = vld [vmem:[#allocation2 + $0x15a] sm:$0xff] }
 0x38f   : > { %v6303_v37 = vld [vmem:[#allocation2 + $0x159] sm:$0xff] }
 0x390   : > { %v2667_v38 = vld [vmem:[#allocation2 + $0x158] sm:$0xff] }
 0x391   : > { %v2604_v43 = vld [vmem:[#allocation2 + $0x152] sm:$0xff]  ;;  %v2605_v9 = vld [vmem:[#allocation2 + $0x15a] sm:$0xff]  ;;  %2699 = vst [vmem:[#allocation3 + $0x738] sm:$0xff] %v2667_v38 }
 0x392   : > { %2636 = vst [vmem:[#allocation3 + $0x778] sm:$0xff] %v2604_v43  ;;  %v6346_v24 = vld [vmem:[%s7364_s3 + $0x478] sm:$0xff]  ;;  %v6350_v38 = vld [vmem:[#allocation3 + $0x2e0] sm:$0xff] }
 0x393   : > { %2637 = vst [vmem:[#allocation3 + $0x7c0] sm:$0xff] %v2605_v9  ;;  %v6353_v43 = vld [vmem:[#allocation2 + $0x9] sm:$0xff]  ;;  %4174 = vmatpush.msra.mxu1 %v6346_v24 }
 0x394   : > { %v6436_v51 = vpop.f32.mrf.mxu1 }
 0x395   : > { %3533 = vmatmul.f32.gmra.mxu3 %v6308_v49  ;;  %7395 = vst [vmem:[#allocation30_spill] sm:$0xff] %v6436_v51  ;;  %v6457_v51 = vld [vmem:[%s7364_s3 + $0x430] sm:$0xff] }
 0x398   : > { %v2182_v62 = vpop.f32.mrf.mxu3 }
 0x399   : > { %v2183_v59 = vadd.f32 %v6070_v58, %v2182_v62  ;;  %v6362_v62 = vld [vmem:[%s7364_s3 + $0x470] sm:$0xff] }
 0x39a   : > { %4175 = vmatpush.msra.mxu1 %v6362_v62 }
 0x39b   : > { %v2222_v2 = vmax.f32 %v2183_v59, 0.0  ;;  %v6368_v59 = vld [vmem:[%s7364_s3 + $0x468] sm:$0xff] }
 0x39c   : > { %4176 = vmatpush.msra.mxu1 %v6368_v59 }
 0x39d   : > { %2254 = vst [vmem:[#allocation2 + $0x169] sm:$0xff] %v2222_v2  ;;  %3536 = vmatmul.f32.gmra.mxu3 %v6317_v7  ;;  %3822 = vmatmul.f32.gmra.mxu1 %v2222_v2  ;;  %v6374_v2 = vld [vmem:[%s7364_s3 + $0x460] sm:$0xff] }
 0x39e   : > { %4177 = vmatpush.msra.mxu1 %v6374_v2 }
 0x3a4   : > { %v2288_v31 = vld [vmem:[#allocation2 + $0x168] sm:$0xff] }
 0x3a5   : > { %3539 = vmatmul.f32.gmra.mxu3 %v6327_v11  ;;  %2320 = vst [vmem:[#allocation3 + $0x870] sm:$0xff] %v2288_v31  ;;  %3376 = vmatmul.f32.gmra.mxu2 %v2288_v31  ;;  %v6336_v27 = vld [vmem:[#allocation2 + $0x169] sm:$0xff] }
 0x3a6   : > { %3709 = vmatmul.f32.gmra.mxu0 %v2288_v31  ;;  %v6338_v18 = vld [vmem:[#allocation2 + $0x168] sm:$0xff]  ;;  %v6382_v31 = vld [vmem:[%s7364_s3 + $0x458] sm:$0xff] }
 0x3a7   : > { %4178 = vmatpush.msra.mxu1 %v6382_v31 }
 0x3ab   : > { %v2185_v3 = vpop.f32.mrf.mxu3 }
 0x3ac   : > { %v2186_v44 = vadd.f32 %v6070_v58, %v2185_v3  ;;  %v3248_v3 = vld [vmem:[%s7364_s3 + $0x3f0] sm:$0xff] }
 0x3ad   : > { %3542 = vmatmul.f32.gmra.mxu3 %v6350_v38  ;;  %4062 = vmatpush.msra.mxu0 %v3248_v3  ;;  %v3246_v3 = vld [vmem:[%s7364_s3 + $0x3e0] sm:$0xff] }
 0x3ae   : > { %v2223_v9 = vmax.f32 %v2186_v44, 0.0  ;;  %v6397_v44 = vld [vmem:[%s7364_s3 + $0x450] sm:$0xff] }
 0x3af   : > { %4179 = vmatpush.msra.mxu1 %v6397_v44  ;;  %4063 = vmatpush.msra.mxu0 %v3247_v34  ;;  %v6426_v34 = vld [vmem:[%s7364_s3 + $0x440] sm:$0xff] }
 0x3b0   : > { %2255 = vst [vmem:[#allocation2 + $0x171] sm:$0xff] %v2223_v9  ;;  %3825 = vmatmul.f32.gmra.mxu1 %v2223_v9 }
 0x3b1   : > { %4064 = vmatpush.msra.mxu0 %v3246_v3  ;;  %4180 = vmatpush.msra.mxu1 %v6417_v60 }
 0x3b3   : > { %4181 = vmatpush.msra.mxu1 %v6426_v34 }
 0x3b5   : > { %3545 = vmatmul.f32.gmra.mxu3 %v6384_v12  ;;  %4182 = vmatpush.msra.mxu1 %v6445_v10 }
 0x3b7   : > { %v2289_v9 = vld [vmem:[#allocation2 + $0x170] sm:$0xff]  ;;  %4183 = vmatpush.msra.mxu1 %v6457_v51 }
 0x3b8   : > { %v6402_v0 = vld [vmem:[#allocation2 + $0x16a] sm:$0xff]  ;;  %2321 = vst [vmem:[#allocation3 + $0x8b8] sm:$0xff] %v2289_v9  ;;  %3379 = vmatmul.f32.gmra.mxu2 %v2289_v9  ;;  %3712 = vmatmul.f32.gmra.mxu0 %v2289_v9  ;;  %v6407_v20 = vld [vmem:[#allocation2 + $0x172] sm:$0xff] }
 0x3b9   : > { %v6409_v14 = vld [vmem:[#allocation2 + $0x171] sm:$0xff]  ;;  %4184 = vmatpush.msra.mxu1 %v6466_v13 }
 0x3ba   : > { %v3245_v9 = vld [vmem:[%s7364_s3 + $0x3d8] sm:$0xff]  ;;  %v6434_v3 = vld [vmem:[#allocation2 + $0x170] sm:$0xff] }
 0x3bb   : > { %4065 = vmatpush.msra.mxu0 %v3245_v9  ;;  %v2606_v56 = vld [vmem:[#allocation2 + $0x16a] sm:$0xff]  ;;  %v2607_v45 = vld [vmem:[#allocation2 + $0x172] sm:$0xff] }
 0x3bc   : > { %v3243_v9 = vld [vmem:[%s7364_s3 + $0x3c8] sm:$0xff]  ;;  %2638 = vst [vmem:[#allocation3 + $0x808] sm:$0xff] %v2606_v56  ;;  %v6474_v56 = vld [vmem:[%s7364_s3 + $0x420] sm:$0xff] }
 0x3bd   : > { %3548 = vmatmul.f32.gmra.mxu3 %v6428_v25  ;;  %4066 = vmatpush.msra.mxu0 %v3244_v52  ;;  %2639 = vst [vmem:[#allocation3 + $0x850] sm:$0xff] %v2607_v45  ;;  %v3231_v45 = vld [vmem:[%s7364_s3 + $0x368] sm:$0xff] }
 0x3be   : > { %3950 = vmatpush.msra.mxu3 %v3231_v45  ;;  %4185 = vmatpush.msra.mxu1 %v6474_v56  ;;  %v6506_v45 = vld [vmem:[%s7364_s3 + $0x410] sm:$0xff] }
 0x3bf   : > { %4067 = vmatpush.msra.mxu0 %v3243_v9  ;;  %v3241_v9 = vld [vmem:[%s7364_s3 + $0x3b8] sm:$0xff] }
 0x3c0   : > { %3399 = vmatmul.f32.vlgmr.msrb.gmra.mxu2 %v2322_v22 }
 0x3c1   : > { %v2188_v52 = vpop.f32.mrf.mxu3  ;;  %4068 = vmatpush.msra.mxu0 %v3242_v42  ;;  %v6489_v42 = vld [vmem:[%s7364_s3 + $0x418] sm:$0xff] }
 0x3c2   : > { %v2189_v22 = vadd.f32 %v6070_v58, %v2188_v52  ;;  %v6476_v58 = vld [vmem:[#allocation3 + $0x3b8] sm:$0xff]  ;;  %v6491_v52 = vpop.f32.mrf.mxu1  ;;  %4186 = vmatpush.msra.mxu1 %v6489_v42 }
 0x3c3   : > { %4069 = vmatpush.msra.mxu0 %v3241_v9  ;;  %7398 = vst [vmem:[#allocation33_spill] sm:$0xff] %v6491_v52  ;;  %v3239_v9 = vld [vmem:[%s7364_s3 + $0x3a8] sm:$0xff]  ;;  %v6514_v52 = vpop.f32.mrf.mxu2 }
 0x3c4   : > { %v2224_v47 = vmax.f32 %v2189_v22, 0.0  ;;  %v3240_v22 = vld [vmem:[%s7364_s3 + $0x3b0] sm:$0xff]  ;;  %7400 = vst [vmem:[#allocation35_spill] sm:$0xff] %v6514_v52  ;;  %4187 = vmatpush.msra.mxu1 %v6506_v45  ;;  %v4547_v52 = vld [vmem:[#allocation3 + $0x98] sm:$0xff] }
 0x3c5   : > { %3551 = vmatmul.f32.gmra.mxu3 %v6476_v58  ;;  %4070 = vmatpush.msra.mxu0 %v3240_v22  ;;  %v6519_v22 = vld [vmem:[%s7364_s3 + $0x408] sm:$0xff] }
 0x3c6   : > { %2256 = vst [vmem:[#allocation2 + $0x181] sm:$0xff] %v2224_v47  ;;  %3828 = vmatmul.f32.gmra.mxu1 %v2224_v47  ;;  %v3215_v47 = vld [vmem:[%s7364_s3 + $0x2e8] sm:$0xff] }
 0x3c7   : > { %3837 = vmatpush.msra.mxu2 %v3215_v47  ;;  %4071 = vmatpush.msra.mxu0 %v3239_v9  ;;  %v6522_v47 = vld [vmem:[#allocation3 + $0x400] sm:$0xff]  ;;  %v6531_v9 = vld [vmem:[%s7364_s3 + $0x400] sm:$0xff] }
 0x3c8   : > { %3402 = vmatmul.f32.gmra.mxu2 %v6353_v43  ;;  %v3238_v43 = vld [vmem:[%s7364_s3 + $0x3a0] sm:$0xff]  ;;  %4188 = vmatpush.msra.mxu1 %v6519_v22 }
 0x3c9   : > { %4072 = vmatpush.msra.mxu0 %v3238_v43  ;;  %v3235_v43 = vld [vmem:[%s7364_s3 + $0x388] sm:$0xff] }
 0x3ca   : > { %4189 = vmatpush.msra.mxu1 %v6531_v9  ;;  %v6541_v36 = vpop.f32.mrf.mxu1 }
 0x3cb   : > { %4073 = vmatpush.msra.mxu0 %v3237_v61  ;;  %7401 = vst [vmem:[#allocation36_spill] sm:$0xff] %v6541_v36  ;;  %v6546_v61 = vpop.f32.mrf.mxu2 }
 0x3cc   : > { %7402 = vst [vmem:[#allocation37_spill] sm:$0xff] %v6546_v61  ;;  %v3214_v61 = vld [vmem:[%s7364_s3 + $0x2e0] sm:$0xff] }
 0x3cd   : > { %3554 = vmatmul.f32.gmra.mxu3 %v6522_v47  ;;  %v2480_v28 = vld [vmem:[#allocation2 + $0x180] sm:$0xff]  ;;  %4074 = vmatpush.msra.mxu0 %v3236_v23 }
 0x3ce   : > { %3715 = vmatmul.f32.gmra.mxu0 %v2480_v28  ;;  %v3234_v28 = vld [vmem:[%s7364_s3 + $0x380] sm:$0xff]  ;;  %3838 = vmatpush.msra.mxu2 %v3214_v61  ;;  %v6575_v61 = vld [vmem:[#allocation3 + $0x4d8] sm:$0xff] }
 0x3cf   : > { %4075 = vmatpush.msra.mxu0 %v3235_v43  ;;  %v3230_v23 = vld [vmem:[%s7364_s3 + $0x360] sm:$0xff] }
 0x3d0   : > { %3405 = vmatmul.f32.gmra.mxu2 %v4547_v52  ;;  %v6548_v52 = vpop.f32.mrf.mxu0  ;;  %3951 = vmatpush.msra.mxu3 %v3230_v23  ;;  %v4550_v43 = vld [vmem:[%s7363_s2] ss:$0 sm:$0xff] }
 0x3d1   : > { %7403 = vst [vmem:[#allocation38_spill] sm:$0xff] %v6548_v52  ;;  %4076 = vmatpush.msra.mxu0 %v3234_v28  ;;  %v6566_v23 = vld [vmem:[#allocation3 + $0x490] sm:$0xff] }
 0x3d2   : > { %v6564_v17 = vpop.f32.mrf.mxu1 }
 0x3d3   : > { %v6562_v48 = vpop.f32.mrf.mxu2  ;;  %7405 = vst [vmem:[#allocation40_spill] sm:$0xff] %v6564_v17 }
 0x3d4   : > { %7404 = vst [vmem:[#allocation39_spill] sm:$0xff] %v6562_v48  ;;  %v4554_v48 = vld [vmem:[#allocation3 + $0x170] sm:$0xff] }
 0x3d5   : > { %3557 = vmatmul.f32.gmra.mxu3 %v6550_v33 }
 0x3d8   : > { %v2191_v36 = vpop.f32.mrf.mxu3  ;;  %3408 = vmatmul.f32.gmra.mxu2 %v4549_v41  ;;  %v6569_v41 = vpop.f32.mrf.mxu0 }
 0x3d9   : > { %v2192_v52 = vadd.f32 %v4550_v43, %v2191_v36  ;;  %7406 = vst [vmem:[#allocation41_spill] sm:$0xff] %v6569_v41  ;;  %v6593_v41 = vld [vmem:[#allocation3 + $0x520] sm:$0xff] }
 0x3da   : > { %v6581_v43 = vpop.f32.mrf.mxu1 }
 0x3db   : > { %v2225_v28 = vmax.f32 %v2192_v52, 0.0  ;;  %v6573_v46 = vpop.f32.mrf.mxu2  ;;  %v3229_v52 = vld [vmem:[%s7364_s3 + $0x358] sm:$0xff]  ;;  %7408 = vst [vmem:[#allocation43_spill] sm:$0xff] %v6581_v43  ;;  %v4556_v43 = vld [vmem:[#allocation3 + $0x1b8] sm:$0xff] }
 0x3dc   : > { %7407 = vst [vmem:[#allocation42_spill] sm:$0xff] %v6573_v46  ;;  %3952 = vmatpush.msra.mxu3 %v3229_v52  ;;  %v3213_v46 = vld [vmem:[%s7364_s3 + $0x2d8] sm:$0xff] }
 0x3dd   : > { %2257 = vst [vmem:[#allocation2 + $0x189] sm:$0xff] %v2225_v28  ;;  %3560 = vmatmul.f32.gmra.mxu3 %v6566_v23  ;;  %3831 = vmatmul.f32.gmra.mxu1 %v2225_v28 }
 0x3de   : > { %3839 = vmatpush.msra.mxu2 %v3213_v46  ;;  %v6605_v46 = vld [vmem:[#allocation3 + $0x568] sm:$0xff] }
 0x3e0   : > { %v6571_v32 = vpop.f32.mrf.mxu3  ;;  %3411 = vmatmul.f32.gmra.mxu2 %v4552_v50  ;;  %v6589_v17 = vpop.f32.mrf.mxu0 }
 0x3e1   : > { %7409 = vst [vmem:[#allocation44_spill] sm:$0xff] %v6589_v17  ;;  %v6623_v17 = vld [vmem:[#allocation3 + $0x5b0] sm:$0xff] }
 0x3e4   : > { %v2481_v36 = vld [vmem:[#allocation2 + $0x188] sm:$0xff] }
 0x3e5   : > { %3563 = vmatmul.f32.gmra.mxu3 %v6575_v61  ;;  %3718 = vmatmul.f32.gmra.mxu0 %v2481_v36  ;;  %v6591_v36 = vpop.f32.mrf.mxu2 }
 0x3e6   : > { %4190 = vmatmul.f32.vlgmr.msra.gmra.mxu1 %v6279_v4  ;;  %7410 = vst [vmem:[#allocation45_spill] sm:$0xff] %v6591_v36  ;;  %v6597_v4 = vpop.f32.mrf.mxu1  ;;  %v4558_v36 = vld [vmem:[#allocation3 + $0x200] sm:$0xff] }
 0x3e7   : > { %7411 = vst [vmem:[#allocation46_spill] sm:$0xff] %v6597_v4 }
 0x3e8   : > { %v6584_v28 = vpop.f32.mrf.mxu3  ;;  %3414 = vmatmul.f32.gmra.mxu2 %v4554_v48  ;;  %v6601_v53 = vpop.f32.mrf.mxu0 }
 0x3e9   : > { %7412 = vst [vmem:[#allocation47_spill] sm:$0xff] %v6601_v53 }
 0x3ed   : > { %3566 = vmatmul.f32.gmra.mxu3 %v6593_v41  ;;  %4077 = vmatmul.f32.vlgmr.msra.gmra.mxu0 %v4552_v50  ;;  %v6603_v57 = vpop.f32.mrf.mxu2  ;;  %v3228_v50 = vld [vmem:[%s7364_s3 + $0x350] sm:$0xff] }
 0x3ee   : > { %4193 = vmatmul.f32.gmra.mxu1 %v6286_v29  ;;  %7413 = vst [vmem:[#allocation48_spill] sm:$0xff] %v6603_v57  ;;  %3953 = vmatpush.msra.mxu3 %v3228_v50  ;;  %v3212_v57 = vld [vmem:[%s7364_s3 + $0x2d0] sm:$0xff]  ;;  %v6617_v4 = vpop.f32.mrf.mxu1  ;;  %v4560_v50 = vld [vmem:[#allocation3 + $0x248] sm:$0xff] }
 0x3ef   : > { %3840 = vmatpush.msra.mxu2 %v3212_v57  ;;  %7415 = vst [vmem:[#allocation50_spill] sm:$0xff] %v6617_v4  ;;  %v6633_v4 = vld [vmem:[#allocation3 + $0x5f8] sm:$0xff] }
 0x3f0   : > { %v6599_v52 = vpop.f32.mrf.mxu3  ;;  %3417 = vmatmul.f32.gmra.mxu2 %v4556_v43 }
 0x3f5   : > { %3569 = vmatmul.f32.gmra.mxu3 %v6605_v46  ;;  %4080 = vmatmul.f32.gmra.mxu0 %v4554_v48  ;;  %v6619_v53 = vpop.f32.mrf.mxu2  ;;  %v6621_v48 = vpop.f32.mrf.mxu0 }
 0x3f6   : > { %4196 = vmatmul.f32.gmra.mxu1 %v6294_v1  ;;  %7416 = vst [vmem:[#allocation51_spill] sm:$0xff] %v6619_v53  ;;  %v6631_v57 = vpop.f32.mrf.mxu1  ;;  %v3227_v53 = vld [vmem:[%s7364_s3 + $0x348] sm:$0xff] }
 0x3f7   : > { %7417 = vst [vmem:[#allocation52_spill] sm:$0xff] %v6621_v48  ;;  %3954 = vmatpush.msra.mxu3 %v3227_v53  ;;  %v4562_v48 = vld [vmem:[#allocation3 + $0x290] sm:$0xff] }
 0x3f8   : > { %v6612_v29 = vpop.f32.mrf.mxu3  ;;  %3420 = vmatmul.f32.gmra.mxu2 %v4558_v36  ;;  %7419 = vst [vmem:[#allocation54_spill] sm:$0xff] %v6631_v57 }
 0x3f9   : > { %7414 = vst [vmem:[#allocation49_spill] sm:$0xff] %v6612_v29 }
 0x3fd   : > { %3572 = vmatmul.f32.gmra.mxu3 %v6623_v17  ;;  %4083 = vmatmul.f32.gmra.mxu0 %v4556_v43  ;;  %v6629_v29 = vpop.f32.mrf.mxu2 }
 0x3fe   : > { %4199 = vmatmul.f32.gmra.mxu1 %v6308_v49  ;;  %7418 = vst [vmem:[#allocation53_spill] sm:$0xff] %v6629_v29  ;;  %v6640_v49 = vpop.f32.mrf.mxu0  ;;  %v3211_v29 = vld [vmem:[%s7364_s3 + $0x2c8] sm:$0xff] }
 0x3ff   : > { %7420 = vst [vmem:[#allocation55_spill] sm:$0xff] %v6640_v49  ;;  %3841 = vmatpush.msra.mxu2 %v3211_v29 }
 0x400   : > { %v6627_v1 = vpop.f32.mrf.mxu3  ;;  %3423 = vmatmul.f32.gmra.mxu2 %v4560_v50 }
 0x405   : > { %3575 = vmatmul.f32.gmra.mxu3 %v6633_v4  ;;  %4086 = vmatmul.f32.gmra.mxu0 %v4558_v36  ;;  %v6647_v57 = vpop.f32.mrf.mxu2  ;;  %v6650_v36 = vpop.f32.mrf.mxu1 }
 0x406   : > { %4202 = vmatmul.f32.gmra.mxu1 %v6317_v7  ;;  %7422 = vst [vmem:[#allocation57_spill] sm:$0xff] %v6647_v57  ;;  %v4563_v7 = vld [vmem:[#allocation3 + $0x2d8] sm:$0xff]  ;;  %v6655_v49 = vpop.f32.mrf.mxu0 }
 0x407   : > { %7423 = vst [vmem:[#allocation58_spill] sm:$0xff] %v6650_v36 }
 0x408   : > { %v6642_v43 = vpop.f32.mrf.mxu3  ;;  %3426 = vmatmul.f32.gmra.mxu2 %v4562_v48  ;;  %7424 = vst [vmem:[#allocation59_spill] sm:$0xff] %v6655_v49  ;;  %v6759_v49 = vld [vmem:[#allocation2 + $0x189] sm:$0xff] }
 0x409   : > { %7421 = vst [vmem:[#allocation56_spill] sm:$0xff] %v6642_v43 }
 0x40d   : > { %3578 = vmatmul.f32.gmra.mxu3 %v6127_v8  ;;  %4089 = vmatmul.f32.gmra.mxu0 %v4560_v50  ;;  %v6657_v43 = vpop.f32.mrf.mxu2  ;;  %v3226_v8 = vld [vmem:[%s7364_s3 + $0x340] sm:$0xff]  ;;  %v6664_v29 = vpop.f32.mrf.mxu1  ;;  %v4564_v50 = vld [vmem:[#allocation3 + $0x320] sm:$0xff] }
 0x40e   : > { %4205 = vmatmul.f32.gmra.mxu1 %v6327_v11  ;;  %7425 = vst [vmem:[#allocation60_spill] sm:$0xff] %v6657_v43  ;;  %3955 = vmatpush.msra.mxu3 %v3226_v8  ;;  %v3210_v43 = vld [vmem:[%s7364_s3 + $0x2c0] sm:$0xff]  ;;  %v4565_v8 = vld [vmem:[#allocation3 + $0x368] sm:$0xff] }
 0x40f   : > { %7426 = vst [vmem:[#allocation61_spill] sm:$0xff] %v6664_v29  ;;  %3842 = vmatpush.msra.mxu2 %v3210_v43  ;;  %v4566_v43 = vld [vmem:[#allocation3 + $0x3b0] sm:$0xff] }
 0x410   : > { %v6653_v53 = vpop.f32.mrf.mxu3  ;;  %3429 = vmatmul.f32.gmra.mxu2 %v4563_v7 }
 0x415   : > { %3581 = vmatmul.f32.gmra.mxu3 %v6129_v63  ;;  %4092 = vmatmul.f32.gmra.mxu0 %v4562_v48  ;;  %v6671_v63 = vpop.f32.mrf.mxu0  ;;  %v6673_v48 = vpop.f32.mrf.mxu2 }
 0x416   : > { %4208 = vmatmul.f32.gmra.mxu1 %v6350_v38  ;;  %7427 = vst [vmem:[#allocation62_spill] sm:$0xff] %v6671_v63  ;;  %v6679_v57 = vpop.f32.mrf.mxu1  ;;  %v4568_v63 = vld [vmem:[#allocation3 + $0x440] sm:$0xff] }
 0x417   : > { %7428 = vst [vmem:[#allocation63_spill] sm:$0xff] %v6673_v48  ;;  %v3224_v48 = vld [vmem:[%s7364_s3 + $0x330] sm:$0xff] }
 0x418   : > { %v6666_v11 = vpop.f32.mrf.mxu3  ;;  %3432 = vmatmul.f32.gmra.mxu2 %v4564_v50  ;;  %7429 = vst [vmem:[#allocation64_spill] sm:$0xff] %v6679_v57  ;;  %v3221_v57 = vld [vmem:[%s7364_s3 + $0x318] sm:$0xff] }
 0x41d   : > { %3584 = vmatmul.f32.gmra.mxu3 %v6200_v55  ;;  %4095 = vmatmul.f32.gmra.mxu0 %v4563_v7  ;;  %v6681_v29 = vpop.f32.mrf.mxu2  ;;  %v6683_v36 = vpop.f32.mrf.mxu0  ;;  %v3225_v55 = vld [vmem:[%s7364_s3 + $0x338] sm:$0xff] }
 0x41e   : > { %4211 = vmatmul.f32.gmra.mxu1 %v6384_v12  ;;  %7430 = vst [vmem:[#allocation65_spill] sm:$0xff] %v6681_v29  ;;  %3956 = vmatpush.msra.mxu3 %v3225_v55  ;;  %v3209_v7 = vld [vmem:[%s7364_s3 + $0x2b8] sm:$0xff]  ;;  %v4567_v55 = vld [vmem:[#allocation3 + $0x3f8] sm:$0xff] }
 0x41f   : > { %7431 = vst [vmem:[#allocation66_spill] sm:$0xff] %v6683_v36  ;;  %3843 = vmatpush.msra.mxu2 %v3209_v7  ;;  %v3223_v7 = vld [vmem:[%s7364_s3 + $0x328] sm:$0xff] }
 0x420   : > { %v6677_v38 = vpop.f32.mrf.mxu3  ;;  %3435 = vmatmul.f32.gmra.mxu2 %v4565_v8  ;;  %3957 = vmatpush.msra.mxu3 %v3224_v48 }
 0x422   : > { %3958 = vmatpush.msra.mxu3 %v3223_v7  ;;  %v6731_v7 = vld [vmem:[#allocation2 + $0x188] sm:$0xff] }
 0x425   : > { %3587 = vmatmul.f32.gmra.mxu3 %v6205_v26  ;;  %4098 = vmatmul.f32.gmra.mxu0 %v4564_v50  ;;  %v6695_v29 = vpop.f32.mrf.mxu2  ;;  %v6697_v26 = vpop.f32.mrf.mxu1 }
 0x426   : > { %4214 = vmatmul.f32.gmra.mxu1 %v6428_v25  ;;  %7432 = vst [vmem:[#allocation67_spill] sm:$0xff] %v6695_v29  ;;  %v6701_v25 = vpop.f32.mrf.mxu0  ;;  %v6711_v29 = vld [vmem:[#allocation2 + $0x181] sm:$0xff] }
 0x427   : > { %7433 = vst [vmem:[#allocation68_spill] sm:$0xff] %v6697_v26  ;;  %v3222_v26 = vld [vmem:[%s7364_s3 + $0x320] sm:$0xff] }
 0x428   : > { %v6690_v12 = vpop.f32.mrf.mxu3  ;;  %3438 = vmatmul.f32.gmra.mxu2 %v4566_v43  ;;  %7434 = vst [vmem:[#allocation69_spill] sm:$0xff] %v6701_v25  ;;  %3959 = vmatpush.msra.mxu3 %v3222_v26 }
 0x42a   : > { %3960 = vmatpush.msra.mxu3 %v3221_v57  ;;  %v3218_v57 = vld [vmem:[%s7364_s3 + $0x300] sm:$0xff] }
 0x42d   : > { %3590 = vmatmul.f32.gmra.mxu3 %v6250_v40  ;;  %4101 = vmatmul.f32.gmra.mxu0 %v4565_v8  ;;  %v6713_v8 = vld [vmem:[#allocation2 + $0x182] sm:$0xff]  ;;  %v6724_v25 = vpop.f32.mrf.mxu1 }
 0x42e   : > { %4217 = vmatmul.f32.gmra.mxu1 %v6476_v58  ;;  %7435 = vst [vmem:[#allocation70_spill] sm:$0xff] %v6713_v8  ;;  %v6715_v58 = vpop.f32.mrf.mxu2  ;;  %v6727_v48 = vpop.f32.mrf.mxu0 }
 0x42f   : > { %7436 = vst [vmem:[#allocation71_spill] sm:$0xff] %v6715_v58  ;;  %v6729_v58 = vld [vmem:[#allocation2 + $0x180] sm:$0xff] }
 0x430   : > { %v6703_v50 = vpop.f32.mrf.mxu3  ;;  %3441 = vmatmul.f32.gmra.mxu2 %v4567_v55  ;;  %7437 = vst [vmem:[#allocation72_spill] sm:$0xff] %v6724_v25 }
 0x431   : > { %7438 = vst [vmem:[#allocation73_spill] sm:$0xff] %v6727_v48  ;;  %v4569_v48 = vld [vmem:[#allocation3 + $0x488] sm:$0xff] }
 0x435   : > { %3593 = vmatmul.f32.gmra.mxu3 %v6252_v39  ;;  %4104 = vmatmul.f32.gmra.mxu0 %v4566_v43  ;;  %v3220_v39 = vld [vmem:[%s7364_s3 + $0x310] sm:$0xff]  ;;  %v3219_v43 = vld [vmem:[%s7364_s3 + $0x308] sm:$0xff] }
 0x436   : > { %4220 = vmatmul.f32.gmra.mxu1 %v6522_v47  ;;  %v3208_v47 = vld [vmem:[%s7364_s3 + $0x2b0] sm:$0xff]  ;;  %3961 = vmatpush.msra.mxu3 %v3220_v39  ;;  %v6751_v25 = vpop.f32.mrf.mxu0 }
 0x437   : > { %3844 = vmatpush.msra.mxu2 %v3208_v47  ;;  %7439 = vst [vmem:[#allocation74_spill] sm:$0xff] %v6751_v25  ;;  %v6754_v47 = vpop.f32.mrf.mxu1  ;;  %v4591_v25 = vld [vmem:[#allocation3 + $0x228] sm:$0xff] }
 0x438   : > { %v6733_v36 = vpop.f32.mrf.mxu3  ;;  %3444 = vmatmul.f32.gmra.mxu2 %v4568_v63  ;;  %3962 = vmatpush.msra.mxu3 %v3219_v43  ;;  %7440 = vst [vmem:[#allocation75_spill] sm:$0xff] %v6754_v47  ;;  %v6761_v43 = vld [vmem:[#allocation2 + $0x18a] sm:$0xff] }
 0x439   : > { %7441 = vst [vmem:[#allocation76_spill] sm:$0xff] %v6761_v43  ;;  %v3207_v47 = vld [vmem:[%s7364_s3 + $0x2a8] sm:$0xff] }
 0x43a   : > { %3963 = vmatpush.msra.mxu3 %v3218_v57  ;;  %v4570_v57 = vld [vmem:[#allocation3 + $0x4d0] sm:$0xff]  ;;  %3845 = vmatpush.msra.mxu2 %v3207_v47  ;;  %v4574_v47 = vld [vmem:[#allocation3 + $0x5a8] sm:$0xff] }
 0x43b   : > { %v6744_v26 = vpop.f32.mrf.mxu2 }
 0x43c   : > { %4473 = vmatpush.msrb.mxu3 %v6346_v24 }
 0x43d   : > { %3596 = vmatmul.f32.gmra.mxu3 %v6297_v35  ;;  %4107 = vmatmul.f32.gmra.mxu0 %v4567_v55 }
 0x43e   : > { %4223 = vmatmul.f32.gmra.mxu1 %v6550_v33  ;;  %4474 = vmatpush.msrb.mxu3 %v6362_v62  ;;  %v6769_v33 = vpop.f32.mrf.mxu0 }
 0x43f   : > { %7442 = vst [vmem:[#allocation77_spill] sm:$0xff] %v6769_v33  ;;  %v6771_v24 = vpop.f32.mrf.mxu1 }
 0x440   : > { %v6756_v39 = vpop.f32.mrf.mxu3  ;;  %3447 = vmatmul.f32.gmra.mxu2 %v4569_v48  ;;  %4475 = vmatpush.msrb.mxu3 %v6368_v59  ;;  %7443 = vst [vmem:[#allocation78_spill] sm:$0xff] %v6771_v24 }
 0x442   : > { %4476 = vmatpush.msrb.mxu3 %v6374_v2 }
 0x443   : > { %v6763_v55 = vpop.f32.mrf.mxu2 }
 0x444   : > { %4477 = vmatpush.msrb.mxu3 %v6382_v31  ;;  %v4571_v31 = vld [vmem:[#allocation3 + $0x518] sm:$0xff] }
 0x445   : > { %3599 = vmatmul.f32.gmra.mxu3 %v6301_v30  ;;  %4110 = vmatmul.f32.gmra.mxu0 %v4568_v63 }
 0x446   : > { %4226 = vmatmul.f32.gmra.mxu1 %v6566_v23  ;;  %4478 = vmatpush.msrb.mxu3 %v6397_v44  ;;  %v6786_v2 = vpop.f32.mrf.mxu0 }
 0x447   : > { %7444 = vst [vmem:[#allocation79_spill] sm:$0xff] %v6786_v2  ;;  %v6788_v23 = vpop.f32.mrf.mxu1  ;;  %v4588_v2 = vld [vmem:[#allocation3 + $0x1e0] sm:$0xff] }
 0x448   : > { %v6773_v62 = vpop.f32.mrf.mxu3  ;;  %3450 = vmatmul.f32.gmra.mxu2 %v4570_v57  ;;  %4479 = vmatpush.msrb.mxu3 %v6417_v60  ;;  %7445 = vst [vmem:[#allocation80_spill] sm:$0xff] %v6788_v23 }
 0x44a   : > { %4480 = vmatpush.msrb.mxu3 %v6426_v34 }
 0x44b   : > { %v6780_v59 = vpop.f32.mrf.mxu2 }
 0x44c   : > { %4481 = vmatpush.msrb.mxu3 %v6445_v10  ;;  %v4572_v10 = vld [vmem:[#allocation3 + $0x560] sm:$0xff] }
 0x44d   : > { %3602 = vmatmul.f32.gmra.mxu3 %v6402_v0  ;;  %4113 = vmatmul.f32.gmra.mxu0 %v4569_v48 }
 0x44e   : > { %4229 = vmatmul.f32.gmra.mxu1 %v6575_v61  ;;  %4482 = vmatpush.msrb.mxu3 %v6457_v51  ;;  %v6800_v44 = vpop.f32.mrf.mxu0  ;;  %v3206_v51 = vld [vmem:[%s7364_s3 + $0x2a0] sm:$0xff] }
 0x44f   : > { %7447 = vst [vmem:[#allocation82_spill] sm:$0xff] %v6800_v44  ;;  %v6802_v34 = vpop.f32.mrf.mxu1  ;;  %3846 = vmatpush.msra.mxu2 %v3206_v51  ;;  %v4585_v44 = vld [vmem:[#allocation3 + $0x198] sm:$0xff] }
 0x450   : > { %v6790_v63 = vpop.f32.mrf.mxu3  ;;  %3453 = vmatmul.f32.gmra.mxu2 %v4571_v31  ;;  %4483 = vmatpush.msrb.mxu3 %v6466_v13  ;;  %7448 = vst [vmem:[#allocation83_spill] sm:$0xff] %v6802_v34  ;;  %v4580_v34 = vld [vmem:[#allocation3 + $0x640] sm:$0xff] }
 0x451   : > { %7446 = vst [vmem:[#allocation81_spill] sm:$0xff] %v6790_v63 }
 0x452   : > { %4484 = vmatpush.msrb.mxu3 %v6474_v56  ;;  %v4573_v56 = vld [vmem:[#allocation3 + $0x30] sm:$0xff] }
 0x453   : > { %v6794_v60 = vpop.f32.mrf.mxu2 }
 0x454   : > { %4485 = vmatpush.msrb.mxu3 %v6489_v42 }
 0x455   : > { %3605 = vmatmul.f32.gmra.mxu3 %v6407_v20  ;;  %4116 = vmatmul.f32.gmra.mxu0 %v4570_v57  ;;  %v4575_v57 = vld [vmem:[#allocation3 + $0x78] sm:$0xff] }
 0x456   : > { %4232 = vmatmul.f32.gmra.mxu1 %v6593_v41  ;;  %4486 = vmatpush.msrb.mxu3 %v6506_v45  ;;  %v6816_v41 = vpop.f32.mrf.mxu0 }
 0x457   : > { %7450 = vst [vmem:[#allocation85_spill] sm:$0xff] %v6816_v41  ;;  %v6818_v48 = vpop.f32.mrf.mxu1 }
 0x458   : > { %v6804_v61 = vpop.f32.mrf.mxu3  ;;  %3456 = vmatmul.f32.gmra.mxu2 %v4572_v10  ;;  %4487 = vmatpush.msrb.mxu3 %v6519_v22  ;;  %7451 = vst [vmem:[#allocation86_spill] sm:$0xff] %v6818_v48  ;;  %v4577_v48 = vld [vmem:[#allocation3 + $0xc0] sm:$0xff] }
 0x459   : > { %7449 = vst [vmem:[#allocation84_spill] sm:$0xff] %v6804_v61  ;;  %v4621_v61 = vld [vmem:[#allocation3 + $0x340] sm:$0xff] }
 0x45a   : > { %4488 = vmatpush.msrb.mxu3 %v6531_v9  ;;  %v4576_v9 = vld [vmem:[#allocation3 + $0x5f0] sm:$0xff] }
 0x45b   : > { %v6811_v13 = vpop.f32.mrf.mxu2 }
 0x45d   : > { %3964 = vmatmul.f32.vlgmr.msra.gmra.mxu3 %v4573_v56  ;;  %4119 = vmatmul.f32.gmra.mxu0 %v4571_v31  ;;  %v3205_v31 = vld [vmem:[%s7364_s3 + $0x298] sm:$0xff] }
 0x45e   : > { %4235 = vmatmul.f32.gmra.mxu1 %v6605_v46  ;;  %v6825_v22 = vpop.f32.mrf.mxu0  ;;  %3847 = vmatpush.msra.mxu2 %v3205_v31  ;;  %v4579_v31 = vld [vmem:[#allocation3 + $0x108] sm:$0xff] }
 0x45f   : > { %7453 = vst [vmem:[#allocation88_spill] sm:$0xff] %v6825_v22  ;;  %v6827_v46 = vpop.f32.mrf.mxu1 }
 0x460   : > { %3459 = vmatmul.f32.gmra.mxu2 %v4574_v47  ;;  %v6820_v42 = vpop.f32.mrf.mxu3  ;;  %7454 = vst [vmem:[#allocation89_spill] sm:$0xff] %v6827_v46 }
 0x461   : > { %7452 = vst [vmem:[#allocation87_spill] sm:$0xff] %v6820_v42  ;;  %v4606_v42 = vld [vmem:[#allocation3 + $0x4b0] sm:$0xff] }
 0x463   : > { %v6822_v45 = vpop.f32.mrf.mxu2 }
 0x465   : > { %3967 = vmatmul.f32.gmra.mxu3 %v4575_v57  ;;  %4122 = vmatmul.f32.gmra.mxu0 %v4572_v10  ;;  %v4578_v57 = vld [vmem:[#allocation3 + $0x638] sm:$0xff] }
 0x466   : > { %4238 = vmatmul.f32.gmra.mxu1 %v6623_v17  ;;  %v6837_v17 = vpop.f32.mrf.mxu0 }
 0x467   : > { %7456 = vst [vmem:[#allocation91_spill] sm:$0xff] %v6837_v17  ;;  %v6839_v10 = vpop.f32.mrf.mxu1  ;;  %v4582_v17 = vld [vmem:[#allocation3 + $0x150] sm:$0xff] }
 0x468   : > { %3462 = vmatmul.f32.gmra.mxu2 %v4576_v9  ;;  %v6832_v51 = vpop.f32.mrf.mxu3  ;;  %7457 = vst [vmem:[#allocation92_spill] sm:$0xff] %v6839_v10 }
 0x469   : > { %7455 = vst [vmem:[#allocation90_spill] sm:$0xff] %v6832_v51 }
 0x46b   : > { %v6834_v56 = vpop.f32.mrf.mxu2 }
 0x46d   : > { %3970 = vmatmul.f32.gmra.mxu3 %v4577_v48  ;;  %4125 = vmatmul.f32.gmra.mxu0 %v4574_v47  ;;  %v3204_v47 = vld [vmem:[%s7364_s3 + $0x290] sm:$0xff] }
 0x46e   : > { %4241 = vmatmul.f32.gmra.mxu1 %v6633_v4  ;;  %v6845_v41 = vpop.f32.mrf.mxu0  ;;  %v4581_v4 = vld [vmem:[#allocation3 + $0x680] sm:$0xff]  ;;  %3848 = vmatpush.msra.mxu2 %v3204_v47  ;;  %v4586_v47 = vld [vmem:[#allocation3 + $0x6d0] sm:$0xff] }
 0x46f   : > { %7459 = vst [vmem:[#allocation94_spill] sm:$0xff] %v6845_v41  ;;  %v6847_v48 = vpop.f32.mrf.mxu1 }
 0x470   : > { %3465 = vmatmul.f32.gmra.mxu2 %v4578_v57  ;;  %v6843_v22 = vpop.f32.mrf.mxu3  ;;  %7460 = vst [vmem:[#allocation95_spill] sm:$0xff] %v6847_v48  ;;  %v4584_v48 = vld [vmem:[#allocation3 + $0x6c8] sm:$0xff] }
 0x471   : > { %7458 = vst [vmem:[#allocation93_spill] sm:$0xff] %v6843_v22  ;;  %v4600_v22 = vld [vmem:[#allocation3 + $0x3d8] sm:$0xff] }
 0x473   : > { %v6841_v46 = vpop.f32.mrf.mxu2 }
 0x475   : > { %3973 = vmatmul.f32.gmra.mxu3 %v4579_v31  ;;  %4128 = vmatmul.f32.gmra.mxu0 %v4576_v9  ;;  %v4583_v31 = vld [vmem:[#allocation3 + $0x688] sm:$0xff] }
 0x476   : > { %4244 = vmatmul.f32.gmra.mxu1 %v4580_v34  ;;  %v6854_v9 = vpop.f32.mrf.mxu0 }
 0x477   : > { %7461 = vst [vmem:[#allocation96_spill] sm:$0xff] %v6854_v9  ;;  %v6858_v41 = vpop.f32.mrf.mxu1 }
 0x478   : > { %3468 = vmatmul.f32.gmra.mxu2 %v4581_v4  ;;  %v6856_v34 = vpop.f32.mrf.mxu3  ;;  %7463 = vst [vmem:[#allocation98_spill] sm:$0xff] %v6858_v41 }
 0x479   : > { %7462 = vst [vmem:[#allocation97_spill] sm:$0xff] %v6856_v34 }
 0x47b   : > { %v6852_v10 = vpop.f32.mrf.mxu2 }
 0x47d   : > { %3976 = vmatmul.f32.gmra.mxu3 %v4582_v17  ;;  %4131 = vmatmul.f32.gmra.mxu0 %v4578_v57  ;;  %v4587_v57 = vld [vmem:[#allocation3 + $0x710] sm:$0xff] }
 0x47e   : > { %4247 = vmatmul.f32.gmra.mxu1 %v4583_v31  ;;  %v6862_v24 = vpop.f32.mrf.mxu0  ;;  %v3203_v31 = vld [vmem:[%s7364_s3 + $0x288] sm:$0xff] }
 0x47f   : > { %7464 = vst [vmem:[#allocation99_spill] sm:$0xff] %v6862_v24  ;;  %v6864_v17 = vpop.f32.mrf.mxu1  ;;  %3849 = vmatpush.msra.mxu2 %v3203_v31 }
 0x480   : > { %3471 = vmatmul.f32.gmra.mxu2 %v4584_v48  ;;  %7465 = vst [vmem:[#allocation100_spill] sm:$0xff] %v6864_v17  ;;  %v6869_v41 = vpop.f32.mrf.mxu3 }
 0x481   : > { %7466 = vst [vmem:[#allocation101_spill] sm:$0xff] %v6869_v41  ;;  %v4598_v41 = vld [vmem:[#allocation3 + $0x390] sm:$0xff] }
 0x483   : > { %v6860_v23 = vpop.f32.mrf.mxu2 }
 0x485   : > { %3979 = vmatmul.f32.gmra.mxu3 %v4585_v44  ;;  %4134 = vmatmul.f32.gmra.mxu0 %v4581_v4  ;;  %v4589_v44 = vld [vmem:[#allocation3 + $0x718] sm:$0xff] }
 0x486   : > { %4250 = vmatmul.f32.gmra.mxu1 %v4586_v47  ;;  %v6873_v4 = vpop.f32.mrf.mxu0  ;;  %v4590_v47 = vld [vmem:[#allocation3 + $0x758] sm:$0xff] }
 0x487   : > { %7467 = vst [vmem:[#allocation102_spill] sm:$0xff] %v6873_v4  ;;  %v6875_v17 = vpop.f32.mrf.mxu1  ;;  %v4592_v4 = vld [vmem:[#allocation3 + $0x270] sm:$0xff] }
 0x488   : > { %3474 = vmatmul.f32.gmra.mxu2 %v4587_v57  ;;  %7468 = vst [vmem:[#allocation103_spill] sm:$0xff] %v6875_v17  ;;  %v6877_v24 = vpop.f32.mrf.mxu3 }
 0x489   : > { %7469 = vst [vmem:[#allocation104_spill] sm:$0xff] %v6877_v24 }
 0x48b   : > { %v6871_v9 = vpop.f32.mrf.mxu2 }
 0x48d   : > { %3982 = vmatmul.f32.gmra.mxu3 %v4588_v2  ;;  %4137 = vmatmul.f32.gmra.mxu0 %v4584_v48  ;;  %v3202_v2 = vld [vmem:[%s7364_s3 + $0x280] sm:$0xff] }
 0x48e   : > { %4253 = vmatmul.f32.gmra.mxu1 %v4589_v44  ;;  %v6886_v48 = vpop.f32.mrf.mxu0  ;;  %3850 = vmatpush.msra.mxu2 %v3202_v2  ;;  %v4595_v2 = vld [vmem:[#allocation3 + $0x7a0] sm:$0xff] }
 0x48f   : > { %7470 = vst [vmem:[#allocation105_spill] sm:$0xff] %v6886_v48  ;;  %v6890_v44 = vpop.f32.mrf.mxu1 }
 0x490   : > { %3477 = vmatmul.f32.gmra.mxu2 %v4590_v47  ;;  %v6892_v17 = vpop.f32.mrf.mxu3 }
 0x491   : > { %7471 = vst [vmem:[#allocation106_spill] sm:$0xff] %v6892_v17 }
 0x493   : > { %v6879_v33 = vpop.f32.mrf.mxu2 }
 0x495   : > { %3985 = vmatmul.f32.gmra.mxu3 %v4591_v25  ;;  %4140 = vmatmul.f32.gmra.mxu0 %v4587_v57  ;;  %v4593_v25 = vld [vmem:[#allocation3 + $0x7a8] sm:$0xff]  ;;  %v4594_v57 = vld [vmem:[#allocation3 + $0x2b8] sm:$0xff] }
 0x496   : > { %4256 = vmatmul.f32.gmra.mxu1 %v6250_v40  ;;  %v6895_v40 = vpop.f32.mrf.mxu0 }
 0x497   : > { %v6899_v48 = vpop.f32.mrf.mxu1 }
 0x498   : > { %3480 = vmatmul.f32.gmra.mxu2 %v6262_v16  ;;  %v6902_v17 = vpop.f32.mrf.mxu3 }
 0x499   : > { %7472 = vst [vmem:[#allocation107_spill] sm:$0xff] %v6902_v17  ;;  %v4597_v17 = vld [vmem:[#allocation3 + $0x348] sm:$0xff] }
 0x49b   : > { %v6888_v31 = vpop.f32.mrf.mxu2 }
 0x49d   : > { %3988 = vmatmul.f32.gmra.mxu3 %v4592_v4  ;;  %4143 = vmatmul.f32.gmra.mxu0 %v4590_v47 }
 0x49e   : > { %4259 = vmatmul.f32.gmra.mxu1 %v4593_v25  ;;  %v6907_v47 = vpop.f32.mrf.mxu0  ;;  %v4596_v25 = vld [vmem:[#allocation3 + $0x300] sm:$0xff] }
 0x4a0   : > { %3483 = vmatmul.f32.gmra.mxu2 %v6275_v5 }
 0x4a3   : > { %v6897_v16 = vpop.f32.mrf.mxu2 }
 0x4a5   : > { %3991 = vmatmul.f32.gmra.mxu3 %v4594_v57  ;;  %4146 = vmatmul.f32.gmra.mxu0 %v4595_v2  ;;  %v6911_v57 = vpop.f32.mrf.mxu1  ;;  %v6914_v2 = vpop.f32.mrf.mxu3 }
 0x4a6   : > { %4262 = vmatmul.f32.gmra.mxu1 %v6297_v35  ;;  %7473 = vst [vmem:[#allocation108_spill] sm:$0xff] %v6914_v2  ;;  %v6920_v24 = vpop.f32.mrf.mxu0 }
 0x4a8   : > { %3486 = vmatmul.f32.gmra.mxu2 %v6303_v37 }
 0x4ab   : > { %v6905_v4 = vpop.f32.mrf.mxu2 }
 0x4ad   : > { %3994 = vmatmul.f32.gmra.mxu3 %v4596_v25  ;;  %4149 = vmatmul.f32.gmra.mxu0 %v6275_v5  ;;  %v6923_v5 = vpop.f32.mrf.mxu1 }
 0x4ae   : > { %4265 = vmatmul.f32.gmra.mxu1 %v6301_v30  ;;  %v6925_v30 = vpop.f32.mrf.mxu3 }
 0x4af   : > { %7474 = vst [vmem:[#allocation109_spill] sm:$0xff] %v6925_v30 }
 0x4b0   : > { %3489 = vmatmul.f32.gmra.mxu2 %v6336_v27 }
 0x4b3   : > { %v6916_v35 = vpop.f32.mrf.mxu2 }
 0x4b5   : > { %3997 = vmatmul.f32.gmra.mxu3 %v4597_v17  ;;  %4152 = vmatmul.f32.gmra.mxu0 %v6303_v37  ;;  %v4599_v17 = vld [vmem:[#allocation3 + $0x28] sm:$0xff]  ;;  %v6931_v37 = vpop.f32.mrf.mxu0  ;;  %v6935_v2 = vpop.f32.mrf.mxu1 }
 0x4b6   : > { %4268 = vmatmul.f32.gmra.mxu1 %v6402_v0  ;;  %v6937_v34 = vpop.f32.mrf.mxu3 }
 0x4b7   : > { %7477 = vst [vmem:[#allocation112_spill] sm:$0xff] %v6937_v34 }
 0x4b8   : > { %3492 = vmatmul.f32.gmra.mxu2 %v6409_v14 }
 0x4bb   : > { %v6927_v25 = vpop.f32.mrf.mxu2 }
 0x4bc   : > { %7475 = vst [vmem:[#allocation110_spill] sm:$0xff] %v6927_v25 }
 0x4bd   : > { %4000 = vmatmul.f32.gmra.mxu3 %v4598_v41  ;;  %4155 = vmatmul.f32.gmra.mxu0 %v6336_v27  ;;  %v4601_v41 = vld [vmem:[#allocation3 + $0x70] sm:$0xff]  ;;  %v6941_v27 = vpop.f32.mrf.mxu0  ;;  %v6946_v30 = vpop.f32.mrf.mxu1 }
 0x4be   : > { %4271 = vmatmul.f32.gmra.mxu1 %v6407_v20  ;;  %v6949_v34 = vpop.f32.mrf.mxu3 }
 0x4bf   : > { %7479 = vst [vmem:[#allocation114_spill] sm:$0xff] %v6949_v34 }
 0x4c0   : > { %3851 = vmatmul.f32.vlgmr.msra.gmra.mxu2 %v4599_v17  ;;  %v4602_v17 = vld [vmem:[#allocation3 + $0x420] sm:$0xff] }
 0x4c3   : > { %v6933_v0 = vpop.f32.mrf.mxu2 }
 0x4c4   : > { %7476 = vst [vmem:[#allocation111_spill] sm:$0xff] %v6933_v0  ;;  %v4609_v0 = vld [vmem:[#allocation3 + $0x190] sm:$0xff] }
 0x4c5   : > { %4003 = vmatmul.f32.gmra.mxu3 %v4600_v22  ;;  %4158 = vmatmul.f32.gmra.mxu0 %v6409_v14  ;;  %v4603_v22 = vld [vmem:[#allocation3 + $0xb8] sm:$0xff]  ;;  %v6953_v51 = vpop.f32.mrf.mxu0 }
 0x4c6   : > { %4274 = vmatmul.f32.gmra.mxu1 %v6713_v8  ;;  %v4623_v8 = vld [vmem:[#allocation3 + $0x388] sm:$0xff] }
 0x4c8   : > { %3854 = vmatmul.f32.gmra.mxu2 %v4601_v41  ;;  %v4604_v41 = vld [vmem:[#allocation3 + $0x468] sm:$0xff] }
 0x4cb   : > { %v6943_v20 = vpop.f32.mrf.mxu2 }
 0x4cc   : > { %7478 = vst [vmem:[#allocation113_spill] sm:$0xff] %v6943_v20  ;;  %v4605_v20 = vld [vmem:[#allocation3 + $0x100] sm:$0xff] }
 0x4cd   : > { %4006 = vmatmul.f32.gmra.mxu3 %v4602_v17  ;;  %4161 = vmatmul.f32.gmra.mxu0 %v6711_v29  ;;  %v6956_v17 = vpop.f32.mrf.mxu3 }
 0x4ce   : > { %4277 = vmatmul.f32.gmra.mxu1 %v6761_v43  ;;  %7481 = vst [vmem:[#allocation116_spill] sm:$0xff] %v6956_v17  ;;  %v4607_v43 = vld [vmem:[#allocation3 + $0x148] sm:$0xff]  ;;  %v4611_v17 = vld [vmem:[#allocation3 + $0x1d8] sm:$0xff] }
 0x4d0   : > { %3857 = vmatmul.f32.gmra.mxu2 %v4603_v22 }
 0x4d3   : > { %v6951_v14 = vpop.f32.mrf.mxu2 }
 0x4d4   : > { %7480 = vst [vmem:[#allocation115_spill] sm:$0xff] %v6951_v14  ;;  %v4608_v14 = vld [vmem:[#allocation3 + $0x4f8] sm:$0xff] }
 0x4d5   : > { %4009 = vmatmul.f32.gmra.mxu3 %v4604_v41  ;;  %4164 = vmatmul.f32.gmra.mxu0 %v6759_v49  ;;  %v6960_v34 = vpop.f32.mrf.mxu3 }
 0x4d6   : > { %7483 = vst [vmem:[#allocation118_spill] sm:$0xff] %v6960_v34  ;;  %v4613_v34 = vld [vmem:[#allocation3 + $0x220] sm:$0xff] }
 0x4d8   : > { %3860 = vmatmul.f32.gmra.mxu2 %v4605_v20  ;;  %v4610_v20 = vld [vmem:[#allocation3 + $0x540] sm:$0xff] }
 0x4db   : > { %v6958_v29 = vpop.f32.mrf.mxu2 }
 0x4dc   : > { %7482 = vst [vmem:[#allocation117_spill] sm:$0xff] %v6958_v29 }
 0x4dd   : > { %4012 = vmatmul.f32.gmra.mxu3 %v4606_v42  ;;  %v6966_v49 = vpop.f32.mrf.mxu3  ;;  %v4612_v42 = vld [vmem:[#allocation3 + $0x588] sm:$0xff] }
 0x4de   : > { %7486 = vst [vmem:[#allocation121_spill] sm:$0xff] %v6966_v49 }
 0x4e0   : > { %3863 = vmatmul.f32.gmra.mxu2 %v4607_v43 }
 0x4e3   : > { %v6962_v22 = vpop.f32.mrf.mxu2 }
 0x4e4   : > { %7484 = vst [vmem:[#allocation119_spill] sm:$0xff] %v6962_v22 }
 0x4e5   : > { %4015 = vmatmul.f32.gmra.mxu3 %v4608_v14  ;;  %v6970_v43 = vpop.f32.mrf.mxu3  ;;  %v4614_v14 = vld [vmem:[#allocation3 + $0x5d0] sm:$0xff] }
 0x4e6   : > { %7488 = vst [vmem:[#allocation123_spill] sm:$0xff] %v6970_v43  ;;  %v4618_v43 = vld [vmem:[#allocation3 + $0x660] sm:$0xff] }
 0x4e8   : > { %3866 = vmatmul.f32.gmra.mxu2 %v4609_v0  ;;  %v4615_v0 = vld [vmem:[#allocation3 + $0x268] sm:$0xff] }
 0x4eb   : > { %v6964_v41 = vpop.f32.mrf.mxu2 }
 0x4ec   : > { %7485 = vst [vmem:[#allocation120_spill] sm:$0xff] %v6964_v41 }
 0x4ed   : > { %4018 = vmatmul.f32.gmra.mxu3 %v4610_v20  ;;  %v3965_v41 = vpop.f32.mrf.mxu3  ;;  %v4616_v20 = vld [vmem:[#allocation3 + $0x618] sm:$0xff] }
 0x4f0   : > { %3869 = vmatmul.f32.gmra.mxu2 %v4611_v17  ;;  %v4617_v17 = vld [vmem:[#allocation3 + $0x2b0] sm:$0xff] }
 0x4f3   : > { %v6968_v29 = vpop.f32.mrf.mxu2 }
 0x4f4   : > { %7487 = vst [vmem:[#allocation122_spill] sm:$0xff] %v6968_v29 }
 0x4f5   : > { %4021 = vmatmul.f32.gmra.mxu3 %v4612_v42  ;;  %v6976_v29 = vpop.f32.mrf.mxu3 }
 0x4f8   : > { %3872 = vmatmul.f32.gmra.mxu2 %v4613_v34  ;;  %v4619_v34 = vld [vmem:[#allocation3 + $0x2f8] sm:$0xff] }
 0x4fb   : > { %v6972_v22 = vpop.f32.mrf.mxu2 }
 0x4fc   : > { %7489 = vst [vmem:[#allocation124_spill] sm:$0xff] %v6972_v22 }
 0x4fd   : > { %4024 = vmatmul.f32.gmra.mxu3 %v4614_v14  ;;  %v6982_v14 = vpop.f32.mrf.mxu3 }
 0x500   : > { %3875 = vmatmul.f32.gmra.mxu2 %v4615_v0  ;;  %v4620_v0 = vld [vmem:[#allocation3 + $0x6a8] sm:$0xff] }
 0x503   : > { %v6974_v49 = vpop.f32.mrf.mxu2 }
 0x504   : > { %7490 = vst [vmem:[#allocation125_spill] sm:$0xff] %v6974_v49 }
 0x505   : > { %4027 = vmatmul.f32.gmra.mxu3 %v4616_v20  ;;  %v4622_v20 = vld [vmem:[#allocation3 + $0x6f0] sm:$0xff] }
 0x508   : > { %3878 = vmatmul.f32.gmra.mxu2 %v4617_v17  ;;  %v6986_v17 = vpop.f32.mrf.mxu3 }
 0x50b   : > { %v6978_v42 = vpop.f32.mrf.mxu2 }
 0x50c   : > { %7491 = vst [vmem:[#allocation126_spill] sm:$0xff] %v6978_v42 }
 0x50d   : > { %4030 = vmatmul.f32.gmra.mxu3 %v4618_v43  ;;  %v4624_v43 = vld [vmem:[#allocation3 + $0x738] sm:$0xff] }
 0x510   : > { %3881 = vmatmul.f32.gmra.mxu2 %v4619_v34  ;;  %v4625_v34 = vld [vmem:[#allocation3 + $0x3d0] sm:$0xff] }
 0x513   : > { %v6980_v22 = vpop.f32.mrf.mxu2 }
 0x514   : > { %7492 = vst [vmem:[#allocation127_spill] sm:$0xff] %v6980_v22  ;;  %v6990_v22 = vpop.f32.mrf.mxu3 }
 0x515   : > { %4033 = vmatmul.f32.gmra.mxu3 %v4620_v0  ;;  %v6998_v0 = vld [vmem:[%s7365_s4] ss:$0 sm:$0xff] }
 0x518   : > { %3884 = vmatmul.f32.gmra.mxu2 %v4621_v61  ;;  %v4626_v61 = vld [vmem:[#allocation3 + $0x418] sm:$0xff] }
 0x51b   : > { %v6984_v49 = vpop.f32.mrf.mxu2 }
 0x51c   : > { %7493 = vst [vmem:[#allocation128_spill] sm:$0xff] %v6984_v49  ;;  %v3291_v49 = vadd.f32 %v6998_v0, %v5981_v15  ;;  %v3294_v15 = vadd.f32 %v6998_v0, %v6006_v21 }
 0x51d   : > { %4036 = vmatmul.f32.gmra.mxu3 %v4622_v20 }
 0x520   : > { %3887 = vmatmul.f32.gmra.mxu2 %v4623_v8  ;;  %v7000_v8 = vpop.f32.mrf.mxu3 }
 0x523   : > { %v6988_v42 = vpop.f32.mrf.mxu2 }
 0x524   : > { %7494 = vst [vmem:[#allocation129_spill] sm:$0xff] %v6988_v42 }
 0x525   : > { %4039 = vmatmul.f32.gmra.mxu3 %v4624_v43  ;;  %v3288_v43 = vadd.f32 %v6998_v0, %v5964_v54  ;;  %v3404_v54 = vadd.f32 %v6780_v59, %v3291_v49 }
 0x528   : > { %3890 = vmatmul.f32.gmra.mxu2 %v4625_v34  ;;  %v3401_v34 = vadd.f32 %v6763_v55, %v3288_v43  ;;  %v4628_v55 = vld [vmem:[#allocation3 + $0x4a8] sm:$0xff] }
 0x52b   : > { %v6992_v25 = vpop.f32.mrf.mxu2 }
 0x52c   : > { %7495 = vst [vmem:[#allocation130_spill] sm:$0xff] %v6992_v25  ;;  %v4627_v25 = vld [vmem:[#allocation3 + $0x460] sm:$0xff] }
 0x52d   : > { %4042 = vmatmul.f32.gmra.mxu3 %v6338_v18  ;;  %v3381_v18 = vadd.f32 %v6998_v0, %v6744_v26  ;;  %v3517_v26 = vadd.f32 %v6584_v28, %v3404_v54  ;;  %v7498_v54 = vld [vmem:[#allocation17_spill] sm:$0xff] }
 0x530   : > { %3893 = vmatmul.f32.gmra.mxu2 %v4626_v61  ;;  %v3514_v61 = vadd.f32 %v6571_v32, %v3401_v34 }
 0x533   : > { %v7002_v20 = vpop.f32.mrf.mxu2 }
 0x534   : > { %7496 = vst [vmem:[#allocation131_spill] sm:$0xff] %v7002_v20  ;;  %v7015_v20 = vpop.f32.mrf.mxu3 }
 0x535   : > { %4045 = vmatmul.f32.gmra.mxu3 %v6434_v3  ;;  %v3627_v3 = vadd.f32 %v6238_v19, %v3514_v61  ;;  %v7497_v19 = vld [vmem:[#allocation18_spill] sm:$0xff] }
 0x536   : > { %v3630_v49 = vadd.f32 %v7497_v19, %v3517_v26  ;;  %v4630_v26 = vld [vmem:[#allocation2] sm:$0xff]  ;;  %v7501_v19 = vld [vmem:[#allocation49_spill] sm:$0xff] }
 0x537   : > { %v3740_v32 = vadd.f32 %v6233_v6, %v3627_v3  ;;  %v4629_v6 = vld [vmem:[#allocation3 + $0x4f0] sm:$0xff] }
 0x538   : > { %3896 = vmatmul.f32.gmra.mxu2 %v4627_v25  ;;  %v3743_v3 = vadd.f32 %v7498_v54, %v3630_v49 }
 0x53b   : > { %v3493_v42 = vpop.f32.mrf.mxu2 }
 0x53c   : > { %v7013_v63 = vadd.f32 %v3493_v42, %v3381_v18  ;;  %v7024_v42 = vpop.f32.mrf.mxu0  ;;  %v7029_v34 = vpop.f32.mrf.mxu3 }
 0x53d   : > { %4048 = vmatmul.f32.gmra.mxu3 %v6729_v58  ;;  %v3407_v58 = vadd.f32 %v6794_v60, %v3294_v15  ;;  %v7032_v18 = vpop.f32.mrf.mxu1  ;;  %v7499_v60 = vld [vmem:[#allocation4_spill] sm:$0xff] }
 0x53f   : > { %v3520_v21 = vadd.f32 %v6599_v52, %v3407_v58  ;;  %v4631_v58 = vld [vmem:[#allocation3 + $0x538] sm:$0xff] }
 0x540   : > { %3899 = vmatmul.f32.gmra.mxu2 %v4628_v55 }
 0x543   : > { %v3852_v25 = vpop.f32.mrf.mxu2 }
 0x544   : > { %v3853_v43 = vadd.f32 %v3852_v25, %v3740_v32  ;;  %v7500_v25 = vld [vmem:[#allocation20_spill] sm:$0xff] }
 0x545   : > { %4051 = vmatmul.f32.gmra.mxu3 %v6731_v7  ;;  %v3633_v15 = vadd.f32 %v7500_v25, %v3520_v21 }
 0x546   : > { %v3966_v59 = vadd.f32 %v3965_v41, %v3853_v43 }
 0x548   : > { %v4079_v28 = vadd.f32 %v6895_v40, %v3966_v59  ;;  %3902 = vmatmul.f32.gmra.mxu2 %v4629_v6  ;;  %v3297_v40 = vadd.f32 %v6998_v0, %v7499_v60  ;;  %v7053_v59 = vpop.f32.mrf.mxu3  ;;  %v7502_v6 = vld [vmem:[#allocation19_spill] sm:$0xff] }
 0x54a   : > { %v4192_v61 = vadd.f32 %v6890_v44, %v4079_v28  ;;  %v3410_v52 = vadd.f32 %v6811_v13, %v3297_v40  ;;  %v7047_v44 = vpop.f32.mrf.mxu0  ;;  %v3746_v13 = vadd.f32 %v7502_v6, %v3633_v15  ;;  %v7504_v40 = vld [vmem:[#allocation22_spill] sm:$0xff]  ;;  %v7505_v15 = vld [vmem:[#allocation21_spill] sm:$0xff] }
 0x54b   : > { %v3855_v7 = vpop.f32.mrf.mxu2  ;;  %v7507_v6 = vld [vmem:[#allocation25_spill] sm:$0xff] }
 0x54c   : > { %v4287_v41 = vmax.f32 %v4192_v61, 0.0  ;;  %v3856_v55 = vadd.f32 %v3855_v7, %v3743_v3  ;;  %v3523_v49 = vadd.f32 %v7501_v19, %v3410_v52  ;;  %v7058_v61 = vpop.f32.mrf.mxu1  ;;  %v7503_v3 = vld [vmem:[#allocation5_spill] sm:$0xff]  ;;  %v4632_v52 = vld [vmem:[#allocation3 + $0x580] sm:$0xff] }
 0x54d   : > { %4054 = vmatmul.f32.gmra.mxu3 %v4630_v26 }
 0x54e   : > { %4319 = vst [vmem:[%s7042_s25] sm:$0xff] %v4287_v41  ;;  %v3969_v32 = vadd.f32 %v6976_v29, %v3856_v55  ;;  %v3300_v29 = vadd.f32 %v6998_v0, %v7503_v3  ;;  %v3636_v41 = vadd.f32 %v7504_v40, %v3523_v49  ;;  %v7508_v3 = vld [vmem:[#allocation56_spill] sm:$0xff] }
 0x550   : > { %v4082_v43 = vadd.f32 %v6907_v47, %v3969_v32  ;;  %3905 = vmatmul.f32.gmra.mxu2 %v4631_v58  ;;  %v3413_v47 = vadd.f32 %v6822_v45, %v3300_v29  ;;  %v7506_v58 = vld [vmem:[#allocation6_spill] sm:$0xff] }
 0x552   : > { %v4195_v28 = vadd.f32 %v6899_v48, %v4082_v43  ;;  %v7066_v48 = vpop.f32.mrf.mxu0  ;;  %v3526_v32 = vadd.f32 %v6627_v1, %v3413_v47  ;;  %v7072_v43 = vpop.f32.mrf.mxu3  ;;  %v7509_v47 = vld [vmem:[#allocation23_spill] sm:$0xff] }
 0x553   : > { %v3858_v54 = vpop.f32.mrf.mxu2 }
 0x554   : > { %v4288_v7 = vmax.f32 %v4195_v28, 0.0  ;;  %v3859_v21 = vadd.f32 %v3858_v54, %v3746_v13  ;;  %v7076_v28 = vpop.f32.mrf.mxu1  ;;  %v4633_v54 = vld [vmem:[#allocation3 + $0x5c8] sm:$0xff] }
 0x555   : > { %4057 = vmatmul.f32.gmra.mxu3 %v4630_v26  ;;  %v3749_v26 = vadd.f32 %v7505_v15, %v3636_v41 }
 0x556   : > { %4320 = vst [vmem:[%s7042_s25 + $0x8] sm:$0xff] %v4288_v7  ;;  %v3972_v60 = vadd.f32 %v6982_v14, %v3859_v21  ;;  %v3303_v14 = vadd.f32 %v6998_v0, %v7506_v58 }
 0x558   : > { %v4085_v55 = vadd.f32 %v6920_v24, %v3972_v60  ;;  %3908 = vmatmul.f32.gmra.mxu2 %v4632_v52  ;;  %v3416_v24 = vadd.f32 %v6834_v56, %v3303_v14  ;;  %v7510_v56 = vld [vmem:[#allocation7_spill] sm:$0xff] }
 0x559   : > { %v3306_v41 = vadd.f32 %v6998_v0, %v7510_v56 }
 0x55a   : > { %v4198_v25 = vadd.f32 %v6911_v57, %v4085_v55  ;;  %v3639_v57 = vadd.f32 %v7507_v6, %v3526_v32  ;;  %v3529_v29 = vadd.f32 %v7508_v3, %v3416_v24  ;;  %v7084_v7 = vpop.f32.mrf.mxu0  ;;  %v7090_v52 = vpop.f32.mrf.mxu3 }
 0x55b   : > { %v3861_v45 = vpop.f32.mrf.mxu2 }
 0x55c   : > { %v4289_v19 = vmax.f32 %v4198_v25, 0.0  ;;  %v3862_v49 = vadd.f32 %v3861_v45, %v3749_v26  ;;  %v3752_v60 = vadd.f32 %v7509_v47, %v3639_v57  ;;  %v7511_v25 = vld [vmem:[#allocation27_spill] sm:$0xff]  ;;  %v7096_v26 = vpop.f32.mrf.mxu1  ;;  %v4634_v45 = vld [vmem:[#allocation3 + $0x610] sm:$0xff] }
 0x55d   : > { %v3642_v15 = vadd.f32 %v7511_v25, %v3529_v29  ;;  %v4635_v29 = vld [vmem:[#allocation3 + $0x658] sm:$0xff] }
 0x55e   : > { %4321 = vst [vmem:[%s7042_s25 + $0x10] sm:$0xff] %v4289_v19  ;;  %v3975_v1 = vadd.f32 %v6986_v17, %v3862_v49  ;;  %v7512_v19 = vld [vmem:[#allocation24_spill] sm:$0xff]  ;;  %v7517_v25 = vld [vmem:[#allocation31_spill] sm:$0xff] }
 0x55f   : > { %v3755_v49 = vadd.f32 %v7512_v19, %v3642_v15  ;;  %v4636_v15 = vld [vmem:[#allocation3 + $0x6a0] sm:$0xff] }
 0x560   : > { %v4088_v13 = vadd.f32 %v6931_v37, %v3975_v1  ;;  %3911 = vmatmul.f32.gmra.mxu2 %v4633_v54  ;;  %v3419_v37 = vadd.f32 %v6841_v46, %v3306_v41  ;;  %v7513_v46 = vld [vmem:[#allocation8_spill] sm:$0xff]  ;;  %v7514_v54 = vld [vmem:[#allocation29_spill] sm:$0xff] }
 0x561   : > { %v3309_v1 = vadd.f32 %v6998_v0, %v7513_v46  ;;  %v7516_v41 = vld [vmem:[#allocation9_spill] sm:$0xff] }
 0x562   : > { %v4201_v21 = vadd.f32 %v6923_v5, %v4088_v13  ;;  %v3532_v58 = vadd.f32 %v6653_v53, %v3419_v37  ;;  %v7104_v6 = vpop.f32.mrf.mxu0  ;;  %v7110_v3 = vpop.f32.mrf.mxu3 }
 0x563   : > { %v3864_v40 = vpop.f32.mrf.mxu2  ;;  %v3422_v13 = vadd.f32 %v6852_v10, %v3309_v1 }
 0x564   : > { %v4290_v55 = vmax.f32 %v4201_v21, 0.0  ;;  %v3865_v17 = vadd.f32 %v3864_v40, %v3752_v60  ;;  %v3645_v53 = vadd.f32 %v7514_v54, %v3532_v58  ;;  %v7113_v21 = vpop.f32.mrf.mxu1  ;;  %v7515_v40 = vld [vmem:[#allocation26_spill] sm:$0xff] }
 0x565   : > { %v3535_v47 = vadd.f32 %v6666_v11, %v3422_v13 }
 0x566   : > { %4322 = vst [vmem:[%s7042_s25 + $0x18] sm:$0xff] %v4290_v55  ;;  %v3978_v32 = vadd.f32 %v6990_v22, %v3865_v17  ;;  %v3758_v10 = vadd.f32 %v7515_v40, %v3645_v53 }
 0x567   : > { %v3648_v11 = vadd.f32 %v7517_v25, %v3535_v47  ;;  %v7524_v25 = vld [vmem:[#allocation33_spill] sm:$0xff] }
 0x568   : > { %v4091_v5 = vadd.f32 %v6941_v27, %v3978_v32  ;;  %3914 = vmatmul.f32.gmra.mxu2 %v4634_v45 }
 0x56a   : > { %v4204_v14 = vadd.f32 %v6935_v2, %v4091_v5  ;;  %v7121_v32 = vpop.f32.mrf.mxu0  ;;  %v7127_v5 = vpop.f32.mrf.mxu3 }
 0x56b   : > { %v3867_v24 = vpop.f32.mrf.mxu2 }
 0x56c   : > { %v4291_v22 = vmax.f32 %v4204_v14, 0.0  ;;  %v3868_v57 = vadd.f32 %v3867_v24, %v3755_v49  ;;  %v7518_v14 = vld [vmem:[#allocation28_spill] sm:$0xff]  ;;  %v7132_v19 = vpop.f32.mrf.mxu1  ;;  %v7519_v24 = vld [vmem:[#allocation10_spill] sm:$0xff] }
 0x56e   : > { %4323 = vst [vmem:[%s7042_s25 + $0x20] sm:$0xff] %v4291_v22  ;;  %v3981_v27 = vadd.f32 %v7000_v8, %v3868_v57  ;;  %v3312_v8 = vadd.f32 %v6998_v0, %v7516_v41  ;;  %v7520_v57 = vld [vmem:[#allocation34_spill] sm:$0xff] }
 0x56f   : > { %v7523_v41 = vld [vmem:[#allocation38_spill] sm:$0xff] }
 0x570   : > { %v4094_v2 = vadd.f32 %v6953_v51, %v3981_v27  ;;  %3917 = vmatmul.f32.gmra.mxu2 %v4635_v29  ;;  %v3425_v37 = vadd.f32 %v6860_v23, %v3312_v8  ;;  %v3761_v23 = vadd.f32 %v7518_v14, %v3648_v11  ;;  %v4637_v27 = vld [vmem:[#allocation3 + $0x6e8] sm:$0xff] }
 0x571   : > { %v7526_v14 = vld [vmem:[#allocation41_spill] sm:$0xff] }
 0x572   : > { %v4207_v60 = vadd.f32 %v6946_v30, %v4094_v2  ;;  %v3538_v45 = vadd.f32 %v6677_v38, %v3425_v37  ;;  %v7140_v13 = vpop.f32.mrf.mxu0  ;;  %v7521_v2 = vld [vmem:[#allocation30_spill] sm:$0xff]  ;;  %v7146_v47 = vpop.f32.mrf.mxu3 }
 0x573   : > { %v3870_v56 = vpop.f32.mrf.mxu2 }
 0x574   : > { %v4292_v55 = vmax.f32 %v4207_v60, 0.0  ;;  %v3871_v17 = vadd.f32 %v3870_v56, %v3758_v10  ;;  %v3651_v38 = vadd.f32 %v7520_v57, %v3538_v45  ;;  %v7522_v60 = vld [vmem:[#allocation11_spill] sm:$0xff]  ;;  %v7150_v56 = vpop.f32.mrf.mxu1 }
 0x576   : > { %4324 = vst [vmem:[%s7042_s25 + $0x28] sm:$0xff] %v4292_v55  ;;  %v3984_v51 = vadd.f32 %v7015_v20, %v3871_v17  ;;  %v3315_v20 = vadd.f32 %v6998_v0, %v7519_v24  ;;  %v3764_v29 = vadd.f32 %v7521_v2, %v3651_v38  ;;  %v4638_v55 = vld [vmem:[#allocation3 + $0x730] sm:$0xff]  ;;  %v4639_v24 = vld [vmem:[#allocation3 + $0x778] sm:$0xff]  ;;  %v4640_v2 = vld [vmem:[#allocation3 + $0x7c0] sm:$0xff] }
 0x578   : > { %v4097_v30 = vadd.f32 %v7024_v42, %v3984_v51  ;;  %3920 = vmatmul.f32.gmra.mxu2 %v4636_v15  ;;  %v3428_v42 = vadd.f32 %v6871_v9, %v3315_v20 }
 0x57a   : > { %v4210_v58 = vadd.f32 %v7032_v18, %v4097_v30  ;;  %v3541_v54 = vadd.f32 %v6690_v12, %v3428_v42  ;;  %v7158_v37 = vpop.f32.mrf.mxu0 }
 0x57b   : > { %v3873_v49 = vpop.f32.mrf.mxu2 }
 0x57c   : > { %v4293_v46 = vmax.f32 %v4210_v58, 0.0  ;;  %v3874_v1 = vadd.f32 %v3873_v49, %v3761_v23  ;;  %v7164_v58 = vpop.f32.mrf.mxu3  ;;  %v7170_v49 = vpop.f32.mrf.mxu1 }
 0x57e   : > { %4325 = vst [vmem:[%s7042_s25 + $0x30] sm:$0xff] %v4293_v46  ;;  %v3987_v22 = vadd.f32 %v7029_v34, %v3874_v1  ;;  %v3318_v34 = vadd.f32 %v6998_v0, %v7522_v60  ;;  %v7527_v1 = vld [vmem:[#allocation36_spill] sm:$0xff] }
 0x580   : > { %v4100_v18 = vadd.f32 %v7047_v44, %v3987_v22  ;;  %3923 = vmatmul.f32.gmra.mxu2 %v4637_v27  ;;  %v3431_v44 = vadd.f32 %v6879_v33, %v3318_v34  ;;  %v7525_v33 = vld [vmem:[#allocation12_spill] sm:$0xff] }
 0x581   : > { %v3321_v15 = vadd.f32 %v6998_v0, %v7525_v33  ;;  %v7530_v34 = vld [vmem:[#allocation40_spill] sm:$0xff] }
 0x582   : > { %v4213_v53 = vadd.f32 %v7058_v61, %v4100_v18  ;;  %v3654_v61 = vadd.f32 %v7523_v41, %v3541_v54  ;;  %v3544_v17 = vadd.f32 %v6703_v50, %v3431_v44  ;;  %v7178_v38 = vpop.f32.mrf.mxu0  ;;  %v7529_v54 = vld [vmem:[#allocation44_spill] sm:$0xff] }
 0x583   : > { %v3876_v9 = vpop.f32.mrf.mxu2 }
 0x584   : > { %v4294_v40 = vmax.f32 %v4213_v53, 0.0  ;;  %v3877_v10 = vadd.f32 %v3876_v9, %v3764_v29  ;;  %v3767_v11 = vadd.f32 %v7524_v25, %v3654_v61  ;;  %v3657_v23 = vadd.f32 %v7526_v14, %v3544_v17  ;;  %v7184_v53 = vpop.f32.mrf.mxu3  ;;  %v7187_v29 = vpop.f32.mrf.mxu1  ;;  %v2736_v17 = vld [vmem:[#allocation2 + $0x199] sm:$0xff]  ;;  %v7535_v14 = vld [vmem:[#allocation52_spill] sm:$0xff] }
 0x585   : > { %4167 = vmatmul.f32.gmra.mxu0 %v2736_v17  ;;  %v7546_v17 = vld [vmem:[#allocation59_spill] sm:$0xff] }
 0x586   : > { %4326 = vst [vmem:[%s7042_s25 + $0x38] sm:$0xff] %v4294_v40  ;;  %v3990_v12 = vadd.f32 %v7053_v59, %v3877_v10  ;;  %v3770_v42 = vadd.f32 %v7527_v1, %v3657_v23  ;;  %v7531_v10 = vld [vmem:[#allocation14_spill] sm:$0xff]  ;;  %v7536_v1 = vld [vmem:[#allocation81_spill] sm:$0xff] }
 0x588   : > { %v4103_v8 = vadd.f32 %v7066_v48, %v3990_v12  ;;  %3926 = vmatmul.f32.gmra.mxu2 %v4638_v55  ;;  %v3434_v48 = vadd.f32 %v6888_v31, %v3321_v15  ;;  %v7528_v31 = vld [vmem:[#allocation13_spill] sm:$0xff]  ;;  %v7534_v15 = vld [vmem:[#allocation15_spill] sm:$0xff] }
 0x589   : > { %v3324_v57 = vadd.f32 %v6998_v0, %v7528_v31 }
 0x58a   : > { %v4216_v51 = vadd.f32 %v7076_v28, %v4103_v8  ;;  %v3547_v20 = vadd.f32 %v6733_v36, %v3434_v48  ;;  %v7195_v61 = vpop.f32.mrf.mxu0  ;;  %v7532_v8 = vld [vmem:[#allocation47_spill] sm:$0xff] }
 0x58b   : > { %v3879_v30 = vpop.f32.mrf.mxu2  ;;  %v3437_v27 = vadd.f32 %v6897_v16, %v3324_v57 }
 0x58c   : > { %v4295_v45 = vmax.f32 %v4216_v51, 0.0  ;;  %v3880_v59 = vadd.f32 %v3879_v30, %v3767_v11  ;;  %v3660_v36 = vadd.f32 %v7529_v54, %v3547_v20  ;;  %v7201_v51 = vpop.f32.mrf.mxu3  ;;  %v7533_v11 = vld [vmem:[#allocation43_spill] sm:$0xff]  ;;  %v7206_v33 = vpop.f32.mrf.mxu1  ;;  %v4642_v20 = vld [vmem:[#allocation3 + $0x850] sm:$0xff] }
 0x58d   : > { %v3550_v9 = vadd.f32 %v6756_v39, %v3437_v27 }
 0x58e   : > { %4327 = vst [vmem:[%s7042_s25 + $0x40] sm:$0xff] %v4295_v45  ;;  %v3993_v50 = vadd.f32 %v7072_v43, %v3880_v59  ;;  %v3773_v16 = vadd.f32 %v7530_v34, %v3660_v36  ;;  %v3330_v45 = vadd.f32 %v6998_v0, %v7534_v15  ;;  %v7542_v34 = vld [vmem:[#allocation84_spill] sm:$0xff] }
 0x58f   : > { %v3663_v55 = vadd.f32 %v7532_v8, %v3550_v9 }
 0x590   : > { %v4106_v28 = vadd.f32 %v7084_v7, %v3993_v50  ;;  %3929 = vmatmul.f32.gmra.mxu2 %v4639_v24  ;;  %v3443_v48 = vadd.f32 %v6916_v35, %v3330_v45  ;;  %v7549_v45 = vld [vmem:[#allocation54_spill] sm:$0xff] }
 0x591   : > { %v3776_v30 = vadd.f32 %v7533_v11, %v3663_v55  ;;  %v7547_v11 = vld [vmem:[#allocation76_spill] sm:$0xff] }
 0x592   : > { %v4219_v46 = vadd.f32 %v7096_v26, %v4106_v28  ;;  %v2801_v28 = vld [vmem:[#allocation2 + $0x1a2] sm:$0xff]  ;;  %v3556_v35 = vadd.f32 %v7536_v1, %v3443_v48 }
 0x593   : > { %v3882_v22 = vpop.f32.mrf.mxu2  ;;  %4283 = vmatmul.f32.vlgmr.msrb.gmra.mxu3 %v2801_v28  ;;  %v7550_v48 = vld [vmem:[#allocation35_spill] sm:$0xff] }
 0x594   : > { %v4296_v43 = vmax.f32 %v4219_v46, 0.0  ;;  %v3883_v18 = vadd.f32 %v3882_v22, %v3770_v42  ;;  %v2737_v46 = vld [vmem:[#allocation2 + $0x1a1] sm:$0xff]  ;;  %v7220_v31 = vpop.f32.mrf.mxu3  ;;  %v4239_v54 = vpop.f32.mrf.mxu1 }
 0x595   : > { %4170 = vmatmul.f32.gmra.mxu0 %v2737_v46 }
 0x596   : > { %4328 = vst [vmem:[%s7042_s25 + $0x48] sm:$0xff] %v4296_v43  ;;  %v3996_v7 = vadd.f32 %v7090_v52, %v3883_v18  ;;  %v3327_v52 = vadd.f32 %v6998_v0, %v7531_v10  ;;  %v7538_v43 = vld [vmem:[#allocation16_spill] sm:$0xff] }
 0x597   : > { %v3333_v18 = vadd.f32 %v6998_v0, %v7538_v43 }
 0x598   : > { %v4109_v26 = vadd.f32 %v7104_v6, %v3996_v7  ;;  %3932 = vmatmul.f32.gmra.mxu2 %v4640_v2  ;;  %v3440_v41 = vadd.f32 %v6905_v4, %v3327_v52  ;;  %v7540_v2 = vld [vmem:[#allocation55_spill] sm:$0xff]  ;;  %v7543_v52 = vld [vmem:[#allocation50_spill] sm:$0xff] }
 0x599   : > { %v3669_v9 = vadd.f32 %v7540_v2, %v3556_v35  ;;  %v7553_v35 = vld [vmem:[#allocation90_spill] sm:$0xff] }
 0x59a   : > { %v4222_v60 = vadd.f32 %v7113_v21, %v4109_v26  ;;  %v4641_v21 = vld [vmem:[#allocation3 + $0x808] sm:$0xff]  ;;  %v3553_v25 = vadd.f32 %v6773_v62, %v3440_v41  ;;  %v7544_v41 = vld [vmem:[#allocation32_spill] sm:$0xff]  ;;  %v7557_v2 = vld [vmem:[#allocation66_spill] sm:$0xff] }
 0x59b   : > { %v3885_v40 = vpop.f32.mrf.mxu2  ;;  %v2800_v62 = vld [vmem:[#allocation2 + $0x19a] sm:$0xff] }
 0x59c   : > { %v4297_v44 = vmax.f32 %v4222_v60, 0.0  ;;  %v3886_v12 = vadd.f32 %v3885_v40, %v3773_v16  ;;  %v3666_v23 = vadd.f32 %v7535_v14, %v3553_v25  ;;  %4280 = vmatmul.f32.gmra.mxu1 %v2800_v62  ;;  %v7541_v60 = vld [vmem:[#allocation70_spill] sm:$0xff]  ;;  %v7551_v62 = vld [vmem:[#allocation113_spill] sm:$0xff] }
 0x59e   : > { %4329 = vst [vmem:[%s7042_s25 + $0x50] sm:$0xff] %v4297_v44  ;;  %v3999_v6 = vadd.f32 %v7110_v3, %v3886_v12  ;;  %v3782_v44 = vadd.f32 %v7543_v52, %v3669_v9 }
 0x5a0   : > { %v4112_v39 = vadd.f32 %v7121_v32, %v3999_v6  ;;  %3935 = vmatmul.f32.gmra.mxu2 %v4641_v21  ;;  %v3336_v6 = vadd.f32 %v6998_v0, %v7544_v41  ;;  %v7560_v41 = vld [vmem:[#allocation39_spill] sm:$0xff] }
 0x5a2   : > { %v4225_v4 = vadd.f32 %v7132_v19, %v4112_v39  ;;  %v7214_v19 = vpop.f32.mrf.mxu0  ;;  %v7545_v39 = vld [vmem:[#allocation111_spill] sm:$0xff] }
 0x5a3   : > { %v3888_v3 = vpop.f32.mrf.mxu2  ;;  %v3449_v21 = vadd.f32 %v7545_v39, %v3336_v6  ;;  %v3345_v6 = vadd.f32 %v6998_v0, %v7560_v41  ;;  %v7561_v39 = vld [vmem:[#allocation117_spill] sm:$0xff] }
 0x5a4   : > { %v4298_v59 = vmax.f32 %v4225_v4, 0.0  ;;  %v3889_v32 = vadd.f32 %v3888_v3, %v3776_v30  ;;  %v4242_v4 = vpop.f32.mrf.mxu1  ;;  %v7548_v30 = vld [vmem:[#allocation87_spill] sm:$0xff] }
 0x5a5   : > { %v3562_v3 = vadd.f32 %v7548_v30, %v3449_v21  ;;  %v3458_v21 = vadd.f32 %v7561_v39, %v3345_v6  ;;  %v7564_v30 = vld [vmem:[#allocation64_spill] sm:$0xff]  ;;  %v7576_v6 = vld [vmem:[#allocation122_spill] sm:$0xff] }
 0x5a6   : > { %4330 = vst [vmem:[%s7042_s25 + $0x58] sm:$0xff] %v4298_v59  ;;  %v4002_v50 = vadd.f32 %v7127_v5, %v3889_v32  ;;  %v7537_v5 = vld [vmem:[#allocation46_spill] sm:$0xff] }
 0x5a7   : > { %v3779_v22 = vadd.f32 %v7537_v5, %v3666_v23 }
 0x5a8   : > { %v4115_v24 = vadd.f32 %v7140_v13, %v4002_v50  ;;  %3938 = vmatmul.f32.gmra.mxu2 %v4642_v20  ;;  %v7539_v13 = vld [vmem:[#allocation110_spill] sm:$0xff]  ;;  %v3339_v50 = vadd.f32 %v6998_v0, %v7550_v48 }
 0x5a9   : > { %v3446_v36 = vadd.f32 %v7539_v13, %v3333_v18  ;;  %v7555_v18 = vld [vmem:[#allocation37_spill] sm:$0xff] }
 0x5aa   : > { %v4228_v42 = vadd.f32 %v7150_v56, %v4115_v24  ;;  %v4129_v40 = vpop.f32.mrf.mxu0  ;;  %v3452_v28 = vadd.f32 %v7551_v62, %v3339_v50  ;;  %v7552_v24 = vld [vmem:[#allocation62_spill] sm:$0xff] }
 0x5ab   : > { %v3891_v57 = vpop.f32.mrf.mxu2  ;;  %v3559_v16 = vadd.f32 %v7542_v34, %v3446_v36  ;;  %v3675_v20 = vadd.f32 %v7552_v24, %v3562_v3  ;;  %v7556_v36 = vld [vmem:[#allocation115_spill] sm:$0xff]  ;;  %v7568_v24 = vld [vmem:[#allocation101_spill] sm:$0xff] }
 0x5ac   : > { %v4299_v27 = vmax.f32 %v4228_v42, 0.0  ;;  %v3892_v7 = vadd.f32 %v3891_v57, %v3779_v22  ;;  %v4245_v1 = vpop.f32.mrf.mxu1  ;;  %v3565_v42 = vadd.f32 %v7553_v35, %v3452_v28  ;;  %v7554_v22 = vld [vmem:[#allocation58_spill] sm:$0xff]  ;;  %v7567_v28 = vld [vmem:[#allocation73_spill] sm:$0xff]  ;;  %v7569_v35 = vld [vmem:[#allocation68_spill] sm:$0xff] }
 0x5ad   : > { %v3672_v25 = vadd.f32 %v7546_v17, %v3559_v16  ;;  %v3788_v57 = vadd.f32 %v7554_v22, %v3675_v20  ;;  %v7570_v22 = vld [vmem:[#allocation45_spill] sm:$0xff] }
 0x5ae   : > { %4331 = vst [vmem:[%s7042_s25 + $0x60] sm:$0xff] %v4299_v27  ;;  %v4005_v26 = vadd.f32 %v7146_v47, %v3892_v7  ;;  %v4019_v47 = vpop.f32.mrf.mxu3  ;;  %v3342_v27 = vadd.f32 %v6998_v0, %v7555_v18  ;;  %v3678_v9 = vadd.f32 %v7557_v2, %v3565_v42  ;;  %v7573_v2 = vld [vmem:[#allocation104_spill] sm:$0xff] }
 0x5af   : > { %v3785_v59 = vadd.f32 %v7549_v45, %v3672_v25 }
 0x5b0   : > { %v4118_v56 = vadd.f32 %v7158_v37, %v4005_v26  ;;  %3941 = vmatmul.f32.gmra.mxu2 %v7541_v60  ;;  %v7558_v60 = vld [vmem:[#allocation93_spill] sm:$0xff] }
 0x5b2   : > { %v4231_v10 = vadd.f32 %v7170_v49, %v4118_v56  ;;  %v4132_v14 = vpop.f32.mrf.mxu0 }
 0x5b3   : > { %v3894_v12 = vpop.f32.mrf.mxu2 }
 0x5b4   : > { %v4300_v8 = vmax.f32 %v4231_v10, 0.0  ;;  %v3895_v55 = vadd.f32 %v3894_v12, %v3782_v44  ;;  %v7559_v10 = vld [vmem:[#allocation61_spill] sm:$0xff]  ;;  %v4248_v44 = vpop.f32.mrf.mxu1 }
 0x5b5   : > { %v3791_v52 = vadd.f32 %v7559_v10, %v3678_v9 }
 0x5b6   : > { %4332 = vst [vmem:[%s7042_s25 + $0x68] sm:$0xff] %v4300_v8  ;;  %v4008_v37 = vadd.f32 %v7164_v58, %v3895_v55  ;;  %v4022_v46 = vpop.f32.mrf.mxu3 }
 0x5b8   : > { %v4121_v49 = vadd.f32 %v7178_v38, %v4008_v37  ;;  %3944 = vmatmul.f32.gmra.mxu2 %v7547_v11 }
 0x5ba   : > { %v4234_v15 = vadd.f32 %v7187_v29, %v4121_v49  ;;  %v4135_v26 = vpop.f32.mrf.mxu0 }
 0x5bb   : > { %v3897_v32 = vpop.f32.mrf.mxu2 }
 0x5bc   : > { %v4301_v23 = vmax.f32 %v4234_v15, 0.0  ;;  %v3898_v58 = vadd.f32 %v3897_v32, %v3785_v59  ;;  %v7565_v59 = vld [vmem:[#allocation42_spill] sm:$0xff] }
 0x5bd   : > { %v3348_v32 = vadd.f32 %v6998_v0, %v7565_v59  ;;  %v7581_v59 = vld [vmem:[#allocation124_spill] sm:$0xff] }
 0x5be   : > { %4333 = vst [vmem:[%s7042_s25 + $0x70] sm:$0xff] %v4301_v23  ;;  %v4011_v38 = vadd.f32 %v7184_v53, %v3898_v58  ;;  %v3455_v53 = vadd.f32 %v7556_v36, %v3342_v27  ;;  %v4251_v23 = vpop.f32.mrf.mxu1  ;;  %v7566_v58 = vld [vmem:[#allocation119_spill] sm:$0xff]  ;;  %v7572_v36 = vld [vmem:[#allocation74_spill] sm:$0xff] }
 0x5c0   : > { %v4124_v29 = vadd.f32 %v7195_v61, %v4011_v38  ;;  %v3568_v34 = vadd.f32 %v7558_v60, %v3455_v53 }
 0x5c2   : > { %v4237_v5 = vadd.f32 %v7206_v33, %v4124_v29  ;;  %v4025_v33 = vpop.f32.mrf.mxu3  ;;  %v4138_v17 = vpop.f32.mrf.mxu0 }
 0x5c3   : > { %v3900_v43 = vpop.f32.mrf.mxu2 }
 0x5c4   : > { %v4302_v7 = vmax.f32 %v4237_v5, 0.0  ;;  %v3901_v13 = vadd.f32 %v3900_v43, %v3788_v57  ;;  %v3351_v57 = vadd.f32 %v6998_v0, %v7570_v22  ;;  %v7586_v22 = vld [vmem:[#allocation125_spill] sm:$0xff] }
 0x5c6   : > { %4334 = vst [vmem:[%s7042_s25 + $0x78] sm:$0xff] %v4302_v7  ;;  %v4014_v61 = vadd.f32 %v7201_v51, %v3901_v13  ;;  %v7571_v7 = vld [vmem:[#allocation120_spill] sm:$0xff]  ;;  %v4254_v53 = vpop.f32.mrf.mxu1 }
 0x5c7   : > { %v3464_v13 = vadd.f32 %v7571_v7, %v3351_v57 }
 0x5c8   : > { %v4127_v56 = vadd.f32 %v7214_v19, %v4014_v61  ;;  %v7562_v19 = vld [vmem:[#allocation69_spill] sm:$0xff] }
 0x5c9   : > { %v3681_v37 = vadd.f32 %v7562_v19, %v3568_v34 }
 0x5ca   : > { %v4240_v16 = vadd.f32 %v4239_v54, %v4127_v56  ;;  %v7563_v54 = vld [vmem:[#allocation97_spill] sm:$0xff]  ;;  %v4028_v15 = vpop.f32.mrf.mxu3  ;;  %v4141_v20 = vpop.f32.mrf.mxu0  ;;  %v7574_v56 = vld [vmem:[#allocation72_spill] sm:$0xff] }
 0x5cb   : > { %v3903_v12 = vpop.f32.mrf.mxu2  ;;  %v3571_v49 = vadd.f32 %v7563_v54, %v3458_v21  ;;  %v3794_v3 = vadd.f32 %v7564_v30, %v3681_v37 }
 0x5cc   : > { %v4303_v8 = vmax.f32 %v4240_v16, 0.0  ;;  %v3904_v55 = vadd.f32 %v3903_v12, %v3791_v52  ;;  %v7575_v16 = vld [vmem:[#allocation48_spill] sm:$0xff] }
 0x5cd   : > { %v3354_v10 = vadd.f32 %v6998_v0, %v7575_v16  ;;  %v7591_v16 = vld [vmem:[#allocation126_spill] sm:$0xff] }
 0x5ce   : > { %4335 = vst [vmem:[%s7042_s25 + $0x80] sm:$0xff] %v4303_v8  ;;  %v4017_v51 = vadd.f32 %v7220_v31, %v3904_v55  ;;  %v3461_v31 = vadd.f32 %v7566_v58, %v3348_v32  ;;  %v7577_v55 = vld [vmem:[#allocation77_spill] sm:$0xff] }
 0x5cf   : > { %v3467_v8 = vadd.f32 %v7576_v6, %v3354_v10  ;;  %v7593_v6 = vld [vmem:[#allocation109_spill] sm:$0xff] }
 0x5d0   : > { %v4130_v25 = vadd.f32 %v4129_v40, %v4017_v51  ;;  %v3684_v40 = vadd.f32 %v7567_v28, %v3571_v49  ;;  %v4257_v51 = vpop.f32.mrf.mxu1 }
 0x5d2   : > { %v4243_v11 = vadd.f32 %v4242_v4, %v4130_v25  ;;  %v3574_v4 = vadd.f32 %v7568_v24, %v3461_v31  ;;  %v3797_v42 = vadd.f32 %v7569_v35, %v3684_v40  ;;  %v4031_v27 = vpop.f32.mrf.mxu3  ;;  %v4144_v52 = vpop.f32.mrf.mxu0  ;;  %v7579_v25 = vld [vmem:[#allocation75_spill] sm:$0xff]  ;;  %v7584_v40 = vld [vmem:[#allocation78_spill] sm:$0xff] }
 0x5d3   : > { %v3906_v45 = vpop.f32.mrf.mxu2 }
 0x5d4   : > { %v4304_v48 = vmax.f32 %v4243_v11, 0.0  ;;  %v3907_v50 = vadd.f32 %v3906_v45, %v3794_v3  ;;  %v7580_v11 = vld [vmem:[#allocation51_spill] sm:$0xff] }
 0x5d5   : > { %v3357_v30 = vadd.f32 %v6998_v0, %v7580_v11 }
 0x5d6   : > { %4336 = vst [vmem:[%s7042_s25 + $0x88] sm:$0xff] %v4304_v48  ;;  %v4020_v62 = vadd.f32 %v4019_v47, %v3907_v50  ;;  %v7582_v50 = vld [vmem:[#allocation79_spill] sm:$0xff] }
 0x5d7   : > { %v3470_v32 = vadd.f32 %v7581_v59, %v3357_v30  ;;  %v7597_v30 = vld [vmem:[#allocation88_spill] sm:$0xff] }
 0x5d8   : > { %v4133_v38 = vadd.f32 %v4132_v14, %v4020_v62  ;;  %v3687_v14 = vadd.f32 %v7572_v36, %v3574_v4  ;;  %v7583_v62 = vld [vmem:[#allocation107_spill] sm:$0xff]  ;;  %v4260_v24 = vpop.f32.mrf.mxu1 }
 0x5da   : > { %v4246_v29 = vadd.f32 %v4245_v1, %v4133_v38  ;;  %v3577_v1 = vadd.f32 %v7573_v2, %v3464_v13  ;;  %v3800_v60 = vadd.f32 %v7574_v56, %v3687_v14  ;;  %v7588_v13 = vld [vmem:[#allocation108_spill] sm:$0xff] }
 0x5db   : > { %v3909_v5 = vpop.f32.mrf.mxu2  ;;  %v7589_v14 = vld [vmem:[#allocation80_spill] sm:$0xff] }
 0x5dc   : > { %v4305_v43 = vmax.f32 %v4246_v29, 0.0  ;;  %v3910_v18 = vadd.f32 %v3909_v5, %v3797_v42  ;;  %v3690_v39 = vadd.f32 %v7577_v55, %v3577_v1  ;;  %v7585_v29 = vld [vmem:[#allocation53_spill] sm:$0xff] }
 0x5dd   : > { %v3360_v35 = vadd.f32 %v6998_v0, %v7585_v29  ;;  %v7590_v1 = vld [vmem:[#allocation57_spill] sm:$0xff]  ;;  %v7602_v29 = vld [vmem:[#allocation91_spill] sm:$0xff] }
 0x5de   : > { %4337 = vst [vmem:[%s7042_s25 + $0x90] sm:$0xff] %v4305_v43  ;;  %v4023_v47 = vadd.f32 %v4022_v46, %v3910_v18  ;;  %v3803_v54 = vadd.f32 %v7579_v25, %v3690_v39  ;;  %v7587_v43 = vld [vmem:[#allocation82_spill] sm:$0xff]  ;;  %v7594_v39 = vld [vmem:[#allocation83_spill] sm:$0xff] }
 0x5df   : > { %v3473_v57 = vadd.f32 %v7586_v22, %v3360_v35 }
 0x5e0   : > { %v4136_v61 = vadd.f32 %v4135_v26, %v4023_v47  ;;  %v4034_v26 = vpop.f32.mrf.mxu3 }
 0x5e1   : > { %v3586_v47 = vadd.f32 %v7588_v13, %v3473_v57  ;;  %v7603_v57 = vld [vmem:[#allocation114_spill] sm:$0xff]  ;;  %v7605_v13 = vld [vmem:[#allocation65_spill] sm:$0xff] }
 0x5e2   : > { %v4249_v9 = vadd.f32 %v4248_v44, %v4136_v61  ;;  %v7578_v44 = vld [vmem:[#allocation106_spill] sm:$0xff] }
 0x5e3   : > { %v3912_v34 = vpop.f32.mrf.mxu2  ;;  %v3580_v19 = vadd.f32 %v7578_v44, %v3467_v8  ;;  %v7595_v44 = vld [vmem:[#allocation60_spill] sm:$0xff] }
 0x5e4   : > { %v4306_v12 = vmax.f32 %v4249_v9, 0.0  ;;  %v3913_v41 = vadd.f32 %v3912_v34, %v3800_v60  ;;  %v3363_v9 = vadd.f32 %v6998_v0, %v7590_v1  ;;  %v4263_v34 = vpop.f32.mrf.mxu1 }
 0x5e6   : > { %4338 = vst [vmem:[%s7042_s25 + $0x98] sm:$0xff] %v4306_v12  ;;  %v4026_v46 = vadd.f32 %v4025_v33, %v3913_v41  ;;  %v4147_v33 = vpop.f32.mrf.mxu0  ;;  %v7592_v12 = vld [vmem:[#allocation85_spill] sm:$0xff] }
 0x5e8   : > { %v4139_v21 = vadd.f32 %v4138_v17, %v4026_v46  ;;  %v3693_v17 = vadd.f32 %v7582_v50, %v3580_v19  ;;  %v4037_v31 = vpop.f32.mrf.mxu3  ;;  %v3366_v19 = vadd.f32 %v6998_v0, %v7595_v44  ;;  %v7599_v50 = vld [vmem:[#allocation86_spill] sm:$0xff] }
 0x5ea   : > { %v4252_v37 = vadd.f32 %v4251_v23, %v4139_v21  ;;  %v3583_v23 = vadd.f32 %v7583_v62, %v3470_v32  ;;  %v3806_v38 = vadd.f32 %v7584_v40, %v3693_v17  ;;  %v7598_v32 = vld [vmem:[#allocation112_spill] sm:$0xff]  ;;  %v7600_v62 = vld [vmem:[#allocation63_spill] sm:$0xff] }
 0x5eb   : > { %v3915_v49 = vpop.f32.mrf.mxu2 }
 0x5ec   : > { %v4307_v3 = vmax.f32 %v4252_v37, 0.0  ;;  %v3916_v45 = vadd.f32 %v3915_v49, %v3803_v54  ;;  %v7596_v49 = vld [vmem:[#allocation127_spill] sm:$0xff] }
 0x5ed   : > { %v3479_v11 = vadd.f32 %v7596_v49, %v3366_v19  ;;  %v7612_v19 = vld [vmem:[#allocation96_spill] sm:$0xff]  ;;  %v7613_v49 = vld [vmem:[#allocation118_spill] sm:$0xff] }
 0x5ee   : > { %4339 = vst [vmem:[%s7042_s25 + $0xa0] sm:$0xff] %v4307_v3  ;;  %v4029_v48 = vadd.f32 %v4028_v15, %v3916_v45  ;;  %v4150_v18 = vpop.f32.mrf.mxu0  ;;  %v4266_v45 = vpop.f32.mrf.mxu1 }
 0x5f0   : > { %v4142_v58 = vadd.f32 %v4141_v20, %v4029_v48  ;;  %v3696_v20 = vadd.f32 %v7587_v43, %v3583_v23  ;;  %v4040_v61 = vpop.f32.mrf.mxu3  ;;  %v3369_v23 = vadd.f32 %v6998_v0, %v7600_v62 }
 0x5f2   : > { %v4255_v28 = vadd.f32 %v4254_v53, %v4142_v58  ;;  %v3809_v53 = vadd.f32 %v7589_v14, %v3696_v20  ;;  %v7604_v20 = vld [vmem:[#allocation89_spill] sm:$0xff] }
 0x5f3   : > { %v3918_v4 = vpop.f32.mrf.mxu2 }
 0x5f4   : > { %v4308_v42 = vmax.f32 %v4255_v28, 0.0  ;;  %v3919_v5 = vadd.f32 %v3918_v4, %v3806_v38 }
 0x5f6   : > { %4340 = vst [vmem:[%s7042_s25 + $0xa8] sm:$0xff] %v4308_v42  ;;  %v4032_v15 = vadd.f32 %v4031_v27, %v3919_v5  ;;  %v3476_v27 = vadd.f32 %v7591_v16, %v3363_v9  ;;  %v4153_v46 = vpop.f32.mrf.mxu0  ;;  %v4269_v22 = vpop.f32.mrf.mxu1  ;;  %v7607_v9 = vld [vmem:[#allocation94_spill] sm:$0xff]  ;;  %v7608_v16 = vld [vmem:[#allocation116_spill] sm:$0xff] }
 0x5f8   : > { %v4145_v7 = vadd.f32 %v4144_v52, %v4032_v15  ;;  %v3699_v52 = vadd.f32 %v7592_v12, %v3586_v47  ;;  %v3589_v8 = vadd.f32 %v7593_v6, %v3476_v27  ;;  %v4043_v54 = vpop.f32.mrf.mxu3  ;;  %v3372_v47 = vadd.f32 %v6998_v0, %v7605_v13  ;;  %v7609_v12 = vld [vmem:[#allocation92_spill] sm:$0xff]  ;;  %v7621_v13 = vld [vmem:[#allocation123_spill] sm:$0xff] }
 0x5fa   : > { %v4258_v36 = vadd.f32 %v4257_v51, %v4145_v7  ;;  %v3812_v21 = vadd.f32 %v7594_v39, %v3699_v52  ;;  %v3702_v3 = vadd.f32 %v7597_v30, %v3589_v8  ;;  %v7610_v8 = vld [vmem:[#allocation67_spill] sm:$0xff] }
 0x5fb   : > { %v3921_v2 = vpop.f32.mrf.mxu2  ;;  %v7614_v30 = vld [vmem:[#allocation95_spill] sm:$0xff] }
 0x5fc   : > { %v4309_v56 = vmax.f32 %v4258_v36, 0.0  ;;  %v3922_v60 = vadd.f32 %v3921_v2, %v3809_v53  ;;  %v3815_v17 = vadd.f32 %v7599_v50, %v3702_v3  ;;  %v7606_v53 = vld [vmem:[#allocation129_spill] sm:$0xff] }
 0x5fd   : > { %v3485_v2 = vadd.f32 %v7606_v53, %v3372_v47  ;;  %v3607_v47 = vadd.f32 %v7621_v13, %v7013_v63 }
 0x5fe   : > { %4341 = vst [vmem:[%s7042_s25 + $0xb0] sm:$0xff] %v4309_v56  ;;  %v4035_v10 = vadd.f32 %v4034_v26, %v3922_v60  ;;  %v4156_v28 = vpop.f32.mrf.mxu0 }
 0x5ff   : > { %v3598_v27 = vadd.f32 %v7608_v16, %v3485_v2 }
 0x600   : > { %v4148_v41 = vadd.f32 %v4147_v33, %v4035_v10  ;;  %v3592_v33 = vadd.f32 %v7598_v32, %v3479_v11  ;;  %v4046_v42 = vpop.f32.mrf.mxu3  ;;  %v7615_v32 = vld [vmem:[#allocation71_spill] sm:$0xff] }
 0x602   : > { %v4261_v55 = vadd.f32 %v4260_v24, %v4148_v41  ;;  %v7601_v24 = vld [vmem:[#allocation128_spill] sm:$0xff]  ;;  %v3705_v35 = vadd.f32 %v7602_v29, %v3592_v33  ;;  %v4272_v41 = vpop.f32.mrf.mxu1  ;;  %v3378_v33 = vadd.f32 %v6998_v0, %v7615_v32 }
 0x603   : > { %v3924_v51 = vpop.f32.mrf.mxu2  ;;  %v3482_v4 = vadd.f32 %v7601_v24, %v3369_v23  ;;  %v7618_v24 = vld [vmem:[#allocation121_spill] sm:$0xff] }
 0x604   : > { %v4310_v37 = vmax.f32 %v4261_v55, 0.0  ;;  %v3925_v25 = vadd.f32 %v3924_v51, %v3812_v21  ;;  %v7611_v21 = vld [vmem:[#allocation130_spill] sm:$0xff] }
 0x605   : > { %v3595_v15 = vadd.f32 %v7603_v57, %v3482_v4 }
 0x606   : > { %4342 = vst [vmem:[%s7042_s25 + $0xb8] sm:$0xff] %v4310_v37  ;;  %v4038_v26 = vadd.f32 %v4037_v31, %v3925_v25  ;;  %v3711_v37 = vadd.f32 %v7612_v19, %v3598_v27 }
 0x607   : > { %v3708_v56 = vadd.f32 %v7607_v9, %v3595_v15 }
 0x608   : > { %v4151_v59 = vadd.f32 %v4150_v18, %v4038_v26  ;;  %v3818_v18 = vadd.f32 %v7604_v20, %v3705_v35  ;;  %v3824_v3 = vadd.f32 %v7614_v30, %v3711_v37  ;;  %v7619_v35 = vld [vmem:[#allocation98_spill] sm:$0xff] }
 0x609   : > { %v3821_v52 = vadd.f32 %v7609_v12, %v3708_v56 }
 0x60a   : > { %v4264_v48 = vadd.f32 %v4263_v34, %v4151_v59  ;;  %v4049_v34 = vpop.f32.mrf.mxu3 }
 0x60b   : > { %v3927_v58 = vpop.f32.mrf.mxu2 }
 0x60c   : > { %v4311_v40 = vmax.f32 %v4264_v48, 0.0  ;;  %v3928_v38 = vadd.f32 %v3927_v58, %v3815_v17  ;;  %v4275_v17 = vpop.f32.mrf.mxu1  ;;  %v7616_v58 = vld [vmem:[#allocation131_spill] sm:$0xff] }
 0x60d   : > { %v3491_v62 = vadd.f32 %v7616_v58, %v3378_v33 }
 0x60e   : > { %4343 = vst [vmem:[%s7042_s25 + $0xc0] sm:$0xff] %v4311_v40  ;;  %v4041_v31 = vadd.f32 %v4040_v61, %v3928_v38  ;;  %v4159_v61 = vpop.f32.mrf.mxu0 }
 0x60f   : > { %v3604_v4 = vadd.f32 %v7618_v24, %v3491_v62 }
 0x610   : > { %v4154_v5 = vadd.f32 %v4153_v46, %v4041_v31  ;;  %v3375_v46 = vadd.f32 %v6998_v0, %v7610_v8 }
 0x612   : > { %v4267_v43 = vadd.f32 %v4266_v45, %v4154_v5  ;;  %v3488_v51 = vadd.f32 %v7611_v21, %v3375_v46  ;;  %v4052_v45 = vpop.f32.mrf.mxu3 }
 0x613   : > { %v3930_v7 = vpop.f32.mrf.mxu2 }
 0x614   : > { %v4312_v36 = vmax.f32 %v4267_v43, 0.0  ;;  %v3931_v14 = vadd.f32 %v3930_v7, %v3818_v18  ;;  %v3601_v11 = vadd.f32 %v7613_v49, %v3488_v51  ;;  %v7620_v43 = vld [vmem:[#allocation102_spill] sm:$0xff]  ;;  %v4278_v18 = vpop.f32.mrf.mxu1 }
 0x615   : > { %v3717_v20 = vadd.f32 %v7620_v43, %v3604_v4 }
 0x616   : > { %4344 = vst [vmem:[%s7042_s25 + $0xc8] sm:$0xff] %v4312_v36  ;;  %v4044_v1 = vadd.f32 %v4043_v54, %v3931_v14  ;;  %v4162_v25 = vpop.f32.mrf.mxu0  ;;  %v7622_v14 = vld [vmem:[#allocation100_spill] sm:$0xff] }
 0x617   : > { %v3830_v53 = vadd.f32 %v7622_v14, %v3717_v20 }
 0x618   : > { %v4157_v60 = vadd.f32 %v4156_v28, %v4044_v1  ;;  %v7617_v28 = vld [vmem:[#allocation99_spill] sm:$0xff] }
 0x619   : > { %v3714_v40 = vadd.f32 %v7617_v28, %v3601_v11 }
 0x61a   : > { %v4270_v10 = vadd.f32 %v4269_v22, %v4157_v60  ;;  %v4055_v22 = vpop.f32.mrf.mxu3 }
 0x61b   : > { %v3933_v6 = vpop.f32.mrf.mxu2 }
 0x61c   : > { %v4313_v55 = vmax.f32 %v4270_v10, 0.0  ;;  %v3934_v39 = vadd.f32 %v3933_v6, %v3821_v52  ;;  %v4281_v27 = vpop.f32.mrf.mxu1  ;;  %v7624_v52 = vld [vmem:[#allocation103_spill] sm:$0xff] }
 0x61e   : > { %4345 = vst [vmem:[%s7042_s25 + $0xd0] sm:$0xff] %v4313_v55  ;;  %v4047_v44 = vadd.f32 %v4046_v42, %v3934_v39  ;;  %v4165_v31 = vpop.f32.mrf.mxu0  ;;  %v3827_v42 = vadd.f32 %v7619_v35, %v3714_v40 }
 0x620   : > { %v4160_v54 = vadd.f32 %v4159_v61, %v4047_v44 }
 0x622   : > { %v4273_v26 = vadd.f32 %v4272_v41, %v4160_v54  ;;  %v4058_v56 = vpop.f32.mrf.mxu3 }
 0x623   : > { %v3936_v59 = vpop.f32.mrf.mxu2 }
 0x624   : > { %v4314_v48 = vmax.f32 %v4273_v26, 0.0  ;;  %v3937_v50 = vadd.f32 %v3936_v59, %v3824_v3 }
 0x626   : > { %4346 = vst [vmem:[%s7042_s25 + $0xd8] sm:$0xff] %v4314_v48  ;;  %v4050_v23 = vadd.f32 %v4049_v34, %v3937_v50  ;;  %v4168_v61 = vpop.f32.mrf.mxu0  ;;  %v7623_v34 = vld [vmem:[#allocation105_spill] sm:$0xff] }
 0x627   : > { %v3720_v16 = vadd.f32 %v7623_v34, %v3607_v47 }
 0x628   : > { %v4163_v38 = vadd.f32 %v4162_v25, %v4050_v23 }
 0x629   : > { %v3833_v41 = vadd.f32 %v7624_v52, %v3720_v16 }
 0x62a   : > { %v4276_v29 = vadd.f32 %v4275_v17, %v4163_v38  ;;  %v4284_v39 = vpop.f32.mrf.mxu3 }
 0x62b   : > { %v3939_v5 = vpop.f32.mrf.mxu2 }
 0x62c   : > { %v4315_v0 = vmax.f32 %v4276_v29, 0.0  ;;  %v3940_v57 = vadd.f32 %v3939_v5, %v3827_v42 }
 0x62e   : > { %4347 = vst [vmem:[%s7042_s25 + $0xe0] sm:$0xff] %v4315_v0  ;;  %v4053_v15 = vadd.f32 %v4052_v45, %v3940_v57  ;;  %v4171_v46 = vpop.f32.mrf.mxu0 }
 0x630   : > { %v4166_v7 = vadd.f32 %v4165_v31, %v4053_v15 }
 0x632   : > { %v4279_v36 = vadd.f32 %v4278_v18, %v4166_v7 }
 0x633   : > { %v3942_v2 = vpop.f32.mrf.mxu2 }
 0x634   : > { %v4316_v1 = vmax.f32 %v4279_v36, 0.0  ;;  %v3943_v9 = vadd.f32 %v3942_v2, %v3830_v53 }
 0x636   : > { %4348 = vst [vmem:[%s7042_s25 + $0xe8] sm:$0xff] %v4316_v1  ;;  %v4056_v60 = vadd.f32 %v4055_v22, %v3943_v9 }
 0x638   : > { %v4169_v10 = vadd.f32 %v4168_v61, %v4056_v60 }
 0x63a   : > { %v4282_v12 = vadd.f32 %v4281_v27, %v4169_v10 }
 0x63b   : > { %v3945_v63 = vpop.f32.mrf.mxu2 }
 0x63c   : > { %v4317_v6 = vmax.f32 %v4282_v12, 0.0  ;;  %v3946_v8 = vadd.f32 %v3945_v63, %v3833_v41 }
 0x63e   : > { %4349 = vst [vmem:[%s7042_s25 + $0xf0] sm:$0xff] %v4317_v6  ;;  %v4059_v55 = vadd.f32 %v4058_v56, %v3946_v8 }
 0x640   : > { %v4172_v21 = vadd.f32 %v4171_v46, %v4059_v55 }
 0x642   : > { %v4285_v51 = vadd.f32 %v4284_v39, %v4172_v21 }
 0x644   : > { %v4318_v44 = vmax.f32 %v4285_v51, 0.0 }
 0x646   : > { %4350 = vst [vmem:[%s7042_s25 + $0xf8] sm:$0xff] %v4318_v44 }
 0x647 PF: > { %s15_s18 = sadd.s32 1, %s4649_s18  }
 0x648   : > { %p12_p4 = scmp.ge.s32.totalorder %s15_s18, 4  }
 0x64a   :  { %14 = sbr.rel (!%p12_p4) target bundleno = 1 (0x1), region = 73 }

</bundles_post_ra>
